<compile_context>
chip_gen: v5e
topology: v5e:2x2
jax: 0.10.0
libtpu: 0.0.40
codegen_flags: <defaults>
</compile_context>

<pallas_src>
import functools

import jax
import jax.numpy as jnp
from jax.experimental import pallas as pl
from jax.experimental.pallas import tpu as pltpu


def _whole_array_spec(shape):
    ndim = len(shape)

    def index_map(*_):
        return (0,) * ndim

    return pl.BlockSpec(tuple(shape), index_map)


_PER_LAYER = 7   # gconv_w, gconv_b, R, W_T, b, att_w, att_b


# ----------------------------------------------------------------------------
# Fused decoder kernel: all TSRN cell layers + gated projection head, one call
# ----------------------------------------------------------------------------

def make_decoder_kernel(*, B, N, D, P, L, PRE_K, PRE_V, S, KDIFF):
    nm = S * KDIFF + 1

    def kernel(*refs):
        x_ref, hx_ref, sup_ref = refs[0], refs[1], refs[2]
        base = 3
        layer_refs = [refs[base + l * _PER_LAYER: base + (l + 1) * _PER_LAYER]
                      for l in range(L)]
        whead_ref = refs[base + L * _PER_LAYER + 0]
        bhead_ref = refs[base + L * _PER_LAYER + 1]
        proj_ref = refs[base + L * _PER_LAYER + 2]
        hxout_ref = refs[base + L * _PER_LAYER + 3]
        xcat_ref = refs[base + L * _PER_LAYER + 4]     # (B*N, max xcat width) VMEM

        sup = [sup_ref[s] for s in range(S)]            # hoisted (N, N) supports

        x = x_ref[...]                                  # (B, N, P) layer-0 input
        outall = None
        for l in range(L):
            (gw_ref, gb_ref, r_ref, wt_ref, bb_ref,
             attw_ref, attb_ref) = layer_refs[l]
            in_l = x.shape[-1]
            F = in_l + D                                # per-term feature width
            hx_l = hx_ref[l]                            # (B, PRE_K, N, D)

            # aggregate the last pre_v hidden states
            pre_h = hx_l[:, PRE_K - 1]
            for i in range(1, PRE_V):
                pre_h = pre_h + hx_l[:, PRE_K - 1 - i]  # (B, N, D)

            # ---- assemble ALL Chebyshev diffusion terms into one xcat slab.
            # Column order matches the fused gconv weight: term-major, and inside
            # each term [input-track (in_l) | hidden-track (D)].  Only the tiny
            # (N, N) support products remain per-batch.
            for b in range(B):
                r0, r1 = b * N, (b + 1) * N
                xi, xh = x[b], pre_h[b]
                xcat_ref[r0:r1, 0:in_l] = xi
                xcat_ref[r0:r1, in_l:F] = xh
                for s in range(S):
                    xi_km2, xh_km2 = xi, xh
                    xi_k = jnp.dot(sup[s], xi, preferred_element_type=jnp.float32)
                    xh_k = jnp.dot(sup[s], xh, preferred_element_type=jnp.float32)
                    t = s * KDIFF + 1
                    xcat_ref[r0:r1, t * F:t * F + in_l] = xi_k
                    xcat_ref[r0:r1, t * F + in_l:(t + 1) * F] = xh_k
                    for k in range(2, KDIFF + 1):
                        xi_k2 = 2.0 * jnp.dot(
                            sup[s], xi_k, preferred_element_type=jnp.float32) - xi_km2
                        xh_k2 = 2.0 * jnp.dot(
                            sup[s], xh_k, preferred_element_type=jnp.float32) - xh_km2
                        t = s * KDIFF + k
                        xcat_ref[r0:r1, t * F:t * F + in_l] = xi_k2
                        xcat_ref[r0:r1, t * F + in_l:(t + 1) * F] = xh_k2
                        xi_km2, xi_k = xi_k, xi_k2
                        xh_km2, xh_k = xh_k, xh_k2

            # ---- ONE large-K MXU matmul for the whole graph convolution
            xcat = xcat_ref[:, 0:nm * F]                # (B*N, nm*F)
            conv = (jnp.dot(xcat, gw_ref[...], preferred_element_type=jnp.float32)
                    + gb_ref[...])
            conv = jnp.where(conv > 0, conv, 0.01 * conv)   # leaky_relu, slope 0.01
            conv3 = conv.reshape(B, N, D)

            # ---- per-node linear, vectorized on the VPU:
            #      out[b, n, :] = conv[b, n, :] @ W[n]   (W fed pre-transposed (D, N, D))
            # No MXU pushes, no masked single-row stores, no scratch round trip.
            out_lin = conv3[:, :, 0:1] * wt_ref[0] + bb_ref[...]
            for d in range(1, D):
                out_lin = out_lin + conv3[:, :, d:d + 1] * wt_ref[d]   # (B, N, D)

            # ---- attention over the pre_k states (exact softmax; PRE_K is tiny)
            attw = attw_ref[0]                          # (N, D)
            attb = attb_ref[...]                        # (1, 1, 1)
            ns, sc = [], []
            for k in range(PRE_K):
                ns_k = hx_l[:, k] + r_ref[k]            # (B, N, D)
                ns.append(ns_k)
                s_k = jnp.sum(jnp.sum(ns_k * attw, axis=2, keepdims=True),
                              axis=1, keepdims=True)    # (B, 1, 1)
                sc.append(s_k + attb)
            m = sc[0]
            for k in range(1, PRE_K):
                m = jnp.maximum(m, sc[k])
            es = [jnp.exp(s_k - m) for s_k in sc]
            den = es[0]
            for k in range(1, PRE_K):
                den = den + es[k]
            inv = 1.0 / den                             # exact divide (tight tolerance)
            att = ns[0] * (es[0] * inv)
            for k in range(1, PRE_K):
                att = att + ns[k] * (es[k] * inv)
            out3 = out_lin + att                        # (B, N, D)

            # ---- rolling hx_k state update (output aliases the hx_k input)
            for k in range(PRE_K - 1):
                hxout_ref[l, :, k] = hx_l[:, k + 1]
            hxout_ref[l, :, PRE_K - 1] = out3

            x = out3
            outall = out3 if l == 0 else outall + out3

        # ---- gated projection head: fused (D, 3P) weight -> one MXU dot, slice + gate
        h = outall.reshape(B * N, D)
        z = (jnp.dot(h, whead_ref[...], preferred_element_type=jnp.float32)
             + bhead_ref[...])
        a1 = jax.nn.sigmoid(z[:, 0:P])
        px = z[:, P:2 * P]
        py = z[:, 2 * P:3 * P]
        proj_ref[...] = (a1 * px + (1.0 - a1) * py).reshape(B, N, P)

    return kernel


# ----------------------------------------------------------------------------
# DecoderModel forward (wrapper: layout plumbing + single pallas_call)
# ----------------------------------------------------------------------------

def decoder_forward(params, supports, inputs, hx_k, *, num_nodes, rnn_units,
                    output_dim, num_rnn_layers, pre_k, pre_v, max_diffusion_step):
    """
    inputs: (B, num_nodes * output_dim)
    hx_k  : (num_layers, B, pre_k, num_nodes, rnn_units)
    returns (projected, stacked hx_k, output) as in the PyTorch module.
    """
    B = inputs.shape[0]
    N, D, P, L = num_nodes, rnn_units, output_dim, num_rnn_layers
    S = supports.shape[0]
    nm = S * max_diffusion_step + 1

    # wrapper-side layout plumbing only (reshape / weight transpose, no compute)
    x = inputs.reshape(B, N, P)

    flat_inputs = [x, hx_k, supports]
    for cell in params['cells']:
        flat_inputs += [cell['gconv_w'], cell['gconv_b'], cell['R'],
                        jnp.transpose(cell['W'], (1, 0, 2)),   # (D, N, D) for the kernel
                        cell['b'], cell['att_w'], cell['att_b']]
    flat_inputs += [params['head_w'], params['head_b']]

    widths = [nm * ((P if l == 0 else D) + D) for l in range(L)]
    xcat_w = max(widths)

    kernel = make_decoder_kernel(B=B, N=N, D=D, P=P, L=L, PRE_K=pre_k,
                                 PRE_V=pre_v, S=S, KDIFF=max_diffusion_step)

    out_shapes = (jax.ShapeDtypeStruct((B, N, P), jnp.float32),
                  jax.ShapeDtypeStruct((L, B, pre_k, N, D), jnp.float32))
    out_specs = (_whole_array_spec((B, N, P)),
                 _whole_array_spec((L, B, pre_k, N, D)))
    in_specs = [_whole_array_spec(a.shape) for a in flat_inputs]

    projected, hx_new = pl.pallas_call(
        kernel,
        out_shape=out_shapes,
        in_specs=in_specs,
        out_specs=out_specs,
        scratch_shapes=[pltpu.VMEM((B * N, xcat_w), jnp.float32)],
        input_output_aliases={1: 1},     # hx_k rolled in place (donate at jit to realize)
        compiler_params=pltpu.CompilerParams(vmem_limit_bytes=32 * 1024 * 1024),
    )(*flat_inputs)

    return projected, hx_new, projected   # `output` is a view of projected


# ----------------------------------------------------------------------------
# Pure-JAX reference (same math, exact softmax) for a tolerance check
# ----------------------------------------------------------------------------

def decoder_forward_reference(params, supports, inputs, hx_k, *, num_nodes,
                              rnn_units, output_dim, num_rnn_layers, pre_k,
                              pre_v, max_diffusion_step):
    B = inputs.shape[0]
    N, D, P, L = num_nodes, rnn_units, output_dim, num_rnn_layers
    S = supports.shape[0]
    output = inputs.reshape(B, N, P)
    hx_new = []
    outall = None
    for l in range(L):
        cell = params['cells'][l]
        hx = hx_k[l]                                    # (B, PRE_K, N, D)
        pre_h = hx[:, -1]
        for i in range(1, pre_v):
            pre_h = pre_h + hx[:, -(i + 1)]
        x0 = jnp.concatenate([output, pre_h], axis=-1)  # (B, N, in+D)
        terms = [x0]
        for s in range(S):
            tkm2 = x0
            tk = jnp.einsum('mn,bnf->bmf', supports[s], x0)
            terms.append(tk)
            for _ in range(2, max_diffusion_step + 1):
                tk2 = 2.0 * jnp.einsum('mn,bnf->bmf', supports[s], tk) - tkm2
                terms.append(tk2)
                tkm2, tk = tk, tk2
        xcat = jnp.concatenate(terms, axis=-1)          # (B, N, nm*(in+D))
        conv = jnp.einsum('bnf,fe->bne', xcat, cell['gconv_w']) + cell['gconv_b']
        conv = jnp.where(conv > 0, conv, 0.01 * conv)
        out_lin = jnp.einsum('bnd,nde->bne', conv, cell['W']) + cell['b']
        new_states = hx + cell['R'][None]               # (B, PRE_K, N, D)
        scores = (jnp.sum(new_states * cell['att_w'][None], axis=(2, 3), keepdims=True)
                  + cell['att_b'][None])
        weight = jax.nn.softmax(scores, axis=1)
        out = out_lin + jnp.sum(new_states * weight, axis=1)
        hx_new.append(jnp.concatenate([hx[:, 1:], out[:, None]], axis=1))
        output = out
        outall = out if l == 0 else outall + out
    h = outall.reshape(B * N, D)
    z = h @ params['head_w'] + params['head_b']
    a1 = jax.nn.sigmoid(z[:, :P])
    px = z[:, P:2 * P]
    py = z[:, 2 * P:3 * P]
    proj = (a1 * px + (1.0 - a1) * py).reshape(B, N, P)
    return proj, jnp.stack(hx_new), proj


# ----------------------------------------------------------------------------
# Deterministic parameter / support construction
# ----------------------------------------------------------------------------

def make_params(key, *, num_nodes, rnn_units, output_dim, num_rnn_layers,
                pre_k, num_supports, max_diffusion_step):
    N, D, P = num_nodes, rnn_units, output_dim
    nm = num_supports * max_diffusion_step + 1
    keys = jax.random.split(key, 3 + 4 * num_rnn_layers)
    kit = iter(keys)

    def normal(k, shape, scale=0.05):
        return scale * jax.random.normal(k, shape, dtype=jnp.float32)

    # head linears stored transposed: (in_features, out_features); fused a|x|y
    wa = normal(next(kit), (D, P))
    wx = normal(next(kit), (D, P))
    wy = normal(next(kit), (D, P))
    params = {
        'head_w': jnp.concatenate([wa, wx, wy], axis=1),        # (D, 3P)
        'head_b': jnp.zeros((1, 3 * P), jnp.float32),
        'cells': [],
    }
    for layer in range(num_rnn_layers):
        in_dim = P if layer == 0 else D
        cell = {
            # fused gconv weight: rows term-major, [input-block | hidden-block] per term
            'gconv_w': normal(next(kit), (nm * (in_dim + D), D)),
            'gconv_b': jnp.full((1, D), 1.0, jnp.float32),       # bias_start = 1.0
            'R':       normal(next(kit), (pre_k, N, D)),
            'W':       normal(next(kit), (N, D, D)),
            'b':       jnp.zeros((N, D), jnp.float32),
            'att_w':   normal(next(kit), (1, N, D)),
            'att_b':   jnp.zeros((1, 1, 1), jnp.float32),
        }
        params['cells'].append(cell)
    return params


def make_supports(key, num_nodes):
    """dual_random_walk-style supports built from a deterministic random adjacency."""
    adj = jax.random.uniform(key, (num_nodes, num_nodes), dtype=jnp.float32)
    adj = adj + jnp.eye(num_nodes, dtype=jnp.float32)
    fwd = adj / jnp.sum(adj, axis=1, keepdims=True)             # D^-1 A
    bwd = adj.T / jnp.sum(adj.T, axis=1, keepdims=True)         # D^-1 A^T
    return jnp.stack([fwd, bwd])                                # (S, N, N)


# ----------------------------------------------------------------------------
# main
# ----------------------------------------------------------------------------

if __name__ == "__main__":
    # small, module-consistent configuration
    B = 2            # batch
    N = 8            # num_nodes (multiple of 8 so batch<->row reshapes are free)
    D = 32           # rnn_units
    P = 2            # output_dim (== decoder input_dim)
    L = 2            # num_rnn_layers
    PRE_K = 3
    PRE_V = 2
    KDIFF = 2        # max_diffusion_step

    root = jax.random.PRNGKey(0)
    k_adj, k_par, k_in, k_hx = jax.random.split(root, 4)

    supports = make_supports(k_adj, N)
    params = make_params(k_par, num_nodes=N, rnn_units=D, output_dim=P,
                         num_rnn_layers=L, pre_k=PRE_K,
                         num_supports=supports.shape[0], max_diffusion_step=KDIFF)

    inputs = jax.random.normal(k_in, (B, N * P), dtype=jnp.float32)
    hx_k = jax.random.normal(k_hx, (L, B, PRE_K, N, D), dtype=jnp.float32)

    cfg = dict(num_nodes=N, rnn_units=D, output_dim=P, num_rnn_layers=L,
               pre_k=PRE_K, pre_v=PRE_V, max_diffusion_step=KDIFF)
    fwd = jax.jit(functools.partial(decoder_forward, **cfg))
    ref = jax.jit(functools.partial(decoder_forward_reference, **cfg))

    projected, new_hx_k, output = fwd(params, supports, inputs, hx_k)
    jax.block_until_ready((projected, new_hx_k, output))

    assert projected.shape == (B, N, P)
    assert new_hx_k.shape == (L, B, PRE_K, N, D)
    assert output.shape == (B, N, P)

    # tolerance check vs pure-JAX reference (exact softmax now -> 25x tighter than
    # before; remaining slack only covers MXU f32-emulation / reduction-order diffs)
    proj_r, hx_r, _ = ref(params, supports, inputs, hx_k)
    jax.block_until_ready((proj_r, hx_r))
    assert jnp.allclose(projected, proj_r, atol=2e-3, rtol=2e-3)
    assert jnp.allclose(new_hx_k, hx_r, atol=2e-3, rtol=2e-3)

    print("KERNEL_OK")
</pallas_src>

<mosaic_0001>
module attributes {stable_mosaic.version = 11 : i64} {
  func.func @kernel(%arg0: memref<2x8x2xf32, #tpu.memory_space<vmem>>, %arg1: memref<2x2x3x8x32xf32, #tpu.memory_space<vmem>>, %arg2: memref<2x8x8xf32, #tpu.memory_space<vmem>>, %arg3: memref<170x32xf32, #tpu.memory_space<vmem>>, %arg4: memref<1x32xf32, #tpu.memory_space<vmem>>, %arg5: memref<3x8x32xf32, #tpu.memory_space<vmem>>, %arg6: memref<32x8x32xf32, #tpu.memory_space<vmem>>, %arg7: memref<8x32xf32, #tpu.memory_space<vmem>>, %arg8: memref<1x8x32xf32, #tpu.memory_space<vmem>>, %arg9: memref<1x1x1xf32, #tpu.memory_space<vmem>>, %arg10: memref<320x32xf32, #tpu.memory_space<vmem>>, %arg11: memref<1x32xf32, #tpu.memory_space<vmem>>, %arg12: memref<3x8x32xf32, #tpu.memory_space<vmem>>, %arg13: memref<32x8x32xf32, #tpu.memory_space<vmem>>, %arg14: memref<8x32xf32, #tpu.memory_space<vmem>>, %arg15: memref<1x8x32xf32, #tpu.memory_space<vmem>>, %arg16: memref<1x1x1xf32, #tpu.memory_space<vmem>>, %arg17: memref<32x6xf32, #tpu.memory_space<vmem>>, %arg18: memref<1x6xf32, #tpu.memory_space<vmem>>, %arg19: memref<2x8x2xf32, #tpu.memory_space<vmem>>, %arg20: memref<2x2x3x8x32xf32, #tpu.memory_space<vmem>>, %arg21: memref<16x320xf32, #tpu.memory_space<vmem>>) attributes {dimension_semantics = [], scalar_prefetch = 0 : i64, scratch_operands = 1 : i64, tpu.core_type = #tpu.core_type<tc>} {
    %c0 = arith.constant 0 : index
    %c0_0 = arith.constant 0 : index
    %c0_1 = arith.constant 0 : index
    %0 = vector.load %arg2[%c0, %c0_0, %c0_1] : memref<2x8x8xf32, #tpu.memory_space<vmem>>, vector<1x8x8xf32>
    %1 = vector.shape_cast %0 : vector<1x8x8xf32> to vector<8x8xf32>
    %c1 = arith.constant 1 : index
    %c0_2 = arith.constant 0 : index
    %c0_3 = arith.constant 0 : index
    %2 = vector.load %arg2[%c1, %c0_2, %c0_3] : memref<2x8x8xf32, #tpu.memory_space<vmem>>, vector<1x8x8xf32>
    %3 = vector.shape_cast %2 : vector<1x8x8xf32> to vector<8x8xf32>
    %c0_4 = arith.constant 0 : index
    %c0_5 = arith.constant 0 : index
    %c0_6 = arith.constant 0 : index
    %4 = vector.load %arg0[%c0_4, %c0_5, %c0_6] : memref<2x8x2xf32, #tpu.memory_space<vmem>>, vector<2x8x2xf32>
    %c0_7 = arith.constant 0 : index
    %c0_8 = arith.constant 0 : index
    %c0_9 = arith.constant 0 : index
    %c0_10 = arith.constant 0 : index
    %c0_11 = arith.constant 0 : index
    %5 = vector.load %arg1[%c0_7, %c0_8, %c0_9, %c0_10, %c0_11] : memref<2x2x3x8x32xf32, #tpu.memory_space<vmem>>, vector<1x2x3x8x32xf32>
    %6 = vector.shape_cast %5 : vector<1x2x3x8x32xf32> to vector<2x3x8x32xf32>
    %7 = vector.extract_strided_slice %6 {offsets = [0, 2, 0, 0], sizes = [2, 1, 8, 32], strides = [1, 1, 1, 1]} : vector<2x3x8x32xf32> to vector<2x1x8x32xf32>
    %8 = vector.shape_cast %7 : vector<2x1x8x32xf32> to vector<2x8x32xf32>
    %9 = vector.extract_strided_slice %6 {offsets = [0, 1, 0, 0], sizes = [2, 1, 8, 32], strides = [1, 1, 1, 1]} : vector<2x3x8x32xf32> to vector<2x1x8x32xf32>
    %10 = vector.shape_cast %9 : vector<2x1x8x32xf32> to vector<2x8x32xf32>
    %11 = arith.addf %8, %10 : vector<2x8x32xf32>
    %12 = vector.extract_strided_slice %4 {offsets = [0, 0, 0], sizes = [1, 8, 2], strides = [1, 1, 1]} : vector<2x8x2xf32> to vector<1x8x2xf32>
    %13 = vector.shape_cast %12 : vector<1x8x2xf32> to vector<8x2xf32>
    %14 = vector.extract_strided_slice %11 {offsets = [0, 0, 0], sizes = [1, 8, 32], strides = [1, 1, 1]} : vector<2x8x32xf32> to vector<1x8x32xf32>
    %15 = vector.shape_cast %14 : vector<1x8x32xf32> to vector<8x32xf32>
    %c0_12 = arith.constant 0 : index
    %c0_13 = arith.constant 0 : index
    %16 = vector.load %arg21[%c0_12, %c0_13] : memref<16x320xf32, #tpu.memory_space<vmem>>, vector<8x2xf32>
    tpu.vector_store %arg21[%c0_12, %c0_13], %13 {strides = array<i32>} : memref<16x320xf32, #tpu.memory_space<vmem>>, vector<8x2xf32>,
    %c0_14 = arith.constant 0 : index
    %c2 = arith.constant 2 : index
    %17 = vector.load %arg21[%c0_14, %c2] : memref<16x320xf32, #tpu.memory_space<vmem>>, vector<8x32xf32>
    tpu.vector_store %arg21[%c0_14, %c2], %15 {strides = array<i32>} : memref<16x320xf32, #tpu.memory_space<vmem>>, vector<8x32xf32>,
    %cst = arith.constant dense<0.000000e+00> : vector<8x2xf32>
    %18 = tpu.matmul %1, %13, %cst {dimension_numbers = #tpu.dot_dimension_numbers<[1], [0], [0], [1], [0, 0, 1, 1], [], []>} : vector<8x8xf32>, vector<8x2xf32>, vector<8x2xf32> -> vector<8x2xf32>
    %cst_15 = arith.constant dense<0.000000e+00> : vector<8x32xf32>
    %19 = tpu.matmul %1, %15, %cst_15 {dimension_numbers = #tpu.dot_dimension_numbers<[1], [0], [0], [1], [0, 0, 1, 1], [], []>} : vector<8x8xf32>, vector<8x32xf32>, vector<8x32xf32> -> vector<8x32xf32>
    %c0_16 = arith.constant 0 : index
    %c34 = arith.constant 34 : index
    %20 = vector.load %arg21[%c0_16, %c34] : memref<16x320xf32, #tpu.memory_space<vmem>>, vector<8x2xf32>
    tpu.vector_store %arg21[%c0_16, %c34], %18 {strides = array<i32>} : memref<16x320xf32, #tpu.memory_space<vmem>>, vector<8x2xf32>,
    %c0_17 = arith.constant 0 : index
    %c36 = arith.constant 36 : index
    %21 = vector.load %arg21[%c0_17, %c36] : memref<16x320xf32, #tpu.memory_space<vmem>>, vector<8x32xf32>
    tpu.vector_store %arg21[%c0_17, %c36], %19 {strides = array<i32>} : memref<16x320xf32, #tpu.memory_space<vmem>>, vector<8x32xf32>,
    %cst_18 = arith.constant dense<0.000000e+00> : vector<8x2xf32>
    %22 = tpu.matmul %1, %18, %cst_18 {dimension_numbers = #tpu.dot_dimension_numbers<[1], [0], [0], [1], [0, 0, 1, 1], [], []>} : vector<8x8xf32>, vector<8x2xf32>, vector<8x2xf32> -> vector<8x2xf32>
    %cst_19 = arith.constant 2.000000e+00 : f32
    %23 = vector.broadcast %cst_19 : f32 to vector<8x2xf32>
    %24 = arith.mulf %23, %22 : vector<8x2xf32>
    %25 = arith.subf %24, %13 : vector<8x2xf32>
    %cst_20 = arith.constant dense<0.000000e+00> : vector<8x32xf32>
    %26 = tpu.matmul %1, %19, %cst_20 {dimension_numbers = #tpu.dot_dimension_numbers<[1], [0], [0], [1], [0, 0, 1, 1], [], []>} : vector<8x8xf32>, vector<8x32xf32>, vector<8x32xf32> -> vector<8x32xf32>
    %cst_21 = arith.constant 2.000000e+00 : f32
    %27 = vector.broadcast %cst_21 : f32 to vector<8x32xf32>
    %28 = arith.mulf %27, %26 : vector<8x32xf32>
    %29 = arith.subf %28, %15 : vector<8x32xf32>
    %c0_22 = arith.constant 0 : index
    %c68 = arith.constant 68 : index
    %30 = vector.load %arg21[%c0_22, %c68] : memref<16x320xf32, #tpu.memory_space<vmem>>, vector<8x2xf32>
    tpu.vector_store %arg21[%c0_22, %c68], %25 {strides = array<i32>} : memref<16x320xf32, #tpu.memory_space<vmem>>, vector<8x2xf32>,
    %c0_23 = arith.constant 0 : index
    %c70 = arith.constant 70 : index
    %31 = vector.load %arg21[%c0_23, %c70] : memref<16x320xf32, #tpu.memory_space<vmem>>, vector<8x32xf32>
    tpu.vector_store %arg21[%c0_23, %c70], %29 {strides = array<i32>} : memref<16x320xf32, #tpu.memory_space<vmem>>, vector<8x32xf32>,
    %cst_24 = arith.constant dense<0.000000e+00> : vector<8x2xf32>
    %32 = tpu.matmul %3, %13, %cst_24 {dimension_numbers = #tpu.dot_dimension_numbers<[1], [0], [0], [1], [0, 0, 1, 1], [], []>} : vector<8x8xf32>, vector<8x2xf32>, vector<8x2xf32> -> vector<8x2xf32>
    %cst_25 = arith.constant dense<0.000000e+00> : vector<8x32xf32>
    %33 = tpu.matmul %3, %15, %cst_25 {dimension_numbers = #tpu.dot_dimension_numbers<[1], [0], [0], [1], [0, 0, 1, 1], [], []>} : vector<8x8xf32>, vector<8x32xf32>, vector<8x32xf32> -> vector<8x32xf32>
    %c0_26 = arith.constant 0 : index
    %c102 = arith.constant 102 : index
    %34 = vector.load %arg21[%c0_26, %c102] : memref<16x320xf32, #tpu.memory_space<vmem>>, vector<8x2xf32>
    tpu.vector_store %arg21[%c0_26, %c102], %32 {strides = array<i32>} : memref<16x320xf32, #tpu.memory_space<vmem>>, vector<8x2xf32>,
    %c0_27 = arith.constant 0 : index
    %c104 = arith.constant 104 : index
    %35 = vector.load %arg21[%c0_27, %c104] : memref<16x320xf32, #tpu.memory_space<vmem>>, vector<8x32xf32>
    tpu.vector_store %arg21[%c0_27, %c104], %33 {strides = array<i32>} : memref<16x320xf32, #tpu.memory_space<vmem>>, vector<8x32xf32>,
    %cst_28 = arith.constant dense<0.000000e+00> : vector<8x2xf32>
    %36 = tpu.matmul %3, %32, %cst_28 {dimension_numbers = #tpu.dot_dimension_numbers<[1], [0], [0], [1], [0, 0, 1, 1], [], []>} : vector<8x8xf32>, vector<8x2xf32>, vector<8x2xf32> -> vector<8x2xf32>
    %cst_29 = arith.constant 2.000000e+00 : f32
    %37 = vector.broadcast %cst_29 : f32 to vector<8x2xf32>
    %38 = arith.mulf %37, %36 : vector<8x2xf32>
    %39 = arith.subf %38, %13 : vector<8x2xf32>
    %cst_30 = arith.constant dense<0.000000e+00> : vector<8x32xf32>
    %40 = tpu.matmul %3, %33, %cst_30 {dimension_numbers = #tpu.dot_dimension_numbers<[1], [0], [0], [1], [0, 0, 1, 1], [], []>} : vector<8x8xf32>, vector<8x32xf32>, vector<8x32xf32> -> vector<8x32xf32>
    %cst_31 = arith.constant 2.000000e+00 : f32
    %41 = vector.broadcast %cst_31 : f32 to vector<8x32xf32>
    %42 = arith.mulf %41, %40 : vector<8x32xf32>
    %43 = arith.subf %42, %15 : vector<8x32xf32>
    %c0_32 = arith.constant 0 : index
    %c136 = arith.constant 136 : index
    %44 = vector.load %arg21[%c0_32, %c136] : memref<16x320xf32, #tpu.memory_space<vmem>>, vector<8x2xf32>
    tpu.vector_store %arg21[%c0_32, %c136], %39 {strides = array<i32>} : memref<16x320xf32, #tpu.memory_space<vmem>>, vector<8x2xf32>,
    %c0_33 = arith.constant 0 : index
    %c138 = arith.constant 138 : index
    %45 = vector.load %arg21[%c0_33, %c138] : memref<16x320xf32, #tpu.memory_space<vmem>>, vector<8x32xf32>
    tpu.vector_store %arg21[%c0_33, %c138], %43 {strides = array<i32>} : memref<16x320xf32, #tpu.memory_space<vmem>>, vector<8x32xf32>,
    %46 = vector.extract_strided_slice %4 {offsets = [1, 0, 0], sizes = [1, 8, 2], strides = [1, 1, 1]} : vector<2x8x2xf32> to vector<1x8x2xf32>
    %47 = vector.shape_cast %46 : vector<1x8x2xf32> to vector<8x2xf32>
    %48 = vector.extract_strided_slice %11 {offsets = [1, 0, 0], sizes = [1, 8, 32], strides = [1, 1, 1]} : vector<2x8x32xf32> to vector<1x8x32xf32>
    %49 = vector.shape_cast %48 : vector<1x8x32xf32> to vector<8x32xf32>
    %c8 = arith.constant 8 : index
    %c0_34 = arith.constant 0 : index
    %50 = vector.load %arg21[%c8, %c0_34] : memref<16x320xf32, #tpu.memory_space<vmem>>, vector<8x2xf32>
    tpu.vector_store %arg21[%c8, %c0_34], %47 {strides = array<i32>} : memref<16x320xf32, #tpu.memory_space<vmem>>, vector<8x2xf32>,
    %c8_35 = arith.constant 8 : index
    %c2_36 = arith.constant 2 : index
    %51 = vector.load %arg21[%c8_35, %c2_36] : memref<16x320xf32, #tpu.memory_space<vmem>>, vector<8x32xf32>
    tpu.vector_store %arg21[%c8_35, %c2_36], %49 {strides = array<i32>} : memref<16x320xf32, #tpu.memory_space<vmem>>, vector<8x32xf32>,
    %cst_37 = arith.constant dense<0.000000e+00> : vector<8x2xf32>
    %52 = tpu.matmul %1, %47, %cst_37 {dimension_numbers = #tpu.dot_dimension_numbers<[1], [0], [0], [1], [0, 0, 1, 1], [], []>} : vector<8x8xf32>, vector<8x2xf32>, vector<8x2xf32> -> vector<8x2xf32>
    %cst_38 = arith.constant dense<0.000000e+00> : vector<8x32xf32>
    %53 = tpu.matmul %1, %49, %cst_38 {dimension_numbers = #tpu.dot_dimension_numbers<[1], [0], [0], [1], [0, 0, 1, 1], [], []>} : vector<8x8xf32>, vector<8x32xf32>, vector<8x32xf32> -> vector<8x32xf32>
    %c8_39 = arith.constant 8 : index
    %c34_40 = arith.constant 34 : index
    %54 = vector.load %arg21[%c8_39, %c34_40] : memref<16x320xf32, #tpu.memory_space<vmem>>, vector<8x2xf32>
    tpu.vector_store %arg21[%c8_39, %c34_40], %52 {strides = array<i32>} : memref<16x320xf32, #tpu.memory_space<vmem>>, vector<8x2xf32>,
    %c8_41 = arith.constant 8 : index
    %c36_42 = arith.constant 36 : index
    %55 = vector.load %arg21[%c8_41, %c36_42] : memref<16x320xf32, #tpu.memory_space<vmem>>, vector<8x32xf32>
    tpu.vector_store %arg21[%c8_41, %c36_42], %53 {strides = array<i32>} : memref<16x320xf32, #tpu.memory_space<vmem>>, vector<8x32xf32>,
    %cst_43 = arith.constant dense<0.000000e+00> : vector<8x2xf32>
    %56 = tpu.matmul %1, %52, %cst_43 {dimension_numbers = #tpu.dot_dimension_numbers<[1], [0], [0], [1], [0, 0, 1, 1], [], []>} : vector<8x8xf32>, vector<8x2xf32>, vector<8x2xf32> -> vector<8x2xf32>
    %cst_44 = arith.constant 2.000000e+00 : f32
    %57 = vector.broadcast %cst_44 : f32 to vector<8x2xf32>
    %58 = arith.mulf %57, %56 : vector<8x2xf32>
    %59 = arith.subf %58, %47 : vector<8x2xf32>
    %cst_45 = arith.constant dense<0.000000e+00> : vector<8x32xf32>
    %60 = tpu.matmul %1, %53, %cst_45 {dimension_numbers = #tpu.dot_dimension_numbers<[1], [0], [0], [1], [0, 0, 1, 1], [], []>} : vector<8x8xf32>, vector<8x32xf32>, vector<8x32xf32> -> vector<8x32xf32>
    %cst_46 = arith.constant 2.000000e+00 : f32
    %61 = vector.broadcast %cst_46 : f32 to vector<8x32xf32>
    %62 = arith.mulf %61, %60 : vector<8x32xf32>
    %63 = arith.subf %62, %49 : vector<8x32xf32>
    %c8_47 = arith.constant 8 : index
    %c68_48 = arith.constant 68 : index
    %64 = vector.load %arg21[%c8_47, %c68_48] : memref<16x320xf32, #tpu.memory_space<vmem>>, vector<8x2xf32>
    tpu.vector_store %arg21[%c8_47, %c68_48], %59 {strides = array<i32>} : memref<16x320xf32, #tpu.memory_space<vmem>>, vector<8x2xf32>,
    %c8_49 = arith.constant 8 : index
    %c70_50 = arith.constant 70 : index
    %65 = vector.load %arg21[%c8_49, %c70_50] : memref<16x320xf32, #tpu.memory_space<vmem>>, vector<8x32xf32>
    tpu.vector_store %arg21[%c8_49, %c70_50], %63 {strides = array<i32>} : memref<16x320xf32, #tpu.memory_space<vmem>>, vector<8x32xf32>,
    %cst_51 = arith.constant dense<0.000000e+00> : vector<8x2xf32>
    %66 = tpu.matmul %3, %47, %cst_51 {dimension_numbers = #tpu.dot_dimension_numbers<[1], [0], [0], [1], [0, 0, 1, 1], [], []>} : vector<8x8xf32>, vector<8x2xf32>, vector<8x2xf32> -> vector<8x2xf32>
    %cst_52 = arith.constant dense<0.000000e+00> : vector<8x32xf32>
    %67 = tpu.matmul %3, %49, %cst_52 {dimension_numbers = #tpu.dot_dimension_numbers<[1], [0], [0], [1], [0, 0, 1, 1], [], []>} : vector<8x8xf32>, vector<8x32xf32>, vector<8x32xf32> -> vector<8x32xf32>
    %c8_53 = arith.constant 8 : index
    %c102_54 = arith.constant 102 : index
    %68 = vector.load %arg21[%c8_53, %c102_54] : memref<16x320xf32, #tpu.memory_space<vmem>>, vector<8x2xf32>
    tpu.vector_store %arg21[%c8_53, %c102_54], %66 {strides = array<i32>} : memref<16x320xf32, #tpu.memory_space<vmem>>, vector<8x2xf32>,
    %c8_55 = arith.constant 8 : index
    %c104_56 = arith.constant 104 : index
    %69 = vector.load %arg21[%c8_55, %c104_56] : memref<16x320xf32, #tpu.memory_space<vmem>>, vector<8x32xf32>
    tpu.vector_store %arg21[%c8_55, %c104_56], %67 {strides = array<i32>} : memref<16x320xf32, #tpu.memory_space<vmem>>, vector<8x32xf32>,
    %cst_57 = arith.constant dense<0.000000e+00> : vector<8x2xf32>
    %70 = tpu.matmul %3, %66, %cst_57 {dimension_numbers = #tpu.dot_dimension_numbers<[1], [0], [0], [1], [0, 0, 1, 1], [], []>} : vector<8x8xf32>, vector<8x2xf32>, vector<8x2xf32> -> vector<8x2xf32>
    %cst_58 = arith.constant 2.000000e+00 : f32
    %71 = vector.broadcast %cst_58 : f32 to vector<8x2xf32>
    %72 = arith.mulf %71, %70 : vector<8x2xf32>
    %73 = arith.subf %72, %47 : vector<8x2xf32>
    %cst_59 = arith.constant dense<0.000000e+00> : vector<8x32xf32>
    %74 = tpu.matmul %3, %67, %cst_59 {dimension_numbers = #tpu.dot_dimension_numbers<[1], [0], [0], [1], [0, 0, 1, 1], [], []>} : vector<8x8xf32>, vector<8x32xf32>, vector<8x32xf32> -> vector<8x32xf32>
    %cst_60 = arith.constant 2.000000e+00 : f32
    %75 = vector.broadcast %cst_60 : f32 to vector<8x32xf32>
    %76 = arith.mulf %75, %74 : vector<8x32xf32>
    %77 = arith.subf %76, %49 : vector<8x32xf32>
    %c8_61 = arith.constant 8 : index
    %c136_62 = arith.constant 136 : index
    %78 = vector.load %arg21[%c8_61, %c136_62] : memref<16x320xf32, #tpu.memory_space<vmem>>, vector<8x2xf32>
    tpu.vector_store %arg21[%c8_61, %c136_62], %73 {strides = array<i32>} : memref<16x320xf32, #tpu.memory_space<vmem>>, vector<8x2xf32>,
    %c8_63 = arith.constant 8 : index
    %c138_64 = arith.constant 138 : index
    %79 = vector.load %arg21[%c8_63, %c138_64] : memref<16x320xf32, #tpu.memory_space<vmem>>, vector<8x32xf32>
    tpu.vector_store %arg21[%c8_63, %c138_64], %77 {strides = array<i32>} : memref<16x320xf32, #tpu.memory_space<vmem>>, vector<8x32xf32>,
    %c0_65 = arith.constant 0 : index
    %c0_66 = arith.constant 0 : index
    %80 = vector.load %arg21[%c0_65, %c0_66] : memref<16x320xf32, #tpu.memory_space<vmem>>, vector<16x170xf32>
    %c0_67 = arith.constant 0 : index
    %c0_68 = arith.constant 0 : index
    %81 = vector.load %arg3[%c0_67, %c0_68] : memref<170x32xf32, #tpu.memory_space<vmem>>, vector<170x32xf32>
    %cst_69 = arith.constant dense<0.000000e+00> : vector<16x32xf32>
    %82 = tpu.matmul %80, %81, %cst_69 {dimension_numbers = #tpu.dot_dimension_numbers<[1], [0], [0], [1], [0, 0, 1, 1], [], []>} : vector<16x170xf32>, vector<170x32xf32>, vector<16x32xf32> -> vector<16x32xf32>
    %c0_70 = arith.constant 0 : index
    %c0_71 = arith.constant 0 : index
    %83 = vector.load %arg4[%c0_70, %c0_71] : memref<1x32xf32, #tpu.memory_space<vmem>>, vector<1x32xf32>
    %84 = vector.broadcast %83 : vector<1x32xf32> to vector<16x32xf32>
    %85 = arith.addf %82, %84 : vector<16x32xf32>
    %cst_72 = arith.constant 0.000000e+00 : f32
    %86 = vector.broadcast %cst_72 : f32 to vector<16x32xf32>
    %87 = arith.cmpf ogt, %85, %86 : vector<16x32xf32>
    %cst_73 = arith.constant 0.00999999977 : f32
    %88 = vector.broadcast %cst_73 : f32 to vector<16x32xf32>
    %89 = arith.mulf %88, %85 : vector<16x32xf32>
    %90 = arith.select %87, %85, %89 : vector<16x32xi1>, vector<16x32xf32>
    %91 = vector.shape_cast %90 : vector<16x32xf32> to vector<2x8x32xf32>
    %92 = vector.extract_strided_slice %91 {offsets = [0, 0, 0], sizes = [2, 8, 1], strides = [1, 1, 1]} : vector<2x8x32xf32> to vector<2x8x1xf32>
    %c0_74 = arith.constant 0 : index
    %c0_75 = arith.constant 0 : index
    %c0_76 = arith.constant 0 : index
    %93 = vector.load %arg6[%c0_74, %c0_75, %c0_76] : memref<32x8x32xf32, #tpu.memory_space<vmem>>, vector<1x8x32xf32>
    %94 = vector.shape_cast %93 : vector<1x8x32xf32> to vector<8x32xf32>
    %95 = vector.shape_cast %94 : vector<8x32xf32> to vector<1x8x32xf32>
    %96 = vector.broadcast %92 : vector<2x8x1xf32> to vector<2x8x32xf32>
    %97 = vector.broadcast %95 : vector<1x8x32xf32> to vector<2x8x32xf32>
    %98 = arith.mulf %96, %97 : vector<2x8x32xf32>
    %c0_77 = arith.constant 0 : index
    %c0_78 = arith.constant 0 : index
    %99 = vector.load %arg7[%c0_77, %c0_78] : memref<8x32xf32, #tpu.memory_space<vmem>>, vector<8x32xf32>
    %100 = vector.shape_cast %99 : vector<8x32xf32> to vector<1x8x32xf32>
    %101 = vector.broadcast %100 : vector<1x8x32xf32> to vector<2x8x32xf32>
    %102 = arith.addf %98, %101 : vector<2x8x32xf32>
    %103 = vector.extract_strided_slice %91 {offsets = [0, 0, 1], sizes = [2, 8, 1], strides = [1, 1, 1]} : vector<2x8x32xf32> to vector<2x8x1xf32>
    %c1_79 = arith.constant 1 : index
    %c0_80 = arith.constant 0 : index
    %c0_81 = arith.constant 0 : index
    %104 = vector.load %arg6[%c1_79, %c0_80, %c0_81] : memref<32x8x32xf32, #tpu.memory_space<vmem>>, vector<1x8x32xf32>
    %105 = vector.shape_cast %104 : vector<1x8x32xf32> to vector<8x32xf32>
    %106 = vector.shape_cast %105 : vector<8x32xf32> to vector<1x8x32xf32>
    %107 = vector.broadcast %103 : vector<2x8x1xf32> to vector<2x8x32xf32>
    %108 = vector.broadcast %106 : vector<1x8x32xf32> to vector<2x8x32xf32>
    %109 = arith.mulf %107, %108 : vector<2x8x32xf32>
    %110 = arith.addf %102, %109 : vector<2x8x32xf32>
    %111 = vector.extract_strided_slice %91 {offsets = [0, 0, 2], sizes = [2, 8, 1], strides = [1, 1, 1]} : vector<2x8x32xf32> to vector<2x8x1xf32>
    %c2_82 = arith.constant 2 : index
    %c0_83 = arith.constant 0 : index
    %c0_84 = arith.constant 0 : index
    %112 = vector.load %arg6[%c2_82, %c0_83, %c0_84] : memref<32x8x32xf32, #tpu.memory_space<vmem>>, vector<1x8x32xf32>
    %113 = vector.shape_cast %112 : vector<1x8x32xf32> to vector<8x32xf32>
    %114 = vector.shape_cast %113 : vector<8x32xf32> to vector<1x8x32xf32>
    %115 = vector.broadcast %111 : vector<2x8x1xf32> to vector<2x8x32xf32>
    %116 = vector.broadcast %114 : vector<1x8x32xf32> to vector<2x8x32xf32>
    %117 = arith.mulf %115, %116 : vector<2x8x32xf32>
    %118 = arith.addf %110, %117 : vector<2x8x32xf32>
    %119 = vector.extract_strided_slice %91 {offsets = [0, 0, 3], sizes = [2, 8, 1], strides = [1, 1, 1]} : vector<2x8x32xf32> to vector<2x8x1xf32>
    %c3 = arith.constant 3 : index
    %c0_85 = arith.constant 0 : index
    %c0_86 = arith.constant 0 : index
    %120 = vector.load %arg6[%c3, %c0_85, %c0_86] : memref<32x8x32xf32, #tpu.memory_space<vmem>>, vector<1x8x32xf32>
    %121 = vector.shape_cast %120 : vector<1x8x32xf32> to vector<8x32xf32>
    %122 = vector.shape_cast %121 : vector<8x32xf32> to vector<1x8x32xf32>
    %123 = vector.broadcast %119 : vector<2x8x1xf32> to vector<2x8x32xf32>
    %124 = vector.broadcast %122 : vector<1x8x32xf32> to vector<2x8x32xf32>
    %125 = arith.mulf %123, %124 : vector<2x8x32xf32>
    %126 = arith.addf %118, %125 : vector<2x8x32xf32>
    %127 = vector.extract_strided_slice %91 {offsets = [0, 0, 4], sizes = [2, 8, 1], strides = [1, 1, 1]} : vector<2x8x32xf32> to vector<2x8x1xf32>
    %c4 = arith.constant 4 : index
    %c0_87 = arith.constant 0 : index
    %c0_88 = arith.constant 0 : index
    %128 = vector.load %arg6[%c4, %c0_87, %c0_88] : memref<32x8x32xf32, #tpu.memory_space<vmem>>, vector<1x8x32xf32>
    %129 = vector.shape_cast %128 : vector<1x8x32xf32> to vector<8x32xf32>
    %130 = vector.shape_cast %129 : vector<8x32xf32> to vector<1x8x32xf32>
    %131 = vector.broadcast %127 : vector<2x8x1xf32> to vector<2x8x32xf32>
    %132 = vector.broadcast %130 : vector<1x8x32xf32> to vector<2x8x32xf32>
    %133 = arith.mulf %131, %132 : vector<2x8x32xf32>
    %134 = arith.addf %126, %133 : vector<2x8x32xf32>
    %135 = vector.extract_strided_slice %91 {offsets = [0, 0, 5], sizes = [2, 8, 1], strides = [1, 1, 1]} : vector<2x8x32xf32> to vector<2x8x1xf32>
    %c5 = arith.constant 5 : index
    %c0_89 = arith.constant 0 : index
    %c0_90 = arith.constant 0 : index
    %136 = vector.load %arg6[%c5, %c0_89, %c0_90] : memref<32x8x32xf32, #tpu.memory_space<vmem>>, vector<1x8x32xf32>
    %137 = vector.shape_cast %136 : vector<1x8x32xf32> to vector<8x32xf32>
    %138 = vector.shape_cast %137 : vector<8x32xf32> to vector<1x8x32xf32>
    %139 = vector.broadcast %135 : vector<2x8x1xf32> to vector<2x8x32xf32>
    %140 = vector.broadcast %138 : vector<1x8x32xf32> to vector<2x8x32xf32>
    %141 = arith.mulf %139, %140 : vector<2x8x32xf32>
    %142 = arith.addf %134, %141 : vector<2x8x32xf32>
    %143 = vector.extract_strided_slice %91 {offsets = [0, 0, 6], sizes = [2, 8, 1], strides = [1, 1, 1]} : vector<2x8x32xf32> to vector<2x8x1xf32>
    %c6 = arith.constant 6 : index
    %c0_91 = arith.constant 0 : index
    %c0_92 = arith.constant 0 : index
    %144 = vector.load %arg6[%c6, %c0_91, %c0_92] : memref<32x8x32xf32, #tpu.memory_space<vmem>>, vector<1x8x32xf32>
    %145 = vector.shape_cast %144 : vector<1x8x32xf32> to vector<8x32xf32>
    %146 = vector.shape_cast %145 : vector<8x32xf32> to vector<1x8x32xf32>
    %147 = vector.broadcast %143 : vector<2x8x1xf32> to vector<2x8x32xf32>
    %148 = vector.broadcast %146 : vector<1x8x32xf32> to vector<2x8x32xf32>
    %149 = arith.mulf %147, %148 : vector<2x8x32xf32>
    %150 = arith.addf %142, %149 : vector<2x8x32xf32>
    %151 = vector.extract_strided_slice %91 {offsets = [0, 0, 7], sizes = [2, 8, 1], strides = [1, 1, 1]} : vector<2x8x32xf32> to vector<2x8x1xf32>
    %c7 = arith.constant 7 : index
    %c0_93 = arith.constant 0 : index
    %c0_94 = arith.constant 0 : index
    %152 = vector.load %arg6[%c7, %c0_93, %c0_94] : memref<32x8x32xf32, #tpu.memory_space<vmem>>, vector<1x8x32xf32>
    %153 = vector.shape_cast %152 : vector<1x8x32xf32> to vector<8x32xf32>
    %154 = vector.shape_cast %153 : vector<8x32xf32> to vector<1x8x32xf32>
    %155 = vector.broadcast %151 : vector<2x8x1xf32> to vector<2x8x32xf32>
    %156 = vector.broadcast %154 : vector<1x8x32xf32> to vector<2x8x32xf32>
    %157 = arith.mulf %155, %156 : vector<2x8x32xf32>
    %158 = arith.addf %150, %157 : vector<2x8x32xf32>
    %159 = vector.extract_strided_slice %91 {offsets = [0, 0, 8], sizes = [2, 8, 1], strides = [1, 1, 1]} : vector<2x8x32xf32> to vector<2x8x1xf32>
    %c8_95 = arith.constant 8 : index
    %c0_96 = arith.constant 0 : index
    %c0_97 = arith.constant 0 : index
    %160 = vector.load %arg6[%c8_95, %c0_96, %c0_97] : memref<32x8x32xf32, #tpu.memory_space<vmem>>, vector<1x8x32xf32>
    %161 = vector.shape_cast %160 : vector<1x8x32xf32> to vector<8x32xf32>
    %162 = vector.shape_cast %161 : vector<8x32xf32> to vector<1x8x32xf32>
    %163 = vector.broadcast %159 : vector<2x8x1xf32> to vector<2x8x32xf32>
    %164 = vector.broadcast %162 : vector<1x8x32xf32> to vector<2x8x32xf32>
    %165 = arith.mulf %163, %164 : vector<2x8x32xf32>
    %166 = arith.addf %158, %165 : vector<2x8x32xf32>
    %167 = vector.extract_strided_slice %91 {offsets = [0, 0, 9], sizes = [2, 8, 1], strides = [1, 1, 1]} : vector<2x8x32xf32> to vector<2x8x1xf32>
    %c9 = arith.constant 9 : index
    %c0_98 = arith.constant 0 : index
    %c0_99 = arith.constant 0 : index
    %168 = vector.load %arg6[%c9, %c0_98, %c0_99] : memref<32x8x32xf32, #tpu.memory_space<vmem>>, vector<1x8x32xf32>
    %169 = vector.shape_cast %168 : vector<1x8x32xf32> to vector<8x32xf32>
    %170 = vector.shape_cast %169 : vector<8x32xf32> to vector<1x8x32xf32>
    %171 = vector.broadcast %167 : vector<2x8x1xf32> to vector<2x8x32xf32>
    %172 = vector.broadcast %170 : vector<1x8x32xf32> to vector<2x8x32xf32>
    %173 = arith.mulf %171, %172 : vector<2x8x32xf32>
    %174 = arith.addf %166, %173 : vector<2x8x32xf32>
    %175 = vector.extract_strided_slice %91 {offsets = [0, 0, 10], sizes = [2, 8, 1], strides = [1, 1, 1]} : vector<2x8x32xf32> to vector<2x8x1xf32>
    %c10 = arith.constant 10 : index
    %c0_100 = arith.constant 0 : index
    %c0_101 = arith.constant 0 : index
    %176 = vector.load %arg6[%c10, %c0_100, %c0_101] : memref<32x8x32xf32, #tpu.memory_space<vmem>>, vector<1x8x32xf32>
    %177 = vector.shape_cast %176 : vector<1x8x32xf32> to vector<8x32xf32>
    %178 = vector.shape_cast %177 : vector<8x32xf32> to vector<1x8x32xf32>
    %179 = vector.broadcast %175 : vector<2x8x1xf32> to vector<2x8x32xf32>
    %180 = vector.broadcast %178 : vector<1x8x32xf32> to vector<2x8x32xf32>
    %181 = arith.mulf %179, %180 : vector<2x8x32xf32>
    %182 = arith.addf %174, %181 : vector<2x8x32xf32>
    %183 = vector.extract_strided_slice %91 {offsets = [0, 0, 11], sizes = [2, 8, 1], strides = [1, 1, 1]} : vector<2x8x32xf32> to vector<2x8x1xf32>
    %c11 = arith.constant 11 : index
    %c0_102 = arith.constant 0 : index
    %c0_103 = arith.constant 0 : index
    %184 = vector.load %arg6[%c11, %c0_102, %c0_103] : memref<32x8x32xf32, #tpu.memory_space<vmem>>, vector<1x8x32xf32>
    %185 = vector.shape_cast %184 : vector<1x8x32xf32> to vector<8x32xf32>
    %186 = vector.shape_cast %185 : vector<8x32xf32> to vector<1x8x32xf32>
    %187 = vector.broadcast %183 : vector<2x8x1xf32> to vector<2x8x32xf32>
    %188 = vector.broadcast %186 : vector<1x8x32xf32> to vector<2x8x32xf32>
    %189 = arith.mulf %187, %188 : vector<2x8x32xf32>
    %190 = arith.addf %182, %189 : vector<2x8x32xf32>
    %191 = vector.extract_strided_slice %91 {offsets = [0, 0, 12], sizes = [2, 8, 1], strides = [1, 1, 1]} : vector<2x8x32xf32> to vector<2x8x1xf32>
    %c12 = arith.constant 12 : index
    %c0_104 = arith.constant 0 : index
    %c0_105 = arith.constant 0 : index
    %192 = vector.load %arg6[%c12, %c0_104, %c0_105] : memref<32x8x32xf32, #tpu.memory_space<vmem>>, vector<1x8x32xf32>
    %193 = vector.shape_cast %192 : vector<1x8x32xf32> to vector<8x32xf32>
    %194 = vector.shape_cast %193 : vector<8x32xf32> to vector<1x8x32xf32>
    %195 = vector.broadcast %191 : vector<2x8x1xf32> to vector<2x8x32xf32>
    %196 = vector.broadcast %194 : vector<1x8x32xf32> to vector<2x8x32xf32>
    %197 = arith.mulf %195, %196 : vector<2x8x32xf32>
    %198 = arith.addf %190, %197 : vector<2x8x32xf32>
    %199 = vector.extract_strided_slice %91 {offsets = [0, 0, 13], sizes = [2, 8, 1], strides = [1, 1, 1]} : vector<2x8x32xf32> to vector<2x8x1xf32>
    %c13 = arith.constant 13 : index
    %c0_106 = arith.constant 0 : index
    %c0_107 = arith.constant 0 : index
    %200 = vector.load %arg6[%c13, %c0_106, %c0_107] : memref<32x8x32xf32, #tpu.memory_space<vmem>>, vector<1x8x32xf32>
    %201 = vector.shape_cast %200 : vector<1x8x32xf32> to vector<8x32xf32>
    %202 = vector.shape_cast %201 : vector<8x32xf32> to vector<1x8x32xf32>
    %203 = vector.broadcast %199 : vector<2x8x1xf32> to vector<2x8x32xf32>
    %204 = vector.broadcast %202 : vector<1x8x32xf32> to vector<2x8x32xf32>
    %205 = arith.mulf %203, %204 : vector<2x8x32xf32>
    %206 = arith.addf %198, %205 : vector<2x8x32xf32>
    %207 = vector.extract_strided_slice %91 {offsets = [0, 0, 14], sizes = [2, 8, 1], strides = [1, 1, 1]} : vector<2x8x32xf32> to vector<2x8x1xf32>
    %c14 = arith.constant 14 : index
    %c0_108 = arith.constant 0 : index
    %c0_109 = arith.constant 0 : index
    %208 = vector.load %arg6[%c14, %c0_108, %c0_109] : memref<32x8x32xf32, #tpu.memory_space<vmem>>, vector<1x8x32xf32>
    %209 = vector.shape_cast %208 : vector<1x8x32xf32> to vector<8x32xf32>
    %210 = vector.shape_cast %209 : vector<8x32xf32> to vector<1x8x32xf32>
    %211 = vector.broadcast %207 : vector<2x8x1xf32> to vector<2x8x32xf32>
    %212 = vector.broadcast %210 : vector<1x8x32xf32> to vector<2x8x32xf32>
    %213 = arith.mulf %211, %212 : vector<2x8x32xf32>
    %214 = arith.addf %206, %213 : vector<2x8x32xf32>
    %215 = vector.extract_strided_slice %91 {offsets = [0, 0, 15], sizes = [2, 8, 1], strides = [1, 1, 1]} : vector<2x8x32xf32> to vector<2x8x1xf32>
    %c15 = arith.constant 15 : index
    %c0_110 = arith.constant 0 : index
    %c0_111 = arith.constant 0 : index
    %216 = vector.load %arg6[%c15, %c0_110, %c0_111] : memref<32x8x32xf32, #tpu.memory_space<vmem>>, vector<1x8x32xf32>
    %217 = vector.shape_cast %216 : vector<1x8x32xf32> to vector<8x32xf32>
    %218 = vector.shape_cast %217 : vector<8x32xf32> to vector<1x8x32xf32>
    %219 = vector.broadcast %215 : vector<2x8x1xf32> to vector<2x8x32xf32>
    %220 = vector.broadcast %218 : vector<1x8x32xf32> to vector<2x8x32xf32>
    %221 = arith.mulf %219, %220 : vector<2x8x32xf32>
    %222 = arith.addf %214, %221 : vector<2x8x32xf32>
    %223 = vector.extract_strided_slice %91 {offsets = [0, 0, 16], sizes = [2, 8, 1], strides = [1, 1, 1]} : vector<2x8x32xf32> to vector<2x8x1xf32>
    %c16 = arith.constant 16 : index
    %c0_112 = arith.constant 0 : index
    %c0_113 = arith.constant 0 : index
    %224 = vector.load %arg6[%c16, %c0_112, %c0_113] : memref<32x8x32xf32, #tpu.memory_space<vmem>>, vector<1x8x32xf32>
    %225 = vector.shape_cast %224 : vector<1x8x32xf32> to vector<8x32xf32>
    %226 = vector.shape_cast %225 : vector<8x32xf32> to vector<1x8x32xf32>
    %227 = vector.broadcast %223 : vector<2x8x1xf32> to vector<2x8x32xf32>
    %228 = vector.broadcast %226 : vector<1x8x32xf32> to vector<2x8x32xf32>
    %229 = arith.mulf %227, %228 : vector<2x8x32xf32>
    %230 = arith.addf %222, %229 : vector<2x8x32xf32>
    %231 = vector.extract_strided_slice %91 {offsets = [0, 0, 17], sizes = [2, 8, 1], strides = [1, 1, 1]} : vector<2x8x32xf32> to vector<2x8x1xf32>
    %c17 = arith.constant 17 : index
    %c0_114 = arith.constant 0 : index
    %c0_115 = arith.constant 0 : index
    %232 = vector.load %arg6[%c17, %c0_114, %c0_115] : memref<32x8x32xf32, #tpu.memory_space<vmem>>, vector<1x8x32xf32>
    %233 = vector.shape_cast %232 : vector<1x8x32xf32> to vector<8x32xf32>
    %234 = vector.shape_cast %233 : vector<8x32xf32> to vector<1x8x32xf32>
    %235 = vector.broadcast %231 : vector<2x8x1xf32> to vector<2x8x32xf32>
    %236 = vector.broadcast %234 : vector<1x8x32xf32> to vector<2x8x32xf32>
    %237 = arith.mulf %235, %236 : vector<2x8x32xf32>
    %238 = arith.addf %230, %237 : vector<2x8x32xf32>
    %239 = vector.extract_strided_slice %91 {offsets = [0, 0, 18], sizes = [2, 8, 1], strides = [1, 1, 1]} : vector<2x8x32xf32> to vector<2x8x1xf32>
    %c18 = arith.constant 18 : index
    %c0_116 = arith.constant 0 : index
    %c0_117 = arith.constant 0 : index
    %240 = vector.load %arg6[%c18, %c0_116, %c0_117] : memref<32x8x32xf32, #tpu.memory_space<vmem>>, vector<1x8x32xf32>
    %241 = vector.shape_cast %240 : vector<1x8x32xf32> to vector<8x32xf32>
    %242 = vector.shape_cast %241 : vector<8x32xf32> to vector<1x8x32xf32>
    %243 = vector.broadcast %239 : vector<2x8x1xf32> to vector<2x8x32xf32>
    %244 = vector.broadcast %242 : vector<1x8x32xf32> to vector<2x8x32xf32>
    %245 = arith.mulf %243, %244 : vector<2x8x32xf32>
    %246 = arith.addf %238, %245 : vector<2x8x32xf32>
    %247 = vector.extract_strided_slice %91 {offsets = [0, 0, 19], sizes = [2, 8, 1], strides = [1, 1, 1]} : vector<2x8x32xf32> to vector<2x8x1xf32>
    %c19 = arith.constant 19 : index
    %c0_118 = arith.constant 0 : index
    %c0_119 = arith.constant 0 : index
    %248 = vector.load %arg6[%c19, %c0_118, %c0_119] : memref<32x8x32xf32, #tpu.memory_space<vmem>>, vector<1x8x32xf32>
    %249 = vector.shape_cast %248 : vector<1x8x32xf32> to vector<8x32xf32>
    %250 = vector.shape_cast %249 : vector<8x32xf32> to vector<1x8x32xf32>
    %251 = vector.broadcast %247 : vector<2x8x1xf32> to vector<2x8x32xf32>
    %252 = vector.broadcast %250 : vector<1x8x32xf32> to vector<2x8x32xf32>
    %253 = arith.mulf %251, %252 : vector<2x8x32xf32>
    %254 = arith.addf %246, %253 : vector<2x8x32xf32>
    %255 = vector.extract_strided_slice %91 {offsets = [0, 0, 20], sizes = [2, 8, 1], strides = [1, 1, 1]} : vector<2x8x32xf32> to vector<2x8x1xf32>
    %c20 = arith.constant 20 : index
    %c0_120 = arith.constant 0 : index
    %c0_121 = arith.constant 0 : index
    %256 = vector.load %arg6[%c20, %c0_120, %c0_121] : memref<32x8x32xf32, #tpu.memory_space<vmem>>, vector<1x8x32xf32>
    %257 = vector.shape_cast %256 : vector<1x8x32xf32> to vector<8x32xf32>
    %258 = vector.shape_cast %257 : vector<8x32xf32> to vector<1x8x32xf32>
    %259 = vector.broadcast %255 : vector<2x8x1xf32> to vector<2x8x32xf32>
    %260 = vector.broadcast %258 : vector<1x8x32xf32> to vector<2x8x32xf32>
    %261 = arith.mulf %259, %260 : vector<2x8x32xf32>
    %262 = arith.addf %254, %261 : vector<2x8x32xf32>
    %263 = vector.extract_strided_slice %91 {offsets = [0, 0, 21], sizes = [2, 8, 1], strides = [1, 1, 1]} : vector<2x8x32xf32> to vector<2x8x1xf32>
    %c21 = arith.constant 21 : index
    %c0_122 = arith.constant 0 : index
    %c0_123 = arith.constant 0 : index
    %264 = vector.load %arg6[%c21, %c0_122, %c0_123] : memref<32x8x32xf32, #tpu.memory_space<vmem>>, vector<1x8x32xf32>
    %265 = vector.shape_cast %264 : vector<1x8x32xf32> to vector<8x32xf32>
    %266 = vector.shape_cast %265 : vector<8x32xf32> to vector<1x8x32xf32>
    %267 = vector.broadcast %263 : vector<2x8x1xf32> to vector<2x8x32xf32>
    %268 = vector.broadcast %266 : vector<1x8x32xf32> to vector<2x8x32xf32>
    %269 = arith.mulf %267, %268 : vector<2x8x32xf32>
    %270 = arith.addf %262, %269 : vector<2x8x32xf32>
    %271 = vector.extract_strided_slice %91 {offsets = [0, 0, 22], sizes = [2, 8, 1], strides = [1, 1, 1]} : vector<2x8x32xf32> to vector<2x8x1xf32>
    %c22 = arith.constant 22 : index
    %c0_124 = arith.constant 0 : index
    %c0_125 = arith.constant 0 : index
    %272 = vector.load %arg6[%c22, %c0_124, %c0_125] : memref<32x8x32xf32, #tpu.memory_space<vmem>>, vector<1x8x32xf32>
    %273 = vector.shape_cast %272 : vector<1x8x32xf32> to vector<8x32xf32>
    %274 = vector.shape_cast %273 : vector<8x32xf32> to vector<1x8x32xf32>
    %275 = vector.broadcast %271 : vector<2x8x1xf32> to vector<2x8x32xf32>
    %276 = vector.broadcast %274 : vector<1x8x32xf32> to vector<2x8x32xf32>
    %277 = arith.mulf %275, %276 : vector<2x8x32xf32>
    %278 = arith.addf %270, %277 : vector<2x8x32xf32>
    %279 = vector.extract_strided_slice %91 {offsets = [0, 0, 23], sizes = [2, 8, 1], strides = [1, 1, 1]} : vector<2x8x32xf32> to vector<2x8x1xf32>
    %c23 = arith.constant 23 : index
    %c0_126 = arith.constant 0 : index
    %c0_127 = arith.constant 0 : index
    %280 = vector.load %arg6[%c23, %c0_126, %c0_127] : memref<32x8x32xf32, #tpu.memory_space<vmem>>, vector<1x8x32xf32>
    %281 = vector.shape_cast %280 : vector<1x8x32xf32> to vector<8x32xf32>
    %282 = vector.shape_cast %281 : vector<8x32xf32> to vector<1x8x32xf32>
    %283 = vector.broadcast %279 : vector<2x8x1xf32> to vector<2x8x32xf32>
    %284 = vector.broadcast %282 : vector<1x8x32xf32> to vector<2x8x32xf32>
    %285 = arith.mulf %283, %284 : vector<2x8x32xf32>
    %286 = arith.addf %278, %285 : vector<2x8x32xf32>
    %287 = vector.extract_strided_slice %91 {offsets = [0, 0, 24], sizes = [2, 8, 1], strides = [1, 1, 1]} : vector<2x8x32xf32> to vector<2x8x1xf32>
    %c24 = arith.constant 24 : index
    %c0_128 = arith.constant 0 : index
    %c0_129 = arith.constant 0 : index
    %288 = vector.load %arg6[%c24, %c0_128, %c0_129] : memref<32x8x32xf32, #tpu.memory_space<vmem>>, vector<1x8x32xf32>
    %289 = vector.shape_cast %288 : vector<1x8x32xf32> to vector<8x32xf32>
    %290 = vector.shape_cast %289 : vector<8x32xf32> to vector<1x8x32xf32>
    %291 = vector.broadcast %287 : vector<2x8x1xf32> to vector<2x8x32xf32>
    %292 = vector.broadcast %290 : vector<1x8x32xf32> to vector<2x8x32xf32>
    %293 = arith.mulf %291, %292 : vector<2x8x32xf32>
    %294 = arith.addf %286, %293 : vector<2x8x32xf32>
    %295 = vector.extract_strided_slice %91 {offsets = [0, 0, 25], sizes = [2, 8, 1], strides = [1, 1, 1]} : vector<2x8x32xf32> to vector<2x8x1xf32>
    %c25 = arith.constant 25 : index
    %c0_130 = arith.constant 0 : index
    %c0_131 = arith.constant 0 : index
    %296 = vector.load %arg6[%c25, %c0_130, %c0_131] : memref<32x8x32xf32, #tpu.memory_space<vmem>>, vector<1x8x32xf32>
    %297 = vector.shape_cast %296 : vector<1x8x32xf32> to vector<8x32xf32>
    %298 = vector.shape_cast %297 : vector<8x32xf32> to vector<1x8x32xf32>
    %299 = vector.broadcast %295 : vector<2x8x1xf32> to vector<2x8x32xf32>
    %300 = vector.broadcast %298 : vector<1x8x32xf32> to vector<2x8x32xf32>
    %301 = arith.mulf %299, %300 : vector<2x8x32xf32>
    %302 = arith.addf %294, %301 : vector<2x8x32xf32>
    %303 = vector.extract_strided_slice %91 {offsets = [0, 0, 26], sizes = [2, 8, 1], strides = [1, 1, 1]} : vector<2x8x32xf32> to vector<2x8x1xf32>
    %c26 = arith.constant 26 : index
    %c0_132 = arith.constant 0 : index
    %c0_133 = arith.constant 0 : index
    %304 = vector.load %arg6[%c26, %c0_132, %c0_133] : memref<32x8x32xf32, #tpu.memory_space<vmem>>, vector<1x8x32xf32>
    %305 = vector.shape_cast %304 : vector<1x8x32xf32> to vector<8x32xf32>
    %306 = vector.shape_cast %305 : vector<8x32xf32> to vector<1x8x32xf32>
    %307 = vector.broadcast %303 : vector<2x8x1xf32> to vector<2x8x32xf32>
    %308 = vector.broadcast %306 : vector<1x8x32xf32> to vector<2x8x32xf32>
    %309 = arith.mulf %307, %308 : vector<2x8x32xf32>
    %310 = arith.addf %302, %309 : vector<2x8x32xf32>
    %311 = vector.extract_strided_slice %91 {offsets = [0, 0, 27], sizes = [2, 8, 1], strides = [1, 1, 1]} : vector<2x8x32xf32> to vector<2x8x1xf32>
    %c27 = arith.constant 27 : index
    %c0_134 = arith.constant 0 : index
    %c0_135 = arith.constant 0 : index
    %312 = vector.load %arg6[%c27, %c0_134, %c0_135] : memref<32x8x32xf32, #tpu.memory_space<vmem>>, vector<1x8x32xf32>
    %313 = vector.shape_cast %312 : vector<1x8x32xf32> to vector<8x32xf32>
    %314 = vector.shape_cast %313 : vector<8x32xf32> to vector<1x8x32xf32>
    %315 = vector.broadcast %311 : vector<2x8x1xf32> to vector<2x8x32xf32>
    %316 = vector.broadcast %314 : vector<1x8x32xf32> to vector<2x8x32xf32>
    %317 = arith.mulf %315, %316 : vector<2x8x32xf32>
    %318 = arith.addf %310, %317 : vector<2x8x32xf32>
    %319 = vector.extract_strided_slice %91 {offsets = [0, 0, 28], sizes = [2, 8, 1], strides = [1, 1, 1]} : vector<2x8x32xf32> to vector<2x8x1xf32>
    %c28 = arith.constant 28 : index
    %c0_136 = arith.constant 0 : index
    %c0_137 = arith.constant 0 : index
    %320 = vector.load %arg6[%c28, %c0_136, %c0_137] : memref<32x8x32xf32, #tpu.memory_space<vmem>>, vector<1x8x32xf32>
    %321 = vector.shape_cast %320 : vector<1x8x32xf32> to vector<8x32xf32>
    %322 = vector.shape_cast %321 : vector<8x32xf32> to vector<1x8x32xf32>
    %323 = vector.broadcast %319 : vector<2x8x1xf32> to vector<2x8x32xf32>
    %324 = vector.broadcast %322 : vector<1x8x32xf32> to vector<2x8x32xf32>
    %325 = arith.mulf %323, %324 : vector<2x8x32xf32>
    %326 = arith.addf %318, %325 : vector<2x8x32xf32>
    %327 = vector.extract_strided_slice %91 {offsets = [0, 0, 29], sizes = [2, 8, 1], strides = [1, 1, 1]} : vector<2x8x32xf32> to vector<2x8x1xf32>
    %c29 = arith.constant 29 : index
    %c0_138 = arith.constant 0 : index
    %c0_139 = arith.constant 0 : index
    %328 = vector.load %arg6[%c29, %c0_138, %c0_139] : memref<32x8x32xf32, #tpu.memory_space<vmem>>, vector<1x8x32xf32>
    %329 = vector.shape_cast %328 : vector<1x8x32xf32> to vector<8x32xf32>
    %330 = vector.shape_cast %329 : vector<8x32xf32> to vector<1x8x32xf32>
    %331 = vector.broadcast %327 : vector<2x8x1xf32> to vector<2x8x32xf32>
    %332 = vector.broadcast %330 : vector<1x8x32xf32> to vector<2x8x32xf32>
    %333 = arith.mulf %331, %332 : vector<2x8x32xf32>
    %334 = arith.addf %326, %333 : vector<2x8x32xf32>
    %335 = vector.extract_strided_slice %91 {offsets = [0, 0, 30], sizes = [2, 8, 1], strides = [1, 1, 1]} : vector<2x8x32xf32> to vector<2x8x1xf32>
    %c30 = arith.constant 30 : index
    %c0_140 = arith.constant 0 : index
    %c0_141 = arith.constant 0 : index
    %336 = vector.load %arg6[%c30, %c0_140, %c0_141] : memref<32x8x32xf32, #tpu.memory_space<vmem>>, vector<1x8x32xf32>
    %337 = vector.shape_cast %336 : vector<1x8x32xf32> to vector<8x32xf32>
    %338 = vector.shape_cast %337 : vector<8x32xf32> to vector<1x8x32xf32>
    %339 = vector.broadcast %335 : vector<2x8x1xf32> to vector<2x8x32xf32>
    %340 = vector.broadcast %338 : vector<1x8x32xf32> to vector<2x8x32xf32>
    %341 = arith.mulf %339, %340 : vector<2x8x32xf32>
    %342 = arith.addf %334, %341 : vector<2x8x32xf32>
    %343 = vector.extract_strided_slice %91 {offsets = [0, 0, 31], sizes = [2, 8, 1], strides = [1, 1, 1]} : vector<2x8x32xf32> to vector<2x8x1xf32>
    %c31 = arith.constant 31 : index
    %c0_142 = arith.constant 0 : index
    %c0_143 = arith.constant 0 : index
    %344 = vector.load %arg6[%c31, %c0_142, %c0_143] : memref<32x8x32xf32, #tpu.memory_space<vmem>>, vector<1x8x32xf32>
    %345 = vector.shape_cast %344 : vector<1x8x32xf32> to vector<8x32xf32>
    %346 = vector.shape_cast %345 : vector<8x32xf32> to vector<1x8x32xf32>
    %347 = vector.broadcast %343 : vector<2x8x1xf32> to vector<2x8x32xf32>
    %348 = vector.broadcast %346 : vector<1x8x32xf32> to vector<2x8x32xf32>
    %349 = arith.mulf %347, %348 : vector<2x8x32xf32>
    %350 = arith.addf %342, %349 : vector<2x8x32xf32>
    %c0_144 = arith.constant 0 : index
    %c0_145 = arith.constant 0 : index
    %c0_146 = arith.constant 0 : index
    %351 = vector.load %arg8[%c0_144, %c0_145, %c0_146] : memref<1x8x32xf32, #tpu.memory_space<vmem>>, vector<1x8x32xf32>
    %352 = vector.shape_cast %351 : vector<1x8x32xf32> to vector<8x32xf32>
    %c0_147 = arith.constant 0 : index
    %c0_148 = arith.constant 0 : index
    %c0_149 = arith.constant 0 : index
    %353 = vector.load %arg9[%c0_147, %c0_148, %c0_149] : memref<1x1x1xf32, #tpu.memory_space<vmem>>, vector<1x1x1xf32>
    %354 = vector.extract_strided_slice %6 {offsets = [0, 0, 0, 0], sizes = [2, 1, 8, 32], strides = [1, 1, 1, 1]} : vector<2x3x8x32xf32> to vector<2x1x8x32xf32>
    %355 = vector.shape_cast %354 : vector<2x1x8x32xf32> to vector<2x8x32xf32>
    %c0_150 = arith.constant 0 : index
    %c0_151 = arith.constant 0 : index
    %c0_152 = arith.constant 0 : index
    %356 = vector.load %arg5[%c0_150, %c0_151, %c0_152] : memref<3x8x32xf32, #tpu.memory_space<vmem>>, vector<1x8x32xf32>
    %357 = vector.shape_cast %356 : vector<1x8x32xf32> to vector<8x32xf32>
    %358 = vector.shape_cast %357 : vector<8x32xf32> to vector<1x8x32xf32>
    %359 = vector.broadcast %358 : vector<1x8x32xf32> to vector<2x8x32xf32>
    %360 = arith.addf %355, %359 : vector<2x8x32xf32>
    %361 = vector.shape_cast %352 : vector<8x32xf32> to vector<1x8x32xf32>
    %362 = vector.broadcast %361 : vector<1x8x32xf32> to vector<2x8x32xf32>
    %363 = arith.mulf %360, %362 : vector<2x8x32xf32>
    %cst_153 = arith.constant dense<0.000000e+00> : vector<2x8xf32>
    %364 = vector.multi_reduction <add>, %363, %cst_153 [2] : vector<2x8x32xf32> to vector<2x8xf32>
    %365 = vector.shape_cast %364 : vector<2x8xf32> to vector<2x8x1xf32>
    %cst_154 = arith.constant dense<0.000000e+00> : vector<2x1xf32>
    %366 = vector.multi_reduction <add>, %365, %cst_154 [1] : vector<2x8x1xf32> to vector<2x1xf32>
    %367 = vector.shape_cast %366 : vector<2x1xf32> to vector<2x1x1xf32>
    %368 = vector.broadcast %353 : vector<1x1x1xf32> to vector<2x1x1xf32>
    %369 = arith.addf %367, %368 : vector<2x1x1xf32>
    %370 = vector.extract_strided_slice %6 {offsets = [0, 1, 0, 0], sizes = [2, 1, 8, 32], strides = [1, 1, 1, 1]} : vector<2x3x8x32xf32> to vector<2x1x8x32xf32>
    %371 = vector.shape_cast %370 : vector<2x1x8x32xf32> to vector<2x8x32xf32>
    %c1_155 = arith.constant 1 : index
    %c0_156 = arith.constant 0 : index
    %c0_157 = arith.constant 0 : index
    %372 = vector.load %arg5[%c1_155, %c0_156, %c0_157] : memref<3x8x32xf32, #tpu.memory_space<vmem>>, vector<1x8x32xf32>
    %373 = vector.shape_cast %372 : vector<1x8x32xf32> to vector<8x32xf32>
    %374 = vector.shape_cast %373 : vector<8x32xf32> to vector<1x8x32xf32>
    %375 = vector.broadcast %374 : vector<1x8x32xf32> to vector<2x8x32xf32>
    %376 = arith.addf %371, %375 : vector<2x8x32xf32>
    %377 = vector.shape_cast %352 : vector<8x32xf32> to vector<1x8x32xf32>
    %378 = vector.broadcast %377 : vector<1x8x32xf32> to vector<2x8x32xf32>
    %379 = arith.mulf %376, %378 : vector<2x8x32xf32>
    %cst_158 = arith.constant dense<0.000000e+00> : vector<2x8xf32>
    %380 = vector.multi_reduction <add>, %379, %cst_158 [2] : vector<2x8x32xf32> to vector<2x8xf32>
    %381 = vector.shape_cast %380 : vector<2x8xf32> to vector<2x8x1xf32>
    %cst_159 = arith.constant dense<0.000000e+00> : vector<2x1xf32>
    %382 = vector.multi_reduction <add>, %381, %cst_159 [1] : vector<2x8x1xf32> to vector<2x1xf32>
    %383 = vector.shape_cast %382 : vector<2x1xf32> to vector<2x1x1xf32>
    %384 = vector.broadcast %353 : vector<1x1x1xf32> to vector<2x1x1xf32>
    %385 = arith.addf %383, %384 : vector<2x1x1xf32>
    %386 = vector.extract_strided_slice %6 {offsets = [0, 2, 0, 0], sizes = [2, 1, 8, 32], strides = [1, 1, 1, 1]} : vector<2x3x8x32xf32> to vector<2x1x8x32xf32>
    %387 = vector.shape_cast %386 : vector<2x1x8x32xf32> to vector<2x8x32xf32>
    %c2_160 = arith.constant 2 : index
    %c0_161 = arith.constant 0 : index
    %c0_162 = arith.constant 0 : index
    %388 = vector.load %arg5[%c2_160, %c0_161, %c0_162] : memref<3x8x32xf32, #tpu.memory_space<vmem>>, vector<1x8x32xf32>
    %389 = vector.shape_cast %388 : vector<1x8x32xf32> to vector<8x32xf32>
    %390 = vector.shape_cast %389 : vector<8x32xf32> to vector<1x8x32xf32>
    %391 = vector.broadcast %390 : vector<1x8x32xf32> to vector<2x8x32xf32>
    %392 = arith.addf %387, %391 : vector<2x8x32xf32>
    %393 = vector.shape_cast %352 : vector<8x32xf32> to vector<1x8x32xf32>
    %394 = vector.broadcast %393 : vector<1x8x32xf32> to vector<2x8x32xf32>
    %395 = arith.mulf %392, %394 : vector<2x8x32xf32>
    %cst_163 = arith.constant dense<0.000000e+00> : vector<2x8xf32>
    %396 = vector.multi_reduction <add>, %395, %cst_163 [2] : vector<2x8x32xf32> to vector<2x8xf32>
    %397 = vector.shape_cast %396 : vector<2x8xf32> to vector<2x8x1xf32>
    %cst_164 = arith.constant dense<0.000000e+00> : vector<2x1xf32>
    %398 = vector.multi_reduction <add>, %397, %cst_164 [1] : vector<2x8x1xf32> to vector<2x1xf32>
    %399 = vector.shape_cast %398 : vector<2x1xf32> to vector<2x1x1xf32>
    %400 = vector.broadcast %353 : vector<1x1x1xf32> to vector<2x1x1xf32>
    %401 = arith.addf %399, %400 : vector<2x1x1xf32>
    %402 = arith.maximumf %369, %385 : vector<2x1x1xf32>
    %403 = arith.maximumf %402, %401 : vector<2x1x1xf32>
    %404 = arith.subf %369, %403 : vector<2x1x1xf32>
    %405 = math.exp %404 : vector<2x1x1xf32>
    %406 = arith.subf %385, %403 : vector<2x1x1xf32>
    %407 = math.exp %406 : vector<2x1x1xf32>
    %408 = arith.subf %401, %403 : vector<2x1x1xf32>
    %409 = math.exp %408 : vector<2x1x1xf32>
    %410 = arith.addf %405, %407 : vector<2x1x1xf32>
    %411 = arith.addf %410, %409 : vector<2x1x1xf32>
    %cst_165 = arith.constant 1.000000e+00 : f32
    %412 = vector.broadcast %cst_165 : f32 to vector<2x1x1xf32>
    %413 = arith.divf %412, %411 : vector<2x1x1xf32>
    %414 = arith.mulf %405, %413 : vector<2x1x1xf32>
    %415 = vector.broadcast %414 : vector<2x1x1xf32> to vector<2x8x32xf32>
    %416 = arith.mulf %360, %415 : vector<2x8x32xf32>
    %417 = arith.mulf %407, %413 : vector<2x1x1xf32>
    %418 = vector.broadcast %417 : vector<2x1x1xf32> to vector<2x8x32xf32>
    %419 = arith.mulf %376, %418 : vector<2x8x32xf32>
    %420 = arith.addf %416, %419 : vector<2x8x32xf32>
    %421 = arith.mulf %409, %413 : vector<2x1x1xf32>
    %422 = vector.broadcast %421 : vector<2x1x1xf32> to vector<2x8x32xf32>
    %423 = arith.mulf %392, %422 : vector<2x8x32xf32>
    %424 = arith.addf %420, %423 : vector<2x8x32xf32>
    %425 = arith.addf %350, %424 : vector<2x8x32xf32>
    %426 = vector.extract_strided_slice %6 {offsets = [0, 1, 0, 0], sizes = [2, 1, 8, 32], strides = [1, 1, 1, 1]} : vector<2x3x8x32xf32> to vector<2x1x8x32xf32>
    %427 = vector.shape_cast %426 : vector<2x1x8x32xf32> to vector<2x8x32xf32>
    %c0_166 = arith.constant 0 : index
    %c0_167 = arith.constant 0 : index
    %c0_168 = arith.constant 0 : index
    %c0_169 = arith.constant 0 : index
    %c0_170 = arith.constant 0 : index
    %428 = vector.load %arg20[%c0_166, %c0_167, %c0_168, %c0_169, %c0_170] : memref<2x2x3x8x32xf32, #tpu.memory_space<vmem>>, vector<1x2x1x8x32xf32>
    %429 = vector.shape_cast %428 : vector<1x2x1x8x32xf32> to vector<2x8x32xf32>
    %430 = vector.shape_cast %427 : vector<2x8x32xf32> to vector<1x2x1x8x32xf32>
    tpu.vector_store %arg20[%c0_166, %c0_167, %c0_168, %c0_169, %c0_170], %430 {strides = array<i32>} : memref<2x2x3x8x32xf32, #tpu.memory_space<vmem>>, vector<1x2x1x8x32xf32>,
    %431 = vector.extract_strided_slice %6 {offsets = [0, 2, 0, 0], sizes = [2, 1, 8, 32], strides = [1, 1, 1, 1]} : vector<2x3x8x32xf32> to vector<2x1x8x32xf32>
    %432 = vector.shape_cast %431 : vector<2x1x8x32xf32> to vector<2x8x32xf32>
    %c0_171 = arith.constant 0 : index
    %c0_172 = arith.constant 0 : index
    %c1_173 = arith.constant 1 : index
    %c0_174 = arith.constant 0 : index
    %c0_175 = arith.constant 0 : index
    %433 = vector.load %arg20[%c0_171, %c0_172, %c1_173, %c0_174, %c0_175] : memref<2x2x3x8x32xf32, #tpu.memory_space<vmem>>, vector<1x2x1x8x32xf32>
    %434 = vector.shape_cast %433 : vector<1x2x1x8x32xf32> to vector<2x8x32xf32>
    %435 = vector.shape_cast %432 : vector<2x8x32xf32> to vector<1x2x1x8x32xf32>
    tpu.vector_store %arg20[%c0_171, %c0_172, %c1_173, %c0_174, %c0_175], %435 {strides = array<i32>} : memref<2x2x3x8x32xf32, #tpu.memory_space<vmem>>, vector<1x2x1x8x32xf32>,
    %c0_176 = arith.constant 0 : index
    %c0_177 = arith.constant 0 : index
    %c2_178 = arith.constant 2 : index
    %c0_179 = arith.constant 0 : index
    %c0_180 = arith.constant 0 : index
    %436 = vector.load %arg20[%c0_176, %c0_177, %c2_178, %c0_179, %c0_180] : memref<2x2x3x8x32xf32, #tpu.memory_space<vmem>>, vector<1x2x1x8x32xf32>
    %437 = vector.shape_cast %436 : vector<1x2x1x8x32xf32> to vector<2x8x32xf32>
    %438 = vector.shape_cast %425 : vector<2x8x32xf32> to vector<1x2x1x8x32xf32>
    tpu.vector_store %arg20[%c0_176, %c0_177, %c2_178, %c0_179, %c0_180], %438 {strides = array<i32>} : memref<2x2x3x8x32xf32, #tpu.memory_space<vmem>>, vector<1x2x1x8x32xf32>,
    %c1_181 = arith.constant 1 : index
    %c0_182 = arith.constant 0 : index
    %c0_183 = arith.constant 0 : index
    %c0_184 = arith.constant 0 : index
    %c0_185 = arith.constant 0 : index
    %439 = vector.load %arg1[%c1_181, %c0_182, %c0_183, %c0_184, %c0_185] : memref<2x2x3x8x32xf32, #tpu.memory_space<vmem>>, vector<1x2x3x8x32xf32>
    %440 = vector.shape_cast %439 : vector<1x2x3x8x32xf32> to vector<2x3x8x32xf32>
    %441 = vector.extract_strided_slice %440 {offsets = [0, 2, 0, 0], sizes = [2, 1, 8, 32], strides = [1, 1, 1, 1]} : vector<2x3x8x32xf32> to vector<2x1x8x32xf32>
    %442 = vector.shape_cast %441 : vector<2x1x8x32xf32> to vector<2x8x32xf32>
    %443 = vector.extract_strided_slice %440 {offsets = [0, 1, 0, 0], sizes = [2, 1, 8, 32], strides = [1, 1, 1, 1]} : vector<2x3x8x32xf32> to vector<2x1x8x32xf32>
    %444 = vector.shape_cast %443 : vector<2x1x8x32xf32> to vector<2x8x32xf32>
    %445 = arith.addf %442, %444 : vector<2x8x32xf32>
    %446 = vector.extract_strided_slice %425 {offsets = [0, 0, 0], sizes = [1, 8, 32], strides = [1, 1, 1]} : vector<2x8x32xf32> to vector<1x8x32xf32>
    %447 = vector.shape_cast %446 : vector<1x8x32xf32> to vector<8x32xf32>
    %448 = vector.extract_strided_slice %445 {offsets = [0, 0, 0], sizes = [1, 8, 32], strides = [1, 1, 1]} : vector<2x8x32xf32> to vector<1x8x32xf32>
    %449 = vector.shape_cast %448 : vector<1x8x32xf32> to vector<8x32xf32>
    %c0_186 = arith.constant 0 : index
    %c0_187 = arith.constant 0 : index
    %450 = vector.load %arg21[%c0_186, %c0_187] : memref<16x320xf32, #tpu.memory_space<vmem>>, vector<8x32xf32>
    tpu.vector_store %arg21[%c0_186, %c0_187], %447 {strides = array<i32>} : memref<16x320xf32, #tpu.memory_space<vmem>>, vector<8x32xf32>,
    %c0_188 = arith.constant 0 : index
    %c32 = arith.constant 32 : index
    %451 = vector.load %arg21[%c0_188, %c32] : memref<16x320xf32, #tpu.memory_space<vmem>>, vector<8x32xf32>
    tpu.vector_store %arg21[%c0_188, %c32], %449 {strides = array<i32>} : memref<16x320xf32, #tpu.memory_space<vmem>>, vector<8x32xf32>,
    %cst_189 = arith.constant dense<0.000000e+00> : vector<8x32xf32>
    %452 = tpu.matmul %1, %447, %cst_189 {dimension_numbers = #tpu.dot_dimension_numbers<[1], [0], [0], [1], [0, 0, 1, 1], [], []>} : vector<8x8xf32>, vector<8x32xf32>, vector<8x32xf32> -> vector<8x32xf32>
    %cst_190 = arith.constant dense<0.000000e+00> : vector<8x32xf32>
    %453 = tpu.matmul %1, %449, %cst_190 {dimension_numbers = #tpu.dot_dimension_numbers<[1], [0], [0], [1], [0, 0, 1, 1], [], []>} : vector<8x8xf32>, vector<8x32xf32>, vector<8x32xf32> -> vector<8x32xf32>
    %c0_191 = arith.constant 0 : index
    %c64 = arith.constant 64 : index
    %454 = vector.load %arg21[%c0_191, %c64] : memref<16x320xf32, #tpu.memory_space<vmem>>, vector<8x32xf32>
    tpu.vector_store %arg21[%c0_191, %c64], %452 {strides = array<i32>} : memref<16x320xf32, #tpu.memory_space<vmem>>, vector<8x32xf32>,
    %c0_192 = arith.constant 0 : index
    %c96 = arith.constant 96 : index
    %455 = vector.load %arg21[%c0_192, %c96] : memref<16x320xf32, #tpu.memory_space<vmem>>, vector<8x32xf32>
    tpu.vector_store %arg21[%c0_192, %c96], %453 {strides = array<i32>} : memref<16x320xf32, #tpu.memory_space<vmem>>, vector<8x32xf32>,
    %cst_193 = arith.constant dense<0.000000e+00> : vector<8x32xf32>
    %456 = tpu.matmul %1, %452, %cst_193 {dimension_numbers = #tpu.dot_dimension_numbers<[1], [0], [0], [1], [0, 0, 1, 1], [], []>} : vector<8x8xf32>, vector<8x32xf32>, vector<8x32xf32> -> vector<8x32xf32>
    %cst_194 = arith.constant 2.000000e+00 : f32
    %457 = vector.broadcast %cst_194 : f32 to vector<8x32xf32>
    %458 = arith.mulf %457, %456 : vector<8x32xf32>
    %459 = arith.subf %458, %447 : vector<8x32xf32>
    %cst_195 = arith.constant dense<0.000000e+00> : vector<8x32xf32>
    %460 = tpu.matmul %1, %453, %cst_195 {dimension_numbers = #tpu.dot_dimension_numbers<[1], [0], [0], [1], [0, 0, 1, 1], [], []>} : vector<8x8xf32>, vector<8x32xf32>, vector<8x32xf32> -> vector<8x32xf32>
    %cst_196 = arith.constant 2.000000e+00 : f32
    %461 = vector.broadcast %cst_196 : f32 to vector<8x32xf32>
    %462 = arith.mulf %461, %460 : vector<8x32xf32>
    %463 = arith.subf %462, %449 : vector<8x32xf32>
    %c0_197 = arith.constant 0 : index
    %c128 = arith.constant 128 : index
    %464 = vector.load %arg21[%c0_197, %c128] : memref<16x320xf32, #tpu.memory_space<vmem>>, vector<8x32xf32>
    tpu.vector_store %arg21[%c0_197, %c128], %459 {strides = array<i32>} : memref<16x320xf32, #tpu.memory_space<vmem>>, vector<8x32xf32>,
    %c0_198 = arith.constant 0 : index
    %c160 = arith.constant 160 : index
    %465 = vector.load %arg21[%c0_198, %c160] : memref<16x320xf32, #tpu.memory_space<vmem>>, vector<8x32xf32>
    tpu.vector_store %arg21[%c0_198, %c160], %463 {strides = array<i32>} : memref<16x320xf32, #tpu.memory_space<vmem>>, vector<8x32xf32>,
    %cst_199 = arith.constant dense<0.000000e+00> : vector<8x32xf32>
    %466 = tpu.matmul %3, %447, %cst_199 {dimension_numbers = #tpu.dot_dimension_numbers<[1], [0], [0], [1], [0, 0, 1, 1], [], []>} : vector<8x8xf32>, vector<8x32xf32>, vector<8x32xf32> -> vector<8x32xf32>
    %cst_200 = arith.constant dense<0.000000e+00> : vector<8x32xf32>
    %467 = tpu.matmul %3, %449, %cst_200 {dimension_numbers = #tpu.dot_dimension_numbers<[1], [0], [0], [1], [0, 0, 1, 1], [], []>} : vector<8x8xf32>, vector<8x32xf32>, vector<8x32xf32> -> vector<8x32xf32>
    %c0_201 = arith.constant 0 : index
    %c192 = arith.constant 192 : index
    %468 = vector.load %arg21[%c0_201, %c192] : memref<16x320xf32, #tpu.memory_space<vmem>>, vector<8x32xf32>
    tpu.vector_store %arg21[%c0_201, %c192], %466 {strides = array<i32>} : memref<16x320xf32, #tpu.memory_space<vmem>>, vector<8x32xf32>,
    %c0_202 = arith.constant 0 : index
    %c224 = arith.constant 224 : index
    %469 = vector.load %arg21[%c0_202, %c224] : memref<16x320xf32, #tpu.memory_space<vmem>>, vector<8x32xf32>
    tpu.vector_store %arg21[%c0_202, %c224], %467 {strides = array<i32>} : memref<16x320xf32, #tpu.memory_space<vmem>>, vector<8x32xf32>,
    %cst_203 = arith.constant dense<0.000000e+00> : vector<8x32xf32>
    %470 = tpu.matmul %3, %466, %cst_203 {dimension_numbers = #tpu.dot_dimension_numbers<[1], [0], [0], [1], [0, 0, 1, 1], [], []>} : vector<8x8xf32>, vector<8x32xf32>, vector<8x32xf32> -> vector<8x32xf32>
    %cst_204 = arith.constant 2.000000e+00 : f32
    %471 = vector.broadcast %cst_204 : f32 to vector<8x32xf32>
    %472 = arith.mulf %471, %470 : vector<8x32xf32>
    %473 = arith.subf %472, %447 : vector<8x32xf32>
    %cst_205 = arith.constant dense<0.000000e+00> : vector<8x32xf32>
    %474 = tpu.matmul %3, %467, %cst_205 {dimension_numbers = #tpu.dot_dimension_numbers<[1], [0], [0], [1], [0, 0, 1, 1], [], []>} : vector<8x8xf32>, vector<8x32xf32>, vector<8x32xf32> -> vector<8x32xf32>
    %cst_206 = arith.constant 2.000000e+00 : f32
    %475 = vector.broadcast %cst_206 : f32 to vector<8x32xf32>
    %476 = arith.mulf %475, %474 : vector<8x32xf32>
    %477 = arith.subf %476, %449 : vector<8x32xf32>
    %c0_207 = arith.constant 0 : index
    %c256 = arith.constant 256 : index
    %478 = vector.load %arg21[%c0_207, %c256] : memref<16x320xf32, #tpu.memory_space<vmem>>, vector<8x32xf32>
    tpu.vector_store %arg21[%c0_207, %c256], %473 {strides = array<i32>} : memref<16x320xf32, #tpu.memory_space<vmem>>, vector<8x32xf32>,
    %c0_208 = arith.constant 0 : index
    %c288 = arith.constant 288 : index
    %479 = vector.load %arg21[%c0_208, %c288] : memref<16x320xf32, #tpu.memory_space<vmem>>, vector<8x32xf32>
    tpu.vector_store %arg21[%c0_208, %c288], %477 {strides = array<i32>} : memref<16x320xf32, #tpu.memory_space<vmem>>, vector<8x32xf32>,
    %480 = vector.extract_strided_slice %425 {offsets = [1, 0, 0], sizes = [1, 8, 32], strides = [1, 1, 1]} : vector<2x8x32xf32> to vector<1x8x32xf32>
    %481 = vector.shape_cast %480 : vector<1x8x32xf32> to vector<8x32xf32>
    %482 = vector.extract_strided_slice %445 {offsets = [1, 0, 0], sizes = [1, 8, 32], strides = [1, 1, 1]} : vector<2x8x32xf32> to vector<1x8x32xf32>
    %483 = vector.shape_cast %482 : vector<1x8x32xf32> to vector<8x32xf32>
    %c8_209 = arith.constant 8 : index
    %c0_210 = arith.constant 0 : index
    %484 = vector.load %arg21[%c8_209, %c0_210] : memref<16x320xf32, #tpu.memory_space<vmem>>, vector<8x32xf32>
    tpu.vector_store %arg21[%c8_209, %c0_210], %481 {strides = array<i32>} : memref<16x320xf32, #tpu.memory_space<vmem>>, vector<8x32xf32>,
    %c8_211 = arith.constant 8 : index
    %c32_212 = arith.constant 32 : index
    %485 = vector.load %arg21[%c8_211, %c32_212] : memref<16x320xf32, #tpu.memory_space<vmem>>, vector<8x32xf32>
    tpu.vector_store %arg21[%c8_211, %c32_212], %483 {strides = array<i32>} : memref<16x320xf32, #tpu.memory_space<vmem>>, vector<8x32xf32>,
    %cst_213 = arith.constant dense<0.000000e+00> : vector<8x32xf32>
    %486 = tpu.matmul %1, %481, %cst_213 {dimension_numbers = #tpu.dot_dimension_numbers<[1], [0], [0], [1], [0, 0, 1, 1], [], []>} : vector<8x8xf32>, vector<8x32xf32>, vector<8x32xf32> -> vector<8x32xf32>
    %cst_214 = arith.constant dense<0.000000e+00> : vector<8x32xf32>
    %487 = tpu.matmul %1, %483, %cst_214 {dimension_numbers = #tpu.dot_dimension_numbers<[1], [0], [0], [1], [0, 0, 1, 1], [], []>} : vector<8x8xf32>, vector<8x32xf32>, vector<8x32xf32> -> vector<8x32xf32>
    %c8_215 = arith.constant 8 : index
    %c64_216 = arith.constant 64 : index
    %488 = vector.load %arg21[%c8_215, %c64_216] : memref<16x320xf32, #tpu.memory_space<vmem>>, vector<8x32xf32>
    tpu.vector_store %arg21[%c8_215, %c64_216], %486 {strides = array<i32>} : memref<16x320xf32, #tpu.memory_space<vmem>>, vector<8x32xf32>,
    %c8_217 = arith.constant 8 : index
    %c96_218 = arith.constant 96 : index
    %489 = vector.load %arg21[%c8_217, %c96_218] : memref<16x320xf32, #tpu.memory_space<vmem>>, vector<8x32xf32>
    tpu.vector_store %arg21[%c8_217, %c96_218], %487 {strides = array<i32>} : memref<16x320xf32, #tpu.memory_space<vmem>>, vector<8x32xf32>,
    %cst_219 = arith.constant dense<0.000000e+00> : vector<8x32xf32>
    %490 = tpu.matmul %1, %486, %cst_219 {dimension_numbers = #tpu.dot_dimension_numbers<[1], [0], [0], [1], [0, 0, 1, 1], [], []>} : vector<8x8xf32>, vector<8x32xf32>, vector<8x32xf32> -> vector<8x32xf32>
    %cst_220 = arith.constant 2.000000e+00 : f32
    %491 = vector.broadcast %cst_220 : f32 to vector<8x32xf32>
    %492 = arith.mulf %491, %490 : vector<8x32xf32>
    %493 = arith.subf %492, %481 : vector<8x32xf32>
    %cst_221 = arith.constant dense<0.000000e+00> : vector<8x32xf32>
    %494 = tpu.matmul %1, %487, %cst_221 {dimension_numbers = #tpu.dot_dimension_numbers<[1], [0], [0], [1], [0, 0, 1, 1], [], []>} : vector<8x8xf32>, vector<8x32xf32>, vector<8x32xf32> -> vector<8x32xf32>
    %cst_222 = arith.constant 2.000000e+00 : f32
    %495 = vector.broadcast %cst_222 : f32 to vector<8x32xf32>
    %496 = arith.mulf %495, %494 : vector<8x32xf32>
    %497 = arith.subf %496, %483 : vector<8x32xf32>
    %c8_223 = arith.constant 8 : index
    %c128_224 = arith.constant 128 : index
    %498 = vector.load %arg21[%c8_223, %c128_224] : memref<16x320xf32, #tpu.memory_space<vmem>>, vector<8x32xf32>
    tpu.vector_store %arg21[%c8_223, %c128_224], %493 {strides = array<i32>} : memref<16x320xf32, #tpu.memory_space<vmem>>, vector<8x32xf32>,
    %c8_225 = arith.constant 8 : index
    %c160_226 = arith.constant 160 : index
    %499 = vector.load %arg21[%c8_225, %c160_226] : memref<16x320xf32, #tpu.memory_space<vmem>>, vector<8x32xf32>
    tpu.vector_store %arg21[%c8_225, %c160_226], %497 {strides = array<i32>} : memref<16x320xf32, #tpu.memory_space<vmem>>, vector<8x32xf32>,
    %cst_227 = arith.constant dense<0.000000e+00> : vector<8x32xf32>
    %500 = tpu.matmul %3, %481, %cst_227 {dimension_numbers = #tpu.dot_dimension_numbers<[1], [0], [0], [1], [0, 0, 1, 1], [], []>} : vector<8x8xf32>, vector<8x32xf32>, vector<8x32xf32> -> vector<8x32xf32>
    %cst_228 = arith.constant dense<0.000000e+00> : vector<8x32xf32>
    %501 = tpu.matmul %3, %483, %cst_228 {dimension_numbers = #tpu.dot_dimension_numbers<[1], [0], [0], [1], [0, 0, 1, 1], [], []>} : vector<8x8xf32>, vector<8x32xf32>, vector<8x32xf32> -> vector<8x32xf32>
    %c8_229 = arith.constant 8 : index
    %c192_230 = arith.constant 192 : index
    %502 = vector.load %arg21[%c8_229, %c192_230] : memref<16x320xf32, #tpu.memory_space<vmem>>, vector<8x32xf32>
    tpu.vector_store %arg21[%c8_229, %c192_230], %500 {strides = array<i32>} : memref<16x320xf32, #tpu.memory_space<vmem>>, vector<8x32xf32>,
    %c8_231 = arith.constant 8 : index
    %c224_232 = arith.constant 224 : index
    %503 = vector.load %arg21[%c8_231, %c224_232] : memref<16x320xf32, #tpu.memory_space<vmem>>, vector<8x32xf32>
    tpu.vector_store %arg21[%c8_231, %c224_232], %501 {strides = array<i32>} : memref<16x320xf32, #tpu.memory_space<vmem>>, vector<8x32xf32>,
    %cst_233 = arith.constant dense<0.000000e+00> : vector<8x32xf32>
    %504 = tpu.matmul %3, %500, %cst_233 {dimension_numbers = #tpu.dot_dimension_numbers<[1], [0], [0], [1], [0, 0, 1, 1], [], []>} : vector<8x8xf32>, vector<8x32xf32>, vector<8x32xf32> -> vector<8x32xf32>
    %cst_234 = arith.constant 2.000000e+00 : f32
    %505 = vector.broadcast %cst_234 : f32 to vector<8x32xf32>
    %506 = arith.mulf %505, %504 : vector<8x32xf32>
    %507 = arith.subf %506, %481 : vector<8x32xf32>
    %cst_235 = arith.constant dense<0.000000e+00> : vector<8x32xf32>
    %508 = tpu.matmul %3, %501, %cst_235 {dimension_numbers = #tpu.dot_dimension_numbers<[1], [0], [0], [1], [0, 0, 1, 1], [], []>} : vector<8x8xf32>, vector<8x32xf32>, vector<8x32xf32> -> vector<8x32xf32>
    %cst_236 = arith.constant 2.000000e+00 : f32
    %509 = vector.broadcast %cst_236 : f32 to vector<8x32xf32>
    %510 = arith.mulf %509, %508 : vector<8x32xf32>
    %511 = arith.subf %510, %483 : vector<8x32xf32>
    %c8_237 = arith.constant 8 : index
    %c256_238 = arith.constant 256 : index
    %512 = vector.load %arg21[%c8_237, %c256_238] : memref<16x320xf32, #tpu.memory_space<vmem>>, vector<8x32xf32>
    tpu.vector_store %arg21[%c8_237, %c256_238], %507 {strides = array<i32>} : memref<16x320xf32, #tpu.memory_space<vmem>>, vector<8x32xf32>,
    %c8_239 = arith.constant 8 : index
    %c288_240 = arith.constant 288 : index
    %513 = vector.load %arg21[%c8_239, %c288_240] : memref<16x320xf32, #tpu.memory_space<vmem>>, vector<8x32xf32>
    tpu.vector_store %arg21[%c8_239, %c288_240], %511 {strides = array<i32>} : memref<16x320xf32, #tpu.memory_space<vmem>>, vector<8x32xf32>,
    %c0_241 = arith.constant 0 : index
    %c0_242 = arith.constant 0 : index
    %514 = vector.load %arg21[%c0_241, %c0_242] : memref<16x320xf32, #tpu.memory_space<vmem>>, vector<16x320xf32>
    %c0_243 = arith.constant 0 : index
    %c0_244 = arith.constant 0 : index
    %515 = vector.load %arg10[%c0_243, %c0_244] : memref<320x32xf32, #tpu.memory_space<vmem>>, vector<320x32xf32>
    %cst_245 = arith.constant dense<0.000000e+00> : vector<16x32xf32>
    %516 = tpu.matmul %514, %515, %cst_245 {dimension_numbers = #tpu.dot_dimension_numbers<[1], [0], [0], [1], [0, 0, 1, 1], [], []>} : vector<16x320xf32>, vector<320x32xf32>, vector<16x32xf32> -> vector<16x32xf32>
    %c0_246 = arith.constant 0 : index
    %c0_247 = arith.constant 0 : index
    %517 = vector.load %arg11[%c0_246, %c0_247] : memref<1x32xf32, #tpu.memory_space<vmem>>, vector<1x32xf32>
    %518 = vector.broadcast %517 : vector<1x32xf32> to vector<16x32xf32>
    %519 = arith.addf %516, %518 : vector<16x32xf32>
    %cst_248 = arith.constant 0.000000e+00 : f32
    %520 = vector.broadcast %cst_248 : f32 to vector<16x32xf32>
    %521 = arith.cmpf ogt, %519, %520 : vector<16x32xf32>
    %cst_249 = arith.constant 0.00999999977 : f32
    %522 = vector.broadcast %cst_249 : f32 to vector<16x32xf32>
    %523 = arith.mulf %522, %519 : vector<16x32xf32>
    %524 = arith.select %521, %519, %523 : vector<16x32xi1>, vector<16x32xf32>
    %525 = vector.shape_cast %524 : vector<16x32xf32> to vector<2x8x32xf32>
    %526 = vector.extract_strided_slice %525 {offsets = [0, 0, 0], sizes = [2, 8, 1], strides = [1, 1, 1]} : vector<2x8x32xf32> to vector<2x8x1xf32>
    %c0_250 = arith.constant 0 : index
    %c0_251 = arith.constant 0 : index
    %c0_252 = arith.constant 0 : index
    %527 = vector.load %arg13[%c0_250, %c0_251, %c0_252] : memref<32x8x32xf32, #tpu.memory_space<vmem>>, vector<1x8x32xf32>
    %528 = vector.shape_cast %527 : vector<1x8x32xf32> to vector<8x32xf32>
    %529 = vector.shape_cast %528 : vector<8x32xf32> to vector<1x8x32xf32>
    %530 = vector.broadcast %526 : vector<2x8x1xf32> to vector<2x8x32xf32>
    %531 = vector.broadcast %529 : vector<1x8x32xf32> to vector<2x8x32xf32>
    %532 = arith.mulf %530, %531 : vector<2x8x32xf32>
    %c0_253 = arith.constant 0 : index
    %c0_254 = arith.constant 0 : index
    %533 = vector.load %arg14[%c0_253, %c0_254] : memref<8x32xf32, #tpu.memory_space<vmem>>, vector<8x32xf32>
    %534 = vector.shape_cast %533 : vector<8x32xf32> to vector<1x8x32xf32>
    %535 = vector.broadcast %534 : vector<1x8x32xf32> to vector<2x8x32xf32>
    %536 = arith.addf %532, %535 : vector<2x8x32xf32>
    %537 = vector.extract_strided_slice %525 {offsets = [0, 0, 1], sizes = [2, 8, 1], strides = [1, 1, 1]} : vector<2x8x32xf32> to vector<2x8x1xf32>
    %c1_255 = arith.constant 1 : index
    %c0_256 = arith.constant 0 : index
    %c0_257 = arith.constant 0 : index
    %538 = vector.load %arg13[%c1_255, %c0_256, %c0_257] : memref<32x8x32xf32, #tpu.memory_space<vmem>>, vector<1x8x32xf32>
    %539 = vector.shape_cast %538 : vector<1x8x32xf32> to vector<8x32xf32>
    %540 = vector.shape_cast %539 : vector<8x32xf32> to vector<1x8x32xf32>
    %541 = vector.broadcast %537 : vector<2x8x1xf32> to vector<2x8x32xf32>
    %542 = vector.broadcast %540 : vector<1x8x32xf32> to vector<2x8x32xf32>
    %543 = arith.mulf %541, %542 : vector<2x8x32xf32>
    %544 = arith.addf %536, %543 : vector<2x8x32xf32>
    %545 = vector.extract_strided_slice %525 {offsets = [0, 0, 2], sizes = [2, 8, 1], strides = [1, 1, 1]} : vector<2x8x32xf32> to vector<2x8x1xf32>
    %c2_258 = arith.constant 2 : index
    %c0_259 = arith.constant 0 : index
    %c0_260 = arith.constant 0 : index
    %546 = vector.load %arg13[%c2_258, %c0_259, %c0_260] : memref<32x8x32xf32, #tpu.memory_space<vmem>>, vector<1x8x32xf32>
    %547 = vector.shape_cast %546 : vector<1x8x32xf32> to vector<8x32xf32>
    %548 = vector.shape_cast %547 : vector<8x32xf32> to vector<1x8x32xf32>
    %549 = vector.broadcast %545 : vector<2x8x1xf32> to vector<2x8x32xf32>
    %550 = vector.broadcast %548 : vector<1x8x32xf32> to vector<2x8x32xf32>
    %551 = arith.mulf %549, %550 : vector<2x8x32xf32>
    %552 = arith.addf %544, %551 : vector<2x8x32xf32>
    %553 = vector.extract_strided_slice %525 {offsets = [0, 0, 3], sizes = [2, 8, 1], strides = [1, 1, 1]} : vector<2x8x32xf32> to vector<2x8x1xf32>
    %c3_261 = arith.constant 3 : index
    %c0_262 = arith.constant 0 : index
    %c0_263 = arith.constant 0 : index
    %554 = vector.load %arg13[%c3_261, %c0_262, %c0_263] : memref<32x8x32xf32, #tpu.memory_space<vmem>>, vector<1x8x32xf32>
    %555 = vector.shape_cast %554 : vector<1x8x32xf32> to vector<8x32xf32>
    %556 = vector.shape_cast %555 : vector<8x32xf32> to vector<1x8x32xf32>
    %557 = vector.broadcast %553 : vector<2x8x1xf32> to vector<2x8x32xf32>
    %558 = vector.broadcast %556 : vector<1x8x32xf32> to vector<2x8x32xf32>
    %559 = arith.mulf %557, %558 : vector<2x8x32xf32>
    %560 = arith.addf %552, %559 : vector<2x8x32xf32>
    %561 = vector.extract_strided_slice %525 {offsets = [0, 0, 4], sizes = [2, 8, 1], strides = [1, 1, 1]} : vector<2x8x32xf32> to vector<2x8x1xf32>
    %c4_264 = arith.constant 4 : index
    %c0_265 = arith.constant 0 : index
    %c0_266 = arith.constant 0 : index
    %562 = vector.load %arg13[%c4_264, %c0_265, %c0_266] : memref<32x8x32xf32, #tpu.memory_space<vmem>>, vector<1x8x32xf32>
    %563 = vector.shape_cast %562 : vector<1x8x32xf32> to vector<8x32xf32>
    %564 = vector.shape_cast %563 : vector<8x32xf32> to vector<1x8x32xf32>
    %565 = vector.broadcast %561 : vector<2x8x1xf32> to vector<2x8x32xf32>
    %566 = vector.broadcast %564 : vector<1x8x32xf32> to vector<2x8x32xf32>
    %567 = arith.mulf %565, %566 : vector<2x8x32xf32>
    %568 = arith.addf %560, %567 : vector<2x8x32xf32>
    %569 = vector.extract_strided_slice %525 {offsets = [0, 0, 5], sizes = [2, 8, 1], strides = [1, 1, 1]} : vector<2x8x32xf32> to vector<2x8x1xf32>
    %c5_267 = arith.constant 5 : index
    %c0_268 = arith.constant 0 : index
    %c0_269 = arith.constant 0 : index
    %570 = vector.load %arg13[%c5_267, %c0_268, %c0_269] : memref<32x8x32xf32, #tpu.memory_space<vmem>>, vector<1x8x32xf32>
    %571 = vector.shape_cast %570 : vector<1x8x32xf32> to vector<8x32xf32>
    %572 = vector.shape_cast %571 : vector<8x32xf32> to vector<1x8x32xf32>
    %573 = vector.broadcast %569 : vector<2x8x1xf32> to vector<2x8x32xf32>
    %574 = vector.broadcast %572 : vector<1x8x32xf32> to vector<2x8x32xf32>
    %575 = arith.mulf %573, %574 : vector<2x8x32xf32>
    %576 = arith.addf %568, %575 : vector<2x8x32xf32>
    %577 = vector.extract_strided_slice %525 {offsets = [0, 0, 6], sizes = [2, 8, 1], strides = [1, 1, 1]} : vector<2x8x32xf32> to vector<2x8x1xf32>
    %c6_270 = arith.constant 6 : index
    %c0_271 = arith.constant 0 : index
    %c0_272 = arith.constant 0 : index
    %578 = vector.load %arg13[%c6_270, %c0_271, %c0_272] : memref<32x8x32xf32, #tpu.memory_space<vmem>>, vector<1x8x32xf32>
    %579 = vector.shape_cast %578 : vector<1x8x32xf32> to vector<8x32xf32>
    %580 = vector.shape_cast %579 : vector<8x32xf32> to vector<1x8x32xf32>
    %581 = vector.broadcast %577 : vector<2x8x1xf32> to vector<2x8x32xf32>
    %582 = vector.broadcast %580 : vector<1x8x32xf32> to vector<2x8x32xf32>
    %583 = arith.mulf %581, %582 : vector<2x8x32xf32>
    %584 = arith.addf %576, %583 : vector<2x8x32xf32>
    %585 = vector.extract_strided_slice %525 {offsets = [0, 0, 7], sizes = [2, 8, 1], strides = [1, 1, 1]} : vector<2x8x32xf32> to vector<2x8x1xf32>
    %c7_273 = arith.constant 7 : index
    %c0_274 = arith.constant 0 : index
    %c0_275 = arith.constant 0 : index
    %586 = vector.load %arg13[%c7_273, %c0_274, %c0_275] : memref<32x8x32xf32, #tpu.memory_space<vmem>>, vector<1x8x32xf32>
    %587 = vector.shape_cast %586 : vector<1x8x32xf32> to vector<8x32xf32>
    %588 = vector.shape_cast %587 : vector<8x32xf32> to vector<1x8x32xf32>
    %589 = vector.broadcast %585 : vector<2x8x1xf32> to vector<2x8x32xf32>
    %590 = vector.broadcast %588 : vector<1x8x32xf32> to vector<2x8x32xf32>
    %591 = arith.mulf %589, %590 : vector<2x8x32xf32>
    %592 = arith.addf %584, %591 : vector<2x8x32xf32>
    %593 = vector.extract_strided_slice %525 {offsets = [0, 0, 8], sizes = [2, 8, 1], strides = [1, 1, 1]} : vector<2x8x32xf32> to vector<2x8x1xf32>
    %c8_276 = arith.constant 8 : index
    %c0_277 = arith.constant 0 : index
    %c0_278 = arith.constant 0 : index
    %594 = vector.load %arg13[%c8_276, %c0_277, %c0_278] : memref<32x8x32xf32, #tpu.memory_space<vmem>>, vector<1x8x32xf32>
    %595 = vector.shape_cast %594 : vector<1x8x32xf32> to vector<8x32xf32>
    %596 = vector.shape_cast %595 : vector<8x32xf32> to vector<1x8x32xf32>
    %597 = vector.broadcast %593 : vector<2x8x1xf32> to vector<2x8x32xf32>
    %598 = vector.broadcast %596 : vector<1x8x32xf32> to vector<2x8x32xf32>
    %599 = arith.mulf %597, %598 : vector<2x8x32xf32>
    %600 = arith.addf %592, %599 : vector<2x8x32xf32>
    %601 = vector.extract_strided_slice %525 {offsets = [0, 0, 9], sizes = [2, 8, 1], strides = [1, 1, 1]} : vector<2x8x32xf32> to vector<2x8x1xf32>
    %c9_279 = arith.constant 9 : index
    %c0_280 = arith.constant 0 : index
    %c0_281 = arith.constant 0 : index
    %602 = vector.load %arg13[%c9_279, %c0_280, %c0_281] : memref<32x8x32xf32, #tpu.memory_space<vmem>>, vector<1x8x32xf32>
    %603 = vector.shape_cast %602 : vector<1x8x32xf32> to vector<8x32xf32>
    %604 = vector.shape_cast %603 : vector<8x32xf32> to vector<1x8x32xf32>
    %605 = vector.broadcast %601 : vector<2x8x1xf32> to vector<2x8x32xf32>
    %606 = vector.broadcast %604 : vector<1x8x32xf32> to vector<2x8x32xf32>
    %607 = arith.mulf %605, %606 : vector<2x8x32xf32>
    %608 = arith.addf %600, %607 : vector<2x8x32xf32>
    %609 = vector.extract_strided_slice %525 {offsets = [0, 0, 10], sizes = [2, 8, 1], strides = [1, 1, 1]} : vector<2x8x32xf32> to vector<2x8x1xf32>
    %c10_282 = arith.constant 10 : index
    %c0_283 = arith.constant 0 : index
    %c0_284 = arith.constant 0 : index
    %610 = vector.load %arg13[%c10_282, %c0_283, %c0_284] : memref<32x8x32xf32, #tpu.memory_space<vmem>>, vector<1x8x32xf32>
    %611 = vector.shape_cast %610 : vector<1x8x32xf32> to vector<8x32xf32>
    %612 = vector.shape_cast %611 : vector<8x32xf32> to vector<1x8x32xf32>
    %613 = vector.broadcast %609 : vector<2x8x1xf32> to vector<2x8x32xf32>
    %614 = vector.broadcast %612 : vector<1x8x32xf32> to vector<2x8x32xf32>
    %615 = arith.mulf %613, %614 : vector<2x8x32xf32>
    %616 = arith.addf %608, %615 : vector<2x8x32xf32>
    %617 = vector.extract_strided_slice %525 {offsets = [0, 0, 11], sizes = [2, 8, 1], strides = [1, 1, 1]} : vector<2x8x32xf32> to vector<2x8x1xf32>
    %c11_285 = arith.constant 11 : index
    %c0_286 = arith.constant 0 : index
    %c0_287 = arith.constant 0 : index
    %618 = vector.load %arg13[%c11_285, %c0_286, %c0_287] : memref<32x8x32xf32, #tpu.memory_space<vmem>>, vector<1x8x32xf32>
    %619 = vector.shape_cast %618 : vector<1x8x32xf32> to vector<8x32xf32>
    %620 = vector.shape_cast %619 : vector<8x32xf32> to vector<1x8x32xf32>
    %621 = vector.broadcast %617 : vector<2x8x1xf32> to vector<2x8x32xf32>
    %622 = vector.broadcast %620 : vector<1x8x32xf32> to vector<2x8x32xf32>
    %623 = arith.mulf %621, %622 : vector<2x8x32xf32>
    %624 = arith.addf %616, %623 : vector<2x8x32xf32>
    %625 = vector.extract_strided_slice %525 {offsets = [0, 0, 12], sizes = [2, 8, 1], strides = [1, 1, 1]} : vector<2x8x32xf32> to vector<2x8x1xf32>
    %c12_288 = arith.constant 12 : index
    %c0_289 = arith.constant 0 : index
    %c0_290 = arith.constant 0 : index
    %626 = vector.load %arg13[%c12_288, %c0_289, %c0_290] : memref<32x8x32xf32, #tpu.memory_space<vmem>>, vector<1x8x32xf32>
    %627 = vector.shape_cast %626 : vector<1x8x32xf32> to vector<8x32xf32>
    %628 = vector.shape_cast %627 : vector<8x32xf32> to vector<1x8x32xf32>
    %629 = vector.broadcast %625 : vector<2x8x1xf32> to vector<2x8x32xf32>
    %630 = vector.broadcast %628 : vector<1x8x32xf32> to vector<2x8x32xf32>
    %631 = arith.mulf %629, %630 : vector<2x8x32xf32>
    %632 = arith.addf %624, %631 : vector<2x8x32xf32>
    %633 = vector.extract_strided_slice %525 {offsets = [0, 0, 13], sizes = [2, 8, 1], strides = [1, 1, 1]} : vector<2x8x32xf32> to vector<2x8x1xf32>
    %c13_291 = arith.constant 13 : index
    %c0_292 = arith.constant 0 : index
    %c0_293 = arith.constant 0 : index
    %634 = vector.load %arg13[%c13_291, %c0_292, %c0_293] : memref<32x8x32xf32, #tpu.memory_space<vmem>>, vector<1x8x32xf32>
    %635 = vector.shape_cast %634 : vector<1x8x32xf32> to vector<8x32xf32>
    %636 = vector.shape_cast %635 : vector<8x32xf32> to vector<1x8x32xf32>
    %637 = vector.broadcast %633 : vector<2x8x1xf32> to vector<2x8x32xf32>
    %638 = vector.broadcast %636 : vector<1x8x32xf32> to vector<2x8x32xf32>
    %639 = arith.mulf %637, %638 : vector<2x8x32xf32>
    %640 = arith.addf %632, %639 : vector<2x8x32xf32>
    %641 = vector.extract_strided_slice %525 {offsets = [0, 0, 14], sizes = [2, 8, 1], strides = [1, 1, 1]} : vector<2x8x32xf32> to vector<2x8x1xf32>
    %c14_294 = arith.constant 14 : index
    %c0_295 = arith.constant 0 : index
    %c0_296 = arith.constant 0 : index
    %642 = vector.load %arg13[%c14_294, %c0_295, %c0_296] : memref<32x8x32xf32, #tpu.memory_space<vmem>>, vector<1x8x32xf32>
    %643 = vector.shape_cast %642 : vector<1x8x32xf32> to vector<8x32xf32>
    %644 = vector.shape_cast %643 : vector<8x32xf32> to vector<1x8x32xf32>
    %645 = vector.broadcast %641 : vector<2x8x1xf32> to vector<2x8x32xf32>
    %646 = vector.broadcast %644 : vector<1x8x32xf32> to vector<2x8x32xf32>
    %647 = arith.mulf %645, %646 : vector<2x8x32xf32>
    %648 = arith.addf %640, %647 : vector<2x8x32xf32>
    %649 = vector.extract_strided_slice %525 {offsets = [0, 0, 15], sizes = [2, 8, 1], strides = [1, 1, 1]} : vector<2x8x32xf32> to vector<2x8x1xf32>
    %c15_297 = arith.constant 15 : index
    %c0_298 = arith.constant 0 : index
    %c0_299 = arith.constant 0 : index
    %650 = vector.load %arg13[%c15_297, %c0_298, %c0_299] : memref<32x8x32xf32, #tpu.memory_space<vmem>>, vector<1x8x32xf32>
    %651 = vector.shape_cast %650 : vector<1x8x32xf32> to vector<8x32xf32>
    %652 = vector.shape_cast %651 : vector<8x32xf32> to vector<1x8x32xf32>
    %653 = vector.broadcast %649 : vector<2x8x1xf32> to vector<2x8x32xf32>
    %654 = vector.broadcast %652 : vector<1x8x32xf32> to vector<2x8x32xf32>
    %655 = arith.mulf %653, %654 : vector<2x8x32xf32>
    %656 = arith.addf %648, %655 : vector<2x8x32xf32>
    %657 = vector.extract_strided_slice %525 {offsets = [0, 0, 16], sizes = [2, 8, 1], strides = [1, 1, 1]} : vector<2x8x32xf32> to vector<2x8x1xf32>
    %c16_300 = arith.constant 16 : index
    %c0_301 = arith.constant 0 : index
    %c0_302 = arith.constant 0 : index
    %658 = vector.load %arg13[%c16_300, %c0_301, %c0_302] : memref<32x8x32xf32, #tpu.memory_space<vmem>>, vector<1x8x32xf32>
    %659 = vector.shape_cast %658 : vector<1x8x32xf32> to vector<8x32xf32>
    %660 = vector.shape_cast %659 : vector<8x32xf32> to vector<1x8x32xf32>
    %661 = vector.broadcast %657 : vector<2x8x1xf32> to vector<2x8x32xf32>
    %662 = vector.broadcast %660 : vector<1x8x32xf32> to vector<2x8x32xf32>
    %663 = arith.mulf %661, %662 : vector<2x8x32xf32>
    %664 = arith.addf %656, %663 : vector<2x8x32xf32>
    %665 = vector.extract_strided_slice %525 {offsets = [0, 0, 17], sizes = [2, 8, 1], strides = [1, 1, 1]} : vector<2x8x32xf32> to vector<2x8x1xf32>
    %c17_303 = arith.constant 17 : index
    %c0_304 = arith.constant 0 : index
    %c0_305 = arith.constant 0 : index
    %666 = vector.load %arg13[%c17_303, %c0_304, %c0_305] : memref<32x8x32xf32, #tpu.memory_space<vmem>>, vector<1x8x32xf32>
    %667 = vector.shape_cast %666 : vector<1x8x32xf32> to vector<8x32xf32>
    %668 = vector.shape_cast %667 : vector<8x32xf32> to vector<1x8x32xf32>
    %669 = vector.broadcast %665 : vector<2x8x1xf32> to vector<2x8x32xf32>
    %670 = vector.broadcast %668 : vector<1x8x32xf32> to vector<2x8x32xf32>
    %671 = arith.mulf %669, %670 : vector<2x8x32xf32>
    %672 = arith.addf %664, %671 : vector<2x8x32xf32>
    %673 = vector.extract_strided_slice %525 {offsets = [0, 0, 18], sizes = [2, 8, 1], strides = [1, 1, 1]} : vector<2x8x32xf32> to vector<2x8x1xf32>
    %c18_306 = arith.constant 18 : index
    %c0_307 = arith.constant 0 : index
    %c0_308 = arith.constant 0 : index
    %674 = vector.load %arg13[%c18_306, %c0_307, %c0_308] : memref<32x8x32xf32, #tpu.memory_space<vmem>>, vector<1x8x32xf32>
    %675 = vector.shape_cast %674 : vector<1x8x32xf32> to vector<8x32xf32>
    %676 = vector.shape_cast %675 : vector<8x32xf32> to vector<1x8x32xf32>
    %677 = vector.broadcast %673 : vector<2x8x1xf32> to vector<2x8x32xf32>
    %678 = vector.broadcast %676 : vector<1x8x32xf32> to vector<2x8x32xf32>
    %679 = arith.mulf %677, %678 : vector<2x8x32xf32>
    %680 = arith.addf %672, %679 : vector<2x8x32xf32>
    %681 = vector.extract_strided_slice %525 {offsets = [0, 0, 19], sizes = [2, 8, 1], strides = [1, 1, 1]} : vector<2x8x32xf32> to vector<2x8x1xf32>
    %c19_309 = arith.constant 19 : index
    %c0_310 = arith.constant 0 : index
    %c0_311 = arith.constant 0 : index
    %682 = vector.load %arg13[%c19_309, %c0_310, %c0_311] : memref<32x8x32xf32, #tpu.memory_space<vmem>>, vector<1x8x32xf32>
    %683 = vector.shape_cast %682 : vector<1x8x32xf32> to vector<8x32xf32>
    %684 = vector.shape_cast %683 : vector<8x32xf32> to vector<1x8x32xf32>
    %685 = vector.broadcast %681 : vector<2x8x1xf32> to vector<2x8x32xf32>
    %686 = vector.broadcast %684 : vector<1x8x32xf32> to vector<2x8x32xf32>
    %687 = arith.mulf %685, %686 : vector<2x8x32xf32>
    %688 = arith.addf %680, %687 : vector<2x8x32xf32>
    %689 = vector.extract_strided_slice %525 {offsets = [0, 0, 20], sizes = [2, 8, 1], strides = [1, 1, 1]} : vector<2x8x32xf32> to vector<2x8x1xf32>
    %c20_312 = arith.constant 20 : index
    %c0_313 = arith.constant 0 : index
    %c0_314 = arith.constant 0 : index
    %690 = vector.load %arg13[%c20_312, %c0_313, %c0_314] : memref<32x8x32xf32, #tpu.memory_space<vmem>>, vector<1x8x32xf32>
    %691 = vector.shape_cast %690 : vector<1x8x32xf32> to vector<8x32xf32>
    %692 = vector.shape_cast %691 : vector<8x32xf32> to vector<1x8x32xf32>
    %693 = vector.broadcast %689 : vector<2x8x1xf32> to vector<2x8x32xf32>
    %694 = vector.broadcast %692 : vector<1x8x32xf32> to vector<2x8x32xf32>
    %695 = arith.mulf %693, %694 : vector<2x8x32xf32>
    %696 = arith.addf %688, %695 : vector<2x8x32xf32>
    %697 = vector.extract_strided_slice %525 {offsets = [0, 0, 21], sizes = [2, 8, 1], strides = [1, 1, 1]} : vector<2x8x32xf32> to vector<2x8x1xf32>
    %c21_315 = arith.constant 21 : index
    %c0_316 = arith.constant 0 : index
    %c0_317 = arith.constant 0 : index
    %698 = vector.load %arg13[%c21_315, %c0_316, %c0_317] : memref<32x8x32xf32, #tpu.memory_space<vmem>>, vector<1x8x32xf32>
    %699 = vector.shape_cast %698 : vector<1x8x32xf32> to vector<8x32xf32>
    %700 = vector.shape_cast %699 : vector<8x32xf32> to vector<1x8x32xf32>
    %701 = vector.broadcast %697 : vector<2x8x1xf32> to vector<2x8x32xf32>
    %702 = vector.broadcast %700 : vector<1x8x32xf32> to vector<2x8x32xf32>
    %703 = arith.mulf %701, %702 : vector<2x8x32xf32>
    %704 = arith.addf %696, %703 : vector<2x8x32xf32>
    %705 = vector.extract_strided_slice %525 {offsets = [0, 0, 22], sizes = [2, 8, 1], strides = [1, 1, 1]} : vector<2x8x32xf32> to vector<2x8x1xf32>
    %c22_318 = arith.constant 22 : index
    %c0_319 = arith.constant 0 : index
    %c0_320 = arith.constant 0 : index
    %706 = vector.load %arg13[%c22_318, %c0_319, %c0_320] : memref<32x8x32xf32, #tpu.memory_space<vmem>>, vector<1x8x32xf32>
    %707 = vector.shape_cast %706 : vector<1x8x32xf32> to vector<8x32xf32>
    %708 = vector.shape_cast %707 : vector<8x32xf32> to vector<1x8x32xf32>
    %709 = vector.broadcast %705 : vector<2x8x1xf32> to vector<2x8x32xf32>
    %710 = vector.broadcast %708 : vector<1x8x32xf32> to vector<2x8x32xf32>
    %711 = arith.mulf %709, %710 : vector<2x8x32xf32>
    %712 = arith.addf %704, %711 : vector<2x8x32xf32>
    %713 = vector.extract_strided_slice %525 {offsets = [0, 0, 23], sizes = [2, 8, 1], strides = [1, 1, 1]} : vector<2x8x32xf32> to vector<2x8x1xf32>
    %c23_321 = arith.constant 23 : index
    %c0_322 = arith.constant 0 : index
    %c0_323 = arith.constant 0 : index
    %714 = vector.load %arg13[%c23_321, %c0_322, %c0_323] : memref<32x8x32xf32, #tpu.memory_space<vmem>>, vector<1x8x32xf32>
    %715 = vector.shape_cast %714 : vector<1x8x32xf32> to vector<8x32xf32>
    %716 = vector.shape_cast %715 : vector<8x32xf32> to vector<1x8x32xf32>
    %717 = vector.broadcast %713 : vector<2x8x1xf32> to vector<2x8x32xf32>
    %718 = vector.broadcast %716 : vector<1x8x32xf32> to vector<2x8x32xf32>
    %719 = arith.mulf %717, %718 : vector<2x8x32xf32>
    %720 = arith.addf %712, %719 : vector<2x8x32xf32>
    %721 = vector.extract_strided_slice %525 {offsets = [0, 0, 24], sizes = [2, 8, 1], strides = [1, 1, 1]} : vector<2x8x32xf32> to vector<2x8x1xf32>
    %c24_324 = arith.constant 24 : index
    %c0_325 = arith.constant 0 : index
    %c0_326 = arith.constant 0 : index
    %722 = vector.load %arg13[%c24_324, %c0_325, %c0_326] : memref<32x8x32xf32, #tpu.memory_space<vmem>>, vector<1x8x32xf32>
    %723 = vector.shape_cast %722 : vector<1x8x32xf32> to vector<8x32xf32>
    %724 = vector.shape_cast %723 : vector<8x32xf32> to vector<1x8x32xf32>
    %725 = vector.broadcast %721 : vector<2x8x1xf32> to vector<2x8x32xf32>
    %726 = vector.broadcast %724 : vector<1x8x32xf32> to vector<2x8x32xf32>
    %727 = arith.mulf %725, %726 : vector<2x8x32xf32>
    %728 = arith.addf %720, %727 : vector<2x8x32xf32>
    %729 = vector.extract_strided_slice %525 {offsets = [0, 0, 25], sizes = [2, 8, 1], strides = [1, 1, 1]} : vector<2x8x32xf32> to vector<2x8x1xf32>
    %c25_327 = arith.constant 25 : index
    %c0_328 = arith.constant 0 : index
    %c0_329 = arith.constant 0 : index
    %730 = vector.load %arg13[%c25_327, %c0_328, %c0_329] : memref<32x8x32xf32, #tpu.memory_space<vmem>>, vector<1x8x32xf32>
    %731 = vector.shape_cast %730 : vector<1x8x32xf32> to vector<8x32xf32>
    %732 = vector.shape_cast %731 : vector<8x32xf32> to vector<1x8x32xf32>
    %733 = vector.broadcast %729 : vector<2x8x1xf32> to vector<2x8x32xf32>
    %734 = vector.broadcast %732 : vector<1x8x32xf32> to vector<2x8x32xf32>
    %735 = arith.mulf %733, %734 : vector<2x8x32xf32>
    %736 = arith.addf %728, %735 : vector<2x8x32xf32>
    %737 = vector.extract_strided_slice %525 {offsets = [0, 0, 26], sizes = [2, 8, 1], strides = [1, 1, 1]} : vector<2x8x32xf32> to vector<2x8x1xf32>
    %c26_330 = arith.constant 26 : index
    %c0_331 = arith.constant 0 : index
    %c0_332 = arith.constant 0 : index
    %738 = vector.load %arg13[%c26_330, %c0_331, %c0_332] : memref<32x8x32xf32, #tpu.memory_space<vmem>>, vector<1x8x32xf32>
    %739 = vector.shape_cast %738 : vector<1x8x32xf32> to vector<8x32xf32>
    %740 = vector.shape_cast %739 : vector<8x32xf32> to vector<1x8x32xf32>
    %741 = vector.broadcast %737 : vector<2x8x1xf32> to vector<2x8x32xf32>
    %742 = vector.broadcast %740 : vector<1x8x32xf32> to vector<2x8x32xf32>
    %743 = arith.mulf %741, %742 : vector<2x8x32xf32>
    %744 = arith.addf %736, %743 : vector<2x8x32xf32>
    %745 = vector.extract_strided_slice %525 {offsets = [0, 0, 27], sizes = [2, 8, 1], strides = [1, 1, 1]} : vector<2x8x32xf32> to vector<2x8x1xf32>
    %c27_333 = arith.constant 27 : index
    %c0_334 = arith.constant 0 : index
    %c0_335 = arith.constant 0 : index
    %746 = vector.load %arg13[%c27_333, %c0_334, %c0_335] : memref<32x8x32xf32, #tpu.memory_space<vmem>>, vector<1x8x32xf32>
    %747 = vector.shape_cast %746 : vector<1x8x32xf32> to vector<8x32xf32>
    %748 = vector.shape_cast %747 : vector<8x32xf32> to vector<1x8x32xf32>
    %749 = vector.broadcast %745 : vector<2x8x1xf32> to vector<2x8x32xf32>
    %750 = vector.broadcast %748 : vector<1x8x32xf32> to vector<2x8x32xf32>
    %751 = arith.mulf %749, %750 : vector<2x8x32xf32>
    %752 = arith.addf %744, %751 : vector<2x8x32xf32>
    %753 = vector.extract_strided_slice %525 {offsets = [0, 0, 28], sizes = [2, 8, 1], strides = [1, 1, 1]} : vector<2x8x32xf32> to vector<2x8x1xf32>
    %c28_336 = arith.constant 28 : index
    %c0_337 = arith.constant 0 : index
    %c0_338 = arith.constant 0 : index
    %754 = vector.load %arg13[%c28_336, %c0_337, %c0_338] : memref<32x8x32xf32, #tpu.memory_space<vmem>>, vector<1x8x32xf32>
    %755 = vector.shape_cast %754 : vector<1x8x32xf32> to vector<8x32xf32>
    %756 = vector.shape_cast %755 : vector<8x32xf32> to vector<1x8x32xf32>
    %757 = vector.broadcast %753 : vector<2x8x1xf32> to vector<2x8x32xf32>
    %758 = vector.broadcast %756 : vector<1x8x32xf32> to vector<2x8x32xf32>
    %759 = arith.mulf %757, %758 : vector<2x8x32xf32>
    %760 = arith.addf %752, %759 : vector<2x8x32xf32>
    %761 = vector.extract_strided_slice %525 {offsets = [0, 0, 29], sizes = [2, 8, 1], strides = [1, 1, 1]} : vector<2x8x32xf32> to vector<2x8x1xf32>
    %c29_339 = arith.constant 29 : index
    %c0_340 = arith.constant 0 : index
    %c0_341 = arith.constant 0 : index
    %762 = vector.load %arg13[%c29_339, %c0_340, %c0_341] : memref<32x8x32xf32, #tpu.memory_space<vmem>>, vector<1x8x32xf32>
    %763 = vector.shape_cast %762 : vector<1x8x32xf32> to vector<8x32xf32>
    %764 = vector.shape_cast %763 : vector<8x32xf32> to vector<1x8x32xf32>
    %765 = vector.broadcast %761 : vector<2x8x1xf32> to vector<2x8x32xf32>
    %766 = vector.broadcast %764 : vector<1x8x32xf32> to vector<2x8x32xf32>
    %767 = arith.mulf %765, %766 : vector<2x8x32xf32>
    %768 = arith.addf %760, %767 : vector<2x8x32xf32>
    %769 = vector.extract_strided_slice %525 {offsets = [0, 0, 30], sizes = [2, 8, 1], strides = [1, 1, 1]} : vector<2x8x32xf32> to vector<2x8x1xf32>
    %c30_342 = arith.constant 30 : index
    %c0_343 = arith.constant 0 : index
    %c0_344 = arith.constant 0 : index
    %770 = vector.load %arg13[%c30_342, %c0_343, %c0_344] : memref<32x8x32xf32, #tpu.memory_space<vmem>>, vector<1x8x32xf32>
    %771 = vector.shape_cast %770 : vector<1x8x32xf32> to vector<8x32xf32>
    %772 = vector.shape_cast %771 : vector<8x32xf32> to vector<1x8x32xf32>
    %773 = vector.broadcast %769 : vector<2x8x1xf32> to vector<2x8x32xf32>
    %774 = vector.broadcast %772 : vector<1x8x32xf32> to vector<2x8x32xf32>
    %775 = arith.mulf %773, %774 : vector<2x8x32xf32>
    %776 = arith.addf %768, %775 : vector<2x8x32xf32>
    %777 = vector.extract_strided_slice %525 {offsets = [0, 0, 31], sizes = [2, 8, 1], strides = [1, 1, 1]} : vector<2x8x32xf32> to vector<2x8x1xf32>
    %c31_345 = arith.constant 31 : index
    %c0_346 = arith.constant 0 : index
    %c0_347 = arith.constant 0 : index
    %778 = vector.load %arg13[%c31_345, %c0_346, %c0_347] : memref<32x8x32xf32, #tpu.memory_space<vmem>>, vector<1x8x32xf32>
    %779 = vector.shape_cast %778 : vector<1x8x32xf32> to vector<8x32xf32>
    %780 = vector.shape_cast %779 : vector<8x32xf32> to vector<1x8x32xf32>
    %781 = vector.broadcast %777 : vector<2x8x1xf32> to vector<2x8x32xf32>
    %782 = vector.broadcast %780 : vector<1x8x32xf32> to vector<2x8x32xf32>
    %783 = arith.mulf %781, %782 : vector<2x8x32xf32>
    %784 = arith.addf %776, %783 : vector<2x8x32xf32>
    %c0_348 = arith.constant 0 : index
    %c0_349 = arith.constant 0 : index
    %c0_350 = arith.constant 0 : index
    %785 = vector.load %arg15[%c0_348, %c0_349, %c0_350] : memref<1x8x32xf32, #tpu.memory_space<vmem>>, vector<1x8x32xf32>
    %786 = vector.shape_cast %785 : vector<1x8x32xf32> to vector<8x32xf32>
    %c0_351 = arith.constant 0 : index
    %c0_352 = arith.constant 0 : index
    %c0_353 = arith.constant 0 : index
    %787 = vector.load %arg16[%c0_351, %c0_352, %c0_353] : memref<1x1x1xf32, #tpu.memory_space<vmem>>, vector<1x1x1xf32>
    %788 = vector.extract_strided_slice %440 {offsets = [0, 0, 0, 0], sizes = [2, 1, 8, 32], strides = [1, 1, 1, 1]} : vector<2x3x8x32xf32> to vector<2x1x8x32xf32>
    %789 = vector.shape_cast %788 : vector<2x1x8x32xf32> to vector<2x8x32xf32>
    %c0_354 = arith.constant 0 : index
    %c0_355 = arith.constant 0 : index
    %c0_356 = arith.constant 0 : index
    %790 = vector.load %arg12[%c0_354, %c0_355, %c0_356] : memref<3x8x32xf32, #tpu.memory_space<vmem>>, vector<1x8x32xf32>
    %791 = vector.shape_cast %790 : vector<1x8x32xf32> to vector<8x32xf32>
    %792 = vector.shape_cast %791 : vector<8x32xf32> to vector<1x8x32xf32>
    %793 = vector.broadcast %792 : vector<1x8x32xf32> to vector<2x8x32xf32>
    %794 = arith.addf %789, %793 : vector<2x8x32xf32>
    %795 = vector.shape_cast %786 : vector<8x32xf32> to vector<1x8x32xf32>
    %796 = vector.broadcast %795 : vector<1x8x32xf32> to vector<2x8x32xf32>
    %797 = arith.mulf %794, %796 : vector<2x8x32xf32>
    %cst_357 = arith.constant dense<0.000000e+00> : vector<2x8xf32>
    %798 = vector.multi_reduction <add>, %797, %cst_357 [2] : vector<2x8x32xf32> to vector<2x8xf32>
    %799 = vector.shape_cast %798 : vector<2x8xf32> to vector<2x8x1xf32>
    %cst_358 = arith.constant dense<0.000000e+00> : vector<2x1xf32>
    %800 = vector.multi_reduction <add>, %799, %cst_358 [1] : vector<2x8x1xf32> to vector<2x1xf32>
    %801 = vector.shape_cast %800 : vector<2x1xf32> to vector<2x1x1xf32>
    %802 = vector.broadcast %787 : vector<1x1x1xf32> to vector<2x1x1xf32>
    %803 = arith.addf %801, %802 : vector<2x1x1xf32>
    %804 = vector.extract_strided_slice %440 {offsets = [0, 1, 0, 0], sizes = [2, 1, 8, 32], strides = [1, 1, 1, 1]} : vector<2x3x8x32xf32> to vector<2x1x8x32xf32>
    %805 = vector.shape_cast %804 : vector<2x1x8x32xf32> to vector<2x8x32xf32>
    %c1_359 = arith.constant 1 : index
    %c0_360 = arith.constant 0 : index
    %c0_361 = arith.constant 0 : index
    %806 = vector.load %arg12[%c1_359, %c0_360, %c0_361] : memref<3x8x32xf32, #tpu.memory_space<vmem>>, vector<1x8x32xf32>
    %807 = vector.shape_cast %806 : vector<1x8x32xf32> to vector<8x32xf32>
    %808 = vector.shape_cast %807 : vector<8x32xf32> to vector<1x8x32xf32>
    %809 = vector.broadcast %808 : vector<1x8x32xf32> to vector<2x8x32xf32>
    %810 = arith.addf %805, %809 : vector<2x8x32xf32>
    %811 = vector.shape_cast %786 : vector<8x32xf32> to vector<1x8x32xf32>
    %812 = vector.broadcast %811 : vector<1x8x32xf32> to vector<2x8x32xf32>
    %813 = arith.mulf %810, %812 : vector<2x8x32xf32>
    %cst_362 = arith.constant dense<0.000000e+00> : vector<2x8xf32>
    %814 = vector.multi_reduction <add>, %813, %cst_362 [2] : vector<2x8x32xf32> to vector<2x8xf32>
    %815 = vector.shape_cast %814 : vector<2x8xf32> to vector<2x8x1xf32>
    %cst_363 = arith.constant dense<0.000000e+00> : vector<2x1xf32>
    %816 = vector.multi_reduction <add>, %815, %cst_363 [1] : vector<2x8x1xf32> to vector<2x1xf32>
    %817 = vector.shape_cast %816 : vector<2x1xf32> to vector<2x1x1xf32>
    %818 = vector.broadcast %787 : vector<1x1x1xf32> to vector<2x1x1xf32>
    %819 = arith.addf %817, %818 : vector<2x1x1xf32>
    %820 = vector.extract_strided_slice %440 {offsets = [0, 2, 0, 0], sizes = [2, 1, 8, 32], strides = [1, 1, 1, 1]} : vector<2x3x8x32xf32> to vector<2x1x8x32xf32>
    %821 = vector.shape_cast %820 : vector<2x1x8x32xf32> to vector<2x8x32xf32>
    %c2_364 = arith.constant 2 : index
    %c0_365 = arith.constant 0 : index
    %c0_366 = arith.constant 0 : index
    %822 = vector.load %arg12[%c2_364, %c0_365, %c0_366] : memref<3x8x32xf32, #tpu.memory_space<vmem>>, vector<1x8x32xf32>
    %823 = vector.shape_cast %822 : vector<1x8x32xf32> to vector<8x32xf32>
    %824 = vector.shape_cast %823 : vector<8x32xf32> to vector<1x8x32xf32>
    %825 = vector.broadcast %824 : vector<1x8x32xf32> to vector<2x8x32xf32>
    %826 = arith.addf %821, %825 : vector<2x8x32xf32>
    %827 = vector.shape_cast %786 : vector<8x32xf32> to vector<1x8x32xf32>
    %828 = vector.broadcast %827 : vector<1x8x32xf32> to vector<2x8x32xf32>
    %829 = arith.mulf %826, %828 : vector<2x8x32xf32>
    %cst_367 = arith.constant dense<0.000000e+00> : vector<2x8xf32>
    %830 = vector.multi_reduction <add>, %829, %cst_367 [2] : vector<2x8x32xf32> to vector<2x8xf32>
    %831 = vector.shape_cast %830 : vector<2x8xf32> to vector<2x8x1xf32>
    %cst_368 = arith.constant dense<0.000000e+00> : vector<2x1xf32>
    %832 = vector.multi_reduction <add>, %831, %cst_368 [1] : vector<2x8x1xf32> to vector<2x1xf32>
    %833 = vector.shape_cast %832 : vector<2x1xf32> to vector<2x1x1xf32>
    %834 = vector.broadcast %787 : vector<1x1x1xf32> to vector<2x1x1xf32>
    %835 = arith.addf %833, %834 : vector<2x1x1xf32>
    %836 = arith.maximumf %803, %819 : vector<2x1x1xf32>
    %837 = arith.maximumf %836, %835 : vector<2x1x1xf32>
    %838 = arith.subf %803, %837 : vector<2x1x1xf32>
    %839 = math.exp %838 : vector<2x1x1xf32>
    %840 = arith.subf %819, %837 : vector<2x1x1xf32>
    %841 = math.exp %840 : vector<2x1x1xf32>
    %842 = arith.subf %835, %837 : vector<2x1x1xf32>
    %843 = math.exp %842 : vector<2x1x1xf32>
    %844 = arith.addf %839, %841 : vector<2x1x1xf32>
    %845 = arith.addf %844, %843 : vector<2x1x1xf32>
    %cst_369 = arith.constant 1.000000e+00 : f32
    %846 = vector.broadcast %cst_369 : f32 to vector<2x1x1xf32>
    %847 = arith.divf %846, %845 : vector<2x1x1xf32>
    %848 = arith.mulf %839, %847 : vector<2x1x1xf32>
    %849 = vector.broadcast %848 : vector<2x1x1xf32> to vector<2x8x32xf32>
    %850 = arith.mulf %794, %849 : vector<2x8x32xf32>
    %851 = arith.mulf %841, %847 : vector<2x1x1xf32>
    %852 = vector.broadcast %851 : vector<2x1x1xf32> to vector<2x8x32xf32>
    %853 = arith.mulf %810, %852 : vector<2x8x32xf32>
    %854 = arith.addf %850, %853 : vector<2x8x32xf32>
    %855 = arith.mulf %843, %847 : vector<2x1x1xf32>
    %856 = vector.broadcast %855 : vector<2x1x1xf32> to vector<2x8x32xf32>
    %857 = arith.mulf %826, %856 : vector<2x8x32xf32>
    %858 = arith.addf %854, %857 : vector<2x8x32xf32>
    %859 = arith.addf %784, %858 : vector<2x8x32xf32>
    %860 = vector.extract_strided_slice %440 {offsets = [0, 1, 0, 0], sizes = [2, 1, 8, 32], strides = [1, 1, 1, 1]} : vector<2x3x8x32xf32> to vector<2x1x8x32xf32>
    %861 = vector.shape_cast %860 : vector<2x1x8x32xf32> to vector<2x8x32xf32>
    %c1_370 = arith.constant 1 : index
    %c0_371 = arith.constant 0 : index
    %c0_372 = arith.constant 0 : index
    %c0_373 = arith.constant 0 : index
    %c0_374 = arith.constant 0 : index
    %862 = vector.load %arg20[%c1_370, %c0_371, %c0_372, %c0_373, %c0_374] : memref<2x2x3x8x32xf32, #tpu.memory_space<vmem>>, vector<1x2x1x8x32xf32>
    %863 = vector.shape_cast %862 : vector<1x2x1x8x32xf32> to vector<2x8x32xf32>
    %864 = vector.shape_cast %861 : vector<2x8x32xf32> to vector<1x2x1x8x32xf32>
    tpu.vector_store %arg20[%c1_370, %c0_371, %c0_372, %c0_373, %c0_374], %864 {strides = array<i32>} : memref<2x2x3x8x32xf32, #tpu.memory_space<vmem>>, vector<1x2x1x8x32xf32>,
    %865 = vector.extract_strided_slice %440 {offsets = [0, 2, 0, 0], sizes = [2, 1, 8, 32], strides = [1, 1, 1, 1]} : vector<2x3x8x32xf32> to vector<2x1x8x32xf32>
    %866 = vector.shape_cast %865 : vector<2x1x8x32xf32> to vector<2x8x32xf32>
    %c1_375 = arith.constant 1 : index
    %c0_376 = arith.constant 0 : index
    %c1_377 = arith.constant 1 : index
    %c0_378 = arith.constant 0 : index
    %c0_379 = arith.constant 0 : index
    %867 = vector.load %arg20[%c1_375, %c0_376, %c1_377, %c0_378, %c0_379] : memref<2x2x3x8x32xf32, #tpu.memory_space<vmem>>, vector<1x2x1x8x32xf32>
    %868 = vector.shape_cast %867 : vector<1x2x1x8x32xf32> to vector<2x8x32xf32>
    %869 = vector.shape_cast %866 : vector<2x8x32xf32> to vector<1x2x1x8x32xf32>
    tpu.vector_store %arg20[%c1_375, %c0_376, %c1_377, %c0_378, %c0_379], %869 {strides = array<i32>} : memref<2x2x3x8x32xf32, #tpu.memory_space<vmem>>, vector<1x2x1x8x32xf32>,
    %c1_380 = arith.constant 1 : index
    %c0_381 = arith.constant 0 : index
    %c2_382 = arith.constant 2 : index
    %c0_383 = arith.constant 0 : index
    %c0_384 = arith.constant 0 : index
    %870 = vector.load %arg20[%c1_380, %c0_381, %c2_382, %c0_383, %c0_384] : memref<2x2x3x8x32xf32, #tpu.memory_space<vmem>>, vector<1x2x1x8x32xf32>
    %871 = vector.shape_cast %870 : vector<1x2x1x8x32xf32> to vector<2x8x32xf32>
    %872 = vector.shape_cast %859 : vector<2x8x32xf32> to vector<1x2x1x8x32xf32>
    tpu.vector_store %arg20[%c1_380, %c0_381, %c2_382, %c0_383, %c0_384], %872 {strides = array<i32>} : memref<2x2x3x8x32xf32, #tpu.memory_space<vmem>>, vector<1x2x1x8x32xf32>,
    %873 = arith.addf %425, %859 : vector<2x8x32xf32>
    %874 = vector.shape_cast %873 : vector<2x8x32xf32> to vector<16x32xf32>
    %c0_385 = arith.constant 0 : index
    %c0_386 = arith.constant 0 : index
    %875 = vector.load %arg17[%c0_385, %c0_386] : memref<32x6xf32, #tpu.memory_space<vmem>>, vector<32x6xf32>
    %cst_387 = arith.constant dense<0.000000e+00> : vector<16x6xf32>
    %876 = tpu.matmul %874, %875, %cst_387 {dimension_numbers = #tpu.dot_dimension_numbers<[1], [0], [0], [1], [0, 0, 1, 1], [], []>} : vector<16x32xf32>, vector<32x6xf32>, vector<16x6xf32> -> vector<16x6xf32>
    %c0_388 = arith.constant 0 : index
    %c0_389 = arith.constant 0 : index
    %877 = vector.load %arg18[%c0_388, %c0_389] : memref<1x6xf32, #tpu.memory_space<vmem>>, vector<1x6xf32>
    %878 = vector.broadcast %877 : vector<1x6xf32> to vector<16x6xf32>
    %879 = arith.addf %876, %878 : vector<16x6xf32>
    %880 = vector.extract_strided_slice %879 {offsets = [0, 0], sizes = [16, 2], strides = [1, 1]} : vector<16x6xf32> to vector<16x2xf32>
    %881 = arith.negf %880 : vector<16x2xf32>
    %882 = math.exp %881 : vector<16x2xf32>
    %cst_390 = arith.constant 1.000000e+00 : f32
    %883 = vector.broadcast %cst_390 : f32 to vector<16x2xf32>
    %884 = arith.addf %883, %882 : vector<16x2xf32>
    %885 = arith.divf %883, %884 : vector<16x2xf32>
    %886 = vector.extract_strided_slice %879 {offsets = [0, 2], sizes = [16, 2], strides = [1, 1]} : vector<16x6xf32> to vector<16x2xf32>
    %887 = vector.extract_strided_slice %879 {offsets = [0, 4], sizes = [16, 2], strides = [1, 1]} : vector<16x6xf32> to vector<16x2xf32>
    %888 = arith.mulf %885, %886 : vector<16x2xf32>
    %cst_391 = arith.constant 1.000000e+00 : f32
    %889 = vector.broadcast %cst_391 : f32 to vector<16x2xf32>
    %890 = arith.subf %889, %885 : vector<16x2xf32>
    %891 = arith.mulf %890, %887 : vector<16x2xf32>
    %892 = arith.addf %888, %891 : vector<16x2xf32>
    %893 = vector.shape_cast %892 : vector<16x2xf32> to vector<2x8x2xf32>
    %c0_392 = arith.constant 0 : index
    %c0_393 = arith.constant 0 : index
    %c0_394 = arith.constant 0 : index
    %894 = vector.load %arg19[%c0_392, %c0_393, %c0_394] : memref<2x8x2xf32, #tpu.memory_space<vmem>>, vector<2x8x2xf32>
    tpu.vector_store %arg19[%c0_392, %c0_393, %c0_394], %893 {strides = array<i32>} : memref<2x8x2xf32, #tpu.memory_space<vmem>>, vector<2x8x2xf32>,
    return
  }
}

</mosaic_0001>

<bundles_post_ra>
// kernel: decoder_forward.1
= control target key start
LH: loop header
LB: loop body
LE: loop exit
PB: predicated region body
PF: predicated region fallthrough
CT: control target
= control target key end

     0   :  { %vm89_vm0 = vcmask 64512   ;;  %vm1078_vm1 = vcmask 261120   ;;  %s4642_s22 = smov 2   ;;  %vm4647_vm2 = vcmask 15360   ;;  %vm87_vm3 = vcmask 277520   ;;  %s4646_s24 = smov 34   ;;  %s4614_s0 = inlined_call_operand.vmem [shape: f32[2,8,2], index: 0, kind: input, shape index: {}]   ;;  %s4615_s2 = inlined_call_operand.vmem [shape: f32[2,8,8], index: 2, kind: input, shape index: {}]   ;;  %s4616_s1 = inlined_call_operand.vmem [shape: f32[2,2,3,8,32], index: 1, kind: input, shape index: {}, may-alias: {1,20}]   ;;  %s4617_s20 = inlined_call_operand.vmem [shape: f32[2,2,3,8,32], index: 20, kind: output, shape index: {1}, may-alias: {1,20}]   ;;  %s4618_s5 = inlined_call_operand.vmem [shape: f32[3,8,32], index: 5, kind: input, shape index: {}]   ;;  %s4619_s8 = inlined_call_operand.vmem [shape: f32[1,8,32], index: 8, kind: input, shape index: {}]   ;;  %s4620_s3 = inlined_call_operand.vmem [shape: f32[170,32], index: 3, kind: input, shape index: {}]   ;;  %s4621_s4 = inlined_call_operand.vmem [shape: f32[1,32], index: 4, kind: input, shape index: {}]   ;;  %s4622_s9 = inlined_call_operand.<no memory space> [shape: f32[1,1,1], index: 9, kind: input, shape index: {}]   ;;  %s4623_s6 = inlined_call_operand.vmem [shape: f32[32,8,32], index: 6, kind: input, shape index: {}]   ;;  %s4624_s7 = inlined_call_operand.vmem [shape: f32[8,32], index: 7, kind: input, shape index: {}]   ;;  %s4625_s10 = inlined_call_operand.vmem [shape: f32[320,32], index: 10, kind: input, shape index: {}]   ;;  %s4626_s11 = inlined_call_operand.vmem [shape: f32[1,32], index: 11, kind: input, shape index: {}]   ;;  %s4627_s12 = inlined_call_operand.vmem [shape: f32[3,8,32], index: 12, kind: input, shape index: {}]   ;;  %s4628_s15 = inlined_call_operand.vmem [shape: f32[1,8,32], index: 15, kind: input, shape index: {}]   ;;  %s4629_s13 = inlined_call_operand.vmem [shape: f32[32,8,32], index: 13, kind: input, shape index: {}]   ;;  %s4630_s14 = inlined_call_operand.vmem [shape: f32[8,32], index: 14, kind: input, shape index: {}]   ;;  %s4631_s16 = inlined_call_operand.<no memory space> [shape: f32[1,1,1], index: 16, kind: input, shape index: {}]   ;;  %s4632_s17 = inlined_call_operand.vmem [shape: f32[32,6], index: 17, kind: input, shape index: {}]   ;;  %s4633_s18 = inlined_call_operand.vmem [shape: f32[1,6], index: 18, kind: input, shape index: {}]   ;;  %s4634_s19 = inlined_call_operand.vmem [shape: f32[2,8,2], index: 19, kind: output, shape index: {0}]  }
   0x1   :  { %4731 = sst [smem:[#allocation16_spill]] %s4614_s0  ;;  %s4640_s26 = smov 102   ;;  %vm137_vm4 = vcmask 294160   ;;  %vm143_vm5 = vcmask 556320   ;;  %v3155_v13 = vld [vmem:[%s4619_s8] sm:$0xff]  ;;  %v547_v33 = vld [vmem:[%s4620_s3 + $0x78] sm:$0xff] }
   0x2   :  { %4732 = sst [smem:[#allocation17_spill]] %s4615_s2  ;;  %s2939_s8 = smov 68   ;;  %v546_v34 = vld [vmem:[%s4620_s3 + $0x70] sm:$0xff]  ;;  %v545_v35 = vld [vmem:[%s4620_s3 + $0x68] sm:$0xff]  ;;  %v544_v36 = vld [vmem:[%s4620_s3 + $0x60] sm:$0xff]  ;;  %vm565_vm6 = vcmask 1041408  }
   0x3   :  { %4733 = sst [smem:[#allocation18_spill]] %s4616_s1  ;;  %s4641_s1 = smov 36   ;;  %v543_v37 = vld [vmem:[%s4620_s3 + $0x58] sm:$0xff]  ;;  %v542_v38 = vld [vmem:[%s4620_s3 + $0x50] sm:$0xff]  ;;  %v541_v39 = vld [vmem:[%s4620_s3 + $0x48] sm:$0xff]  ;;  %vm193_vm7 = vcmask 572960  }
   0x4   :  { %4734 = sst [smem:[#allocation19_spill]] %s4617_s20  ;;  %s2937_s20 = smov 104   ;;  %v540_v40 = vld [vmem:[%s4620_s3 + $0x40] sm:$0xff]  ;;  %v539_v42 = vld [vmem:[%s4620_s3 + $0x38] sm:$0xff]  ;;  %v538_v44 = vld [vmem:[%s4620_s3 + $0x30] sm:$0xff]  ;;  %vm199_vm8 = vcmask 835120  }
   0x5   :  { %4735 = sst [smem:[#allocation20_spill]] %s4618_s5  ;;  %s4643_s28 = smov 10   ;;  %v537_v51 = vld [vmem:[%s4620_s3 + $0x28] sm:$0xff]  ;;  %v536_v52 = vld [vmem:[%s4620_s3 + $0x20] sm:$0xff]  ;;  %v535_v53 = vld [vmem:[%s4620_s3 + $0x18] sm:$0xff]  ;;  %vm248_vm9 = vcmask 851760  }
   0x6   :  { %s4736_s23 = sld [smem:[#allocation16_spill]]  ;;  %v534_v54 = vld [vmem:[%s4620_s3 + $0x10] sm:$0xff]  ;;  %v533_v58 = vld [vmem:[%s4620_s3 + $0x8] sm:$0xff]  ;;  %v532_v59 = vld [vmem:[%s4620_s3] sm:$0xff]  ;;  %vm254_vm10 = vcmask 1048384   ;;  %vm305_vm11 = vcmask 80960  }
   0x7   :  { %s4737_s25 = sld [smem:[#allocation17_spill]]  ;;  %v553_v60 = vld [vmem:[%s4620_s3 + $0xa8] sm:$0x3]  ;;  %v552_v61 = vld [vmem:[%s4620_s3 + $0xa0] sm:$0xff]  ;;  %v551_v62 = vld [vmem:[%s4620_s3 + $0x98] sm:$0xff]  ;;  %vm311_vm12 = vcmask 343120  }
   0x8   :  { %s4738_s27 = sld [smem:[#allocation18_spill]]  ;;  %v550_v63 = vld [vmem:[%s4620_s3 + $0x90] sm:$0xff]  ;;  %vm558_vm13 = vcmask 343040   ;;  %s4742_s5 = smov 70  }
   0x9   :  { %s4739_s0 = sld [smem:[#allocation19_spill]] }
   0xc   :  { %v3088_v0 = vld [vmem:[%s4736_s23] sm:$0xff]  ;;  %v3189_v32 = vld [vmem:[%s4736_s23 + $0x8] sm:$0xff]  ;;  %s4746_s23 = smov 102  }
   0xd   :  { %v3093_v1 = vld [vmem:[%s4737_s25] sm:$0xff]  ;;  %108 = vmatpush.msra.mxu0 %v3088_v0  ;;  %v3121_v5 = vld [vmem:[%s4737_s25 + $0x8] sm:$0xff]  ;;  %82 = vst.msk [vmem:[#allocation2] sm:$0xff] %vm4647_vm2, %v3088_v0 }
   0xe   :  { %v3098_v2 = vld [vmem:[%s4738_s27 + $0x8] sm:$0xff]  ;;  %v3104_v3 = vld [vmem:[%s4738_s27 + $0x10] sm:$0xff]  ;;  %2583 = vmatmul.msk.f32.vlgmr.msra.gmra.mxu0 %vm89_vm0, %v3093_v1  ;;  %313 = vst.msk [vmem:[#allocation2 + $0x18] sm:$0xff] %vm4647_vm2, %v3189_v32 }
   0xf   :  { %v3110_v4 = vadd.f32 %v3104_v3, %v3098_v2  ;;  %2635 = vst.msk [vmem:[%s4739_s0 + $0x8] sm:$0xff] %vm1078_vm1, %v3104_v3 }
  0x11   :  { %128 = vmatpush.msrb.mxu0 %v3110_v4  ;;  %239 = vmatpush.msra.mxu1 %v3110_v4 }
  0x12   :  { %2588 = vmatmul.msk.f32.vlgmr.msra.gmra.mxu1 %vm89_vm0, %v3121_v5  ;;  %84 = vrot.lane.b32.xlu0 %v3110_v4, %s4642_s22  ;;  %s4645_s22 = smov 70  }
  0x13   :  { %219 = vmatpush.msra.mxu0 %v3088_v0 }
  0x16   :  { %2584 = vmatmul.msk.f32.vlgmr.msrb.gmra.mxu0 %vm89_vm0, %v3093_v1  ;;  %v73_v12 = vld [vmem:[%s4738_s27] sm:$0xff] }
  0x17   :  { %1261 = vst.msk [vmem:[%s4739_s0] sm:$0xff] %vm1078_vm1, %v3098_v2  ;;  %334 = vmatpush.msrb.mxu0 %v3189_v32 }
  0x1e   :  { %2587 = vmatmul.msk.f32.vlgmr.msra.gmra.mxu0 %vm89_vm0, %v3121_v5  ;;  %v3268_v55 = vld [vmem:[%s4738_s27 + $0x20] sm:$0xff]  ;;  %v3273_v56 = vld [vmem:[%s4738_s27 + $0x28] sm:$0xff] }
  0x1f   :  { %438 = vmatpush.msra.mxu0 %v3189_v32  ;;  %v3277_v57 = vadd.f32 %v3273_v56, %v3268_v55  ;;  %2636 = vst.msk [vmem:[%s4739_s0 + $0x20] sm:$0xff] %vm1078_vm1, %v3273_v56 }
  0x21   :  { %354 = vmatpush.msrb.mxu1 %v3277_v57 }
  0x22   :  { %2592 = vmatmul.msk.f32.vlgmr.msrb.gmra.mxu1 %vm89_vm0, %v3093_v1 }
  0x23   :  { %458 = vmatpush.msra.mxu1 %v3277_v57 }
  0x25   :  { %2599 = vmatpush.msk.msrb.mxu1 %vm565_vm6, %v553_v60 }
  0x26   :  { %2591 = vmatmul.msk.f32.vlgmr.msrb.gmra.mxu0 %vm89_vm0, %v3093_v1 }
  0x27   :  { %569 = vmatpush.msrb.mxu0 %v547_v33  ;;  %603 = vmatpush.msrb.mxu1 %v552_v61 }
  0x29   :  { %570 = vmatpush.msrb.mxu0 %v546_v34  ;;  %604 = vmatpush.msrb.mxu1 %v551_v62 }
  0x2a   :  { %2596 = vmatmul.msk.f32.vlgmr.msra.gmra.mxu1 %vm89_vm0, %v3121_v5 }
  0x2b   :  { %571 = vmatpush.msrb.mxu0 %v545_v35  ;;  %605 = vmatpush.msrb.mxu1 %v550_v63 }
  0x2d   :  { %572 = vmatpush.msrb.mxu0 %v544_v36 }
  0x2e   :  { %2595 = vmatmul.msk.f32.vlgmr.msra.gmra.mxu0 %vm89_vm0, %v3121_v5 }
  0x2f   :  { %573 = vmatpush.msrb.mxu0 %v543_v37 }
  0x31   :  { %574 = vmatpush.msrb.mxu0 %v542_v38 }
  0x33   :  { %575 = vmatpush.msrb.mxu0 %v541_v39 }
  0x35   :  { %576 = vmatpush.msrb.mxu0 %v540_v40 }
  0x37   :  { %577 = vmatpush.msrb.mxu0 %v539_v42 }
  0x39   :  { %578 = vmatpush.msrb.mxu0 %v538_v44 }
  0x3b   :  { %579 = vmatpush.msrb.mxu0 %v537_v51 }
  0x3d   :  { %580 = vmatpush.msrb.mxu0 %v536_v52 }
  0x3f   :  { %581 = vmatpush.msrb.mxu0 %v535_v53 }
  0x41   :  { %582 = vmatpush.msrb.mxu0 %v534_v54 }
  0x43   :  { %583 = vmatpush.msrb.mxu0 %v533_v58 }
  0x45   :  { %584 = vmatpush.msrb.mxu0 %v532_v59 }
  0x84   :  { %v85_v6 = vpop.permute.xlu0 %84 }
  0x85   :  { %88 = vst.msk [vmem:[#allocation2] sm:$0xff] %vm87_vm3, %v85_v6 }
  0x8b   :  { %v110_v7 = vpop.f32.mrf.mxu0 }
  0x8c   :  { %134 = vrot.lane.b32.xlu0 %v110_v7, %s4646_s24  ;;  %160 = vmatpush.msra.mxu2 %v110_v7  ;;  %s2976_s24 = smov 32  }
  0x8d   :  { %2585 = vmatmul.msk.f32.vlgmr.msra.gmra.mxu2 %vm89_vm0, %v3093_v1 }
  0x8f   :  { %v241_v9 = vpop.f32.mrf.mxu1 }
  0x93   :  { %v130_v8 = vpop.f32.mrf.mxu0 }
  0x94   :  { %140 = vrot.lane.b32.xlu1 %v130_v8, %s4641_s1  ;;  %182 = vmatpush.msra.mxu3 %v130_v8  ;;  %s4644_s1 = smov 8  }
  0x95   :  { %2586 = vmatmul.msk.f32.vlgmr.msra.gmra.mxu3 %vm89_vm0, %v3093_v1  ;;  %251 = vrot.lane.b32.xlu0 %v241_v9, %s2937_s20 }
  0x96   :  { %294 = vmatpush.msrb.mxu3 %v241_v9 }
  0x9b   :  { %v221_v10 = vpop.f32.mrf.mxu0 }
  0x9c   :  { %245 = vrot.lane.b32.xlu2 %v221_v10, %s4640_s26  ;;  %272 = vmatpush.msrb.mxu2 %v221_v10  ;;  %s4740_s26 = sld [smem:[#allocation20_spill]] }
  0x9d   :  { %2589 = vmatmul.msk.f32.vlgmr.msrb.gmra.mxu2 %vm89_vm0, %v3121_v5  ;;  %2590 = vmatmul.msk.f32.vlgmr.msrb.gmra.mxu3 %vm89_vm0, %v3121_v5 }
  0xa2   :  { %v3160_v14 = vld [vmem:[%s4740_s26] sm:$0xff]  ;;  %v3226_v41 = vld [vmem:[%s4740_s26 + $0x10] sm:$0xff]  ;;  %v3234_v43 = vld [vmem:[%s4740_s26 + $0x8] sm:$0xff] }
  0xa3   :  { %v3163_v16 = vadd.f32 %v3160_v14, %v73_v12  ;;  %v3241_v45 = vadd.f32 %v3226_v41, %v3104_v3  ;;  %v3245_v46 = vadd.f32 %v3234_v43, %v3098_v2  ;;  %v548_v2 = vld [vmem:[%s4620_s3 + $0x80] sm:$0xff] }
  0xa5   :  { %v1076_v18 = vmul.f32 %v3163_v16, %v3155_v13  ;;  %v1129_v47 = vmul.f32 %v3241_v45, %v3155_v13  ;;  %v1103_v48 = vmul.f32 %v3245_v46, %v3155_v13 }
  0xa7   :  { %v1079_v19 = vsel %vm1078_vm1, %v1076_v18, 0.0  ;;  %v1131_v49 = vsel %vm1078_vm1, %v1129_v47, 0.0  ;;  %v1105_v50 = vsel %vm1078_vm1, %v1103_v48, 0.0  ;;  %v3325_v18 = vpop.f32.mrf.mxu0 }
  0xa8   :  { %384 = vmatpush.msra.mxu2 %v3325_v18 }
  0xa9   :  { %2593 = vmatmul.msk.f32.vlgmr.msra.gmra.mxu2 %vm89_vm0, %v3093_v1 }
  0xaf   :  { %v3337_v58 = vpop.f32.mrf.mxu0 }
  0xb0   :  { %489 = vmatpush.msrb.mxu2 %v3337_v58 }
  0xb1   :  { %2597 = vmatmul.msk.f32.vlgmr.msrb.gmra.mxu2 %vm89_vm0, %v3121_v5 }
  0xbf   :  { %1080 = vadd.xlane.f32.xlu0 %v1079_v19 }
  0xf6   :  { %v246_v3 = vpop.permute.xlu2 %245 }
  0xfe   :  { %v135_v11 = vpop.permute.xlu0 %134 }
  0xff   :  { %138 = vst.msk [vmem:[#allocation2] sm:$0xff] %vm137_vm4, %v135_v11 }
 0x106   :  { %v141_v15 = vpop.permute.xlu1 %140 }
 0x107   :  { %144 = vst.msk [vmem:[#allocation2] sm:$0xff] %vm143_vm5, %v141_v15  ;;  %v3171_v17 = vpop.permute.xlu0 %251 }
 0x108   :  { %256 = vst.msk [vmem:[#allocation2 + $0x8] sm:$0xff] %vm89_vm0, %v3171_v17 }
 0x110   :  { %v162_v20 = vpop.f32.mrf.mxu2 }
 0x111   :  { %v165_v21 = vmul.f32 2.0, %v162_v20 }
 0x113   :  { %v166_v22 = vsub.f32 %v165_v21, %v3088_v0 }
 0x115   :  { %190 = vrot.lane.b32.xlu1 %v166_v22, %s2939_s8 }
 0x118   :  { %v184_v23 = vpop.f32.mrf.mxu3 }
 0x119   :  { %v187_v24 = vmul.f32 2.0, %v184_v23 }
 0x11b   :  { %v188_v25 = vsub.f32 %v187_v24, %v3110_v4 }
 0x11d   :  { %196 = vrot.lane.b32.xlu2 %v188_v25, %s4645_s22  ;;  %s4743_s22 = smov 2  }
 0x120   :  { %v274_v26 = vpop.f32.mrf.mxu2  ;;  %v296_v27 = vpop.f32.mrf.mxu3 }
 0x121   :  { %v277_v28 = vmul.f32 2.0, %v274_v26  ;;  %v299_v29 = vmul.f32 2.0, %v296_v27 }
 0x123   :  { %v278_v30 = vsub.f32 %v277_v28, %v3088_v0  ;;  %v300_v31 = vsub.f32 %v299_v29, %v3110_v4  ;;  %v549_v0 = vld [vmem:[%s4620_s3 + $0x88] sm:$0xff]  ;;  %v26_v4 = vstv %s4622_s9  ;;  %s4744_s3 = smov 8   ;;  %s4745_s9 = smov 36  }
 0x124   :  { %606 = vmatpush.msrb.mxu1 %v549_v0  ;;  %27 = vst [vmem:[#allocation3] sm:$0x1] %v26_v4 }
 0x125   :  { %302 = vrot.lane.b32.xlu1 %v278_v30, %s4644_s1  ;;  %308 = vrot.lane.b32.xlu2 %v300_v31, %s4643_s28 }
 0x126   :  { %607 = vmatpush.msrb.mxu1 %v548_v2 }
 0x12b   :  { %v3332_v35 = vld [vmem:[#allocation3] sm:$0x1] }
 0x132   :  { %v1081_v12 = vpop.xlane.xlu0 %1080 }
 0x133   :  { %v1085_v15 = vrot.slane %v1081_v12, 4 }
 0x135   :  { %v1086_v19 = vadd.f32 %v1085_v15, %v1081_v12 }
 0x137   :  { %v1087_v20 = vrot.slane %v1086_v19, 2 }
 0x139   :  { %v1088_v21 = vadd.f32 %v1087_v20, %v1086_v19 }
 0x13b   :  { %v1089_v27 = vrot.slane %v1088_v21, 1 }
 0x13d   :  { %v1090_v33 = vadd.f32 %v1089_v27, %v1088_v21 }
 0x13f   :  { %v1097_v39 = vadd.f32 %v1090_v33, %v3332_v35  ;;  %v4708_v33 = vmov 3  }
 0x14e   :  { %1132 = vadd.xlane.f32.xlu2 %v1131_v49 }
 0x14f   :  { %1106 = vadd.xlane.f32.xlu1 %v1105_v50 }
 0x177   :  { %v197_v6 = vpop.permute.xlu2 %196 }
 0x17f   :  { %v309_v9 = vpop.permute.xlu2 %308 }
 0x187   :  { %v191_v7 = vpop.permute.xlu1 %190 }
 0x188   :  { %194 = vst.msk [vmem:[#allocation2] sm:$0xff] %vm193_vm7, %v191_v7 }
 0x189   :  { %200 = vst.msk [vmem:[#allocation2] sm:$0xff] %vm199_vm8, %v197_v6 }
 0x18a   :  { %249 = vst.msk [vmem:[#allocation2] sm:$0xff] %vm248_vm9, %v246_v3  ;;  %v3342_v3 = vpop.f32.mrf.mxu1 }
 0x18b   :  { %255 = vst.msk [vmem:[#allocation2] sm:$0xff] %vm254_vm10, %v3171_v17  ;;  %v4676_v17 = vmov 0   ;;  %406 = vmatpush.msra.mxu3 %v3342_v3 }
 0x18c   :  { %2752 = vset.pattern.permute.xlu1 %v4676_v17  ;;  %2753 = vset.pattern.permute.xlu2 %v4676_v17 }
 0x18d   :  { %2594 = vmatmul.msk.f32.vlgmr.msra.gmra.mxu3 %vm89_vm0, %v3093_v1 }
 0x192   :  { %v528_v8 = vld [vmem:[#allocation2] sm:$0xff]  ;;  %v3347_v15 = vpop.f32.mrf.mxu1 }
 0x193   :  { %585 = vmatmul.f32.vlgmr.msrb.gmra.mxu0 %v528_v8  ;;  %511 = vmatpush.msrb.mxu3 %v3347_v15 }
 0x195   :  { %2598 = vmatmul.msk.f32.vlgmr.msrb.gmra.mxu3 %vm89_vm0, %v3121_v5 }
 0x197   :  { %v303_v10 = vpop.permute.xlu1 %302 }
 0x198   :  { %306 = vst.msk [vmem:[#allocation2 + $0x8] sm:$0xff] %vm305_vm11, %v303_v10 }
 0x199   :  { %312 = vst.msk [vmem:[#allocation2 + $0x8] sm:$0xff] %vm311_vm12, %v309_v9 }
 0x1a0   :  { %v529_v11 = vld [vmem:[#allocation2 + $0x8] sm:$0xff] }
 0x1a1   :  { %2600 = vmatmul.msk.f32.vlgmr.msrb.gmra.mxu1 %vm558_vm13, %v529_v11 }
 0x1c1   :  { %v1133_v22 = vpop.xlane.xlu2 %1132 }
 0x1c2   :  { %v1107_v23 = vpop.xlane.xlu1 %1106  ;;  %v1137_v24 = vrot.slane %v1133_v22, 4 }
 0x1c3   :  { %v1111_v25 = vrot.slane %v1107_v23, 4 }
 0x1c4   :  { %v1138_v26 = vadd.f32 %v1137_v24, %v1133_v22  ;;  %v4648_v22 = vmov 1   ;;  %v3361_v24 = vld [vmem:[%s4621_s4] ss:$0 sm:$0xff]  ;;  %s4741_s4 = smov 34  }
 0x1c5   :  { %v1112_v28 = vadd.f32 %v1111_v25, %v1107_v23  ;;  %2754 = vset.pattern.permute.xlu0 %v4648_v22  ;;  %v4710_v23 = vmov 2  }
 0x1c6   :  { %v1139_v29 = vrot.slane %v1138_v26, 2 }
 0x1c7   :  { %v1113_v30 = vrot.slane %v1112_v28, 2 }
 0x1c8   :  { %v1140_v31 = vadd.f32 %v1139_v29, %v1138_v26 }
 0x1c9   :  { %v1114_v34 = vadd.f32 %v1113_v30, %v1112_v28  ;;  %v4704_v30 = vmov 4  }
 0x1ca   :  { %v1141_v36 = vrot.slane %v1140_v31, 1 }
 0x1cb   :  { %v1115_v37 = vrot.slane %v1114_v34, 1 }
 0x1cc   :  { %v1142_v38 = vadd.f32 %v1141_v36, %v1140_v31  ;;  %v4696_v31 = vmov 8   ;;  %v4684_v36 = vmov 13  }
 0x1cd   :  { %v1116_v40 = vadd.f32 %v1115_v37, %v1114_v34  ;;  %v4698_v34 = vmov 6   ;;  %v4702_v37 = vmov 5  }
 0x1ce   :  { %v1149_v44 = vadd.f32 %v1142_v38, %v3332_v35  ;;  %v4692_v38 = vmov 9  }
 0x1cf   :  { %v1123_v42 = vadd.f32 %v1116_v40, %v3332_v35  ;;  %v4706_v40 = vmov 7  }
 0x1d1   :  { %v1151_v47 = vmax.f32 %v1097_v39, %v1123_v42 }
 0x1d3   :  { %v1153_v48 = vmax.f32 %v1151_v47, %v1149_v44  ;;  %v4690_v47 = vmov 10  }
 0x1d5   :  { %v1161_v49 = vsub.f32 %v1123_v42, %v1153_v48  ;;  %v1167_v50 = vsub.f32 %v1149_v44, %v1153_v48  ;;  %v1155_v51 = vsub.f32 %v1097_v39, %v1153_v48  ;;  %v4672_v39 = vmov 18  }
 0x1d6   :  { %v4686_v42 = vmov 11   ;;  %v4664_v44 = vmov 23   ;;  %v4680_v48 = vmov 14  }
 0x1d7   :  { %v1163_v52 = vmul.f32 1.442695, %v1161_v49  ;;  %v1169_v53 = vmul.f32 1.442695, %v1167_v50  ;;  %v1157_v54 = vmul.f32 1.442695, %v1155_v51  ;;  %v386_v51 = vpop.f32.mrf.mxu2 }
 0x1d8   :  { %v4656_v49 = vmov 28   ;;  %v4700_v50 = vmov 12  }
 0x1d9   :  { %2892 = vpow2.f32 %v1163_v52  ;;  %v4674_v52 = vmov 16  }
 0x1da   :  { %2894 = vpow2.f32 %v1169_v53  ;;  %v4650_v53 = vmov 31  }
 0x1db   :  { %2896 = vpow2.f32 %v1157_v54  ;;  %v4678_v54 = vmov 15  }
 0x1df   :  { %v2893_v59 = vpop.eup %2892 }
 0x1e0   :  { %v2895_v60 = vpop.eup %2894 }
 0x1e1   :  { %v2897_v61 = vpop.eup %2896 }
 0x1e2   :  { %v1173_v62 = vadd.f32 %v2897_v61, %v2893_v59 }
 0x1e4   :  { %v1175_v63 = vadd.f32 %v2895_v60, %v1173_v62  ;;  %v4694_v62 = vmov 17  }
 0x1e6   :  { %2898 = vrcp.f32 %v1175_v63  ;;  %v1188_v4 = vand.u32 2147483648, %v1175_v63  ;;  %vm1182_vm14 = vweird.f32 %v1175_v63  ;;  %v1186_v7 = vand.u32 2147483647, %v1175_v63 }
 0x1e8   :  { %v1189_v9 = vor.u32 1.1754944e-38, %v1188_v4  ;;  %vm1187_vm2 = vcmp.eq.f32.partialorder %v1186_v7, 8.507059e+37  ;;  %v4688_v4 = vmov 22   ;;  %v4658_v7 = vmov 26  }
 0x1ec   :  { %v2899_v0 = vpop.eup %2898 }
 0x1ed   :  { %v1178_v2 = vmul.f32 %v2899_v0, %v1175_v63  ;;  %vm1183_vm15 = vweird.f32 %v2899_v0  ;;  %v4666_v63 = vmov 21  }
 0x1ee   :  { %vm1184_vm6 = vmor %vm1182_vm14, %vm1183_vm15 }
 0x1ef   :  { %v1179_v6 = vsub.f32 1.0, %v1178_v2  ;;  %v4662_v2 = vmov 24  }
 0x1f1   :  { %v1180_v8 = vmul.f32 %v2899_v0, %v1179_v6 }
 0x1f3   :  { %v1181_v10 = vadd.f32 %v2899_v0, %v1180_v8  ;;  %v4660_v8 = vmov 25  }
 0x1f5   :  { %v1185_v11 = vsel %vm1184_vm6, %v2899_v0, %v1181_v10  ;;  %v4668_v0 = vmov 20   ;;  %v4654_v10 = vmov 29  }
 0x1f6   :  { %v1190_v12 = vsel %vm1187_vm2, %v1189_v9, %v1185_v11  ;;  %v4682_v11 = vmov 27  }
 0x1f7   :  { %v1207_v19 = vmul.f32 %v2897_v61, %v1190_v12  ;;  %v3350_v20 = vmul.f32 %v2895_v60, %v1190_v12  ;;  %v3352_v21 = vmul.f32 %v2893_v59, %v1190_v12  ;;  %v389_v59 = vmul.f32 2.0, %v386_v51 }
 0x1f8   :  { %v4670_v61 = vmov 19  }
 0x1f9   :  { %v1211_v1 = vperm.slane %v1207_v19, 0  ;;  %v390_v60 = vsub.f32 %v389_v59, %v3189_v32 }
 0x1fb   :  { %1214 = vperm.xlu1 %2752, %v1211_v1   ;;  %v4652_v1 = vmov 30  }
 0x203   :  { %2755 = vset.pattern.permute.xlu1 %v4710_v23 }
 0x210   :  { %v586_v25 = vpop.f32.mrf.mxu0 }
 0x211   :  { %v587_v26 = vadd.f32 %v3361_v24, %v586_v25 }
 0x21e   :  { %v609_v27 = vpop.f32.mrf.mxu1 }
 0x21f   :  { %v610_v28 = vadd.f32 %v609_v27, %v587_v26  ;;  %v408_v27 = vpop.f32.mrf.mxu3 }
 0x220   :  { %v411_v51 = vmul.f32 2.0, %v408_v27  ;;  %v3456_v27 = vld [vmem:[%s4624_s7] sm:$0xff]  ;;  %s4747_s7 = smov 10  }
 0x221   :  { %vm615_vm2 = vcmp.gt.f32.partialorder %v610_v28, 0.0  ;;  %v617_v5 = vmul.f32 0.01, %v610_v28 }
 0x223   :  { %v3364_v29 = vsel %vm615_vm2, %v610_v28, %v617_v5  ;;  %v1227_v28 = vperm.slane %v3352_v21, 0 }
 0x224   :  { %654 = vperm.xlu1 %2755, %v3364_v29   ;;  %640 = vperm.xlu0 %2754, %v3364_v29  }
 0x225   :  { %624 = vperm.xlu2 %2753, %v3364_v29  }
 0x22c   :  { %2757 = vset.pattern.permute.xlu1 %v4704_v30  ;;  %2761 = vset.pattern.permute.xlu0 %v4696_v31 }
 0x22d   :  { %2756 = vset.pattern.permute.xlu2 %v4708_v33  ;;  %682 = vperm.xlu1 %2757, %v3364_v29  }
 0x22e   :  { %738 = vperm.xlu0 %2761, %v3364_v29   ;;  %668 = vperm.xlu2 %2756, %v3364_v29  }
 0x235   :  { %2759 = vset.pattern.permute.xlu1 %v4698_v34 }
 0x236   :  { %2766 = vset.pattern.permute.xlu0 %v4684_v36  ;;  %2758 = vset.pattern.permute.xlu2 %v4702_v37  ;;  %v3637_v36 = vld [vmem:[%s4623_s6 + $0xb0] sm:$0xff] }
 0x237   :  { %710 = vperm.xlu1 %2759, %v3364_v29   ;;  %808 = vperm.xlu0 %2766, %v3364_v29  }
 0x238   :  { %696 = vperm.xlu2 %2758, %v3364_v29  }
 0x23f   :  { %2762 = vset.pattern.permute.xlu1 %v4692_v38  ;;  %2771 = vset.pattern.permute.xlu0 %v4672_v39  ;;  %v3578_v39 = vld [vmem:[%s4623_s6 + $0x78] sm:$0xff] }
 0x240   :  { %2760 = vset.pattern.permute.xlu2 %v4706_v40  ;;  %752 = vperm.xlu1 %2762, %v3364_v29  }
 0x241   :  { %878 = vperm.xlu0 %2771, %v3364_v29   ;;  %724 = vperm.xlu2 %2760, %v3364_v29  }
 0x248   :  { %2764 = vset.pattern.permute.xlu1 %v4686_v42 }
 0x249   :  { %2776 = vset.pattern.permute.xlu0 %v4664_v44  ;;  %2763 = vset.pattern.permute.xlu2 %v4690_v47 }
 0x24a   :  { %780 = vperm.xlu1 %2764, %v3364_v29   ;;  %948 = vperm.xlu0 %2776, %v3364_v29  }
 0x24b   :  { %766 = vperm.xlu2 %2763, %v3364_v29  }
 0x252   :  { %2767 = vset.pattern.permute.xlu1 %v4680_v48  ;;  %2781 = vset.pattern.permute.xlu0 %v4656_v49 }
 0x253   :  { %2765 = vset.pattern.permute.xlu2 %v4700_v50  ;;  %822 = vperm.xlu1 %2767, %v3364_v29  }
 0x254   :  { %1018 = vperm.xlu0 %2781, %v3364_v29   ;;  %794 = vperm.xlu2 %2765, %v3364_v29  }
 0x25b   :  { %2769 = vset.pattern.permute.xlu1 %v4674_v52 }
 0x25c   :  { %2785 = vset.pattern.permute.xlu0 %v4650_v53  ;;  %2768 = vset.pattern.permute.xlu2 %v4678_v54 }
 0x25d   :  { %850 = vperm.xlu1 %2769, %v3364_v29   ;;  %1060 = vperm.xlu0 %2785, %v3364_v29  }
 0x25e   :  { %836 = vperm.xlu2 %2768, %v3364_v29  }
 0x265   :  { %2772 = vset.pattern.permute.xlu1 %v4670_v61  ;;  %414 = vrot.lane.b32.xlu0 %v390_v60, %s2939_s8 }
 0x266   :  { %2770 = vset.pattern.permute.xlu2 %v4694_v62  ;;  %892 = vperm.xlu1 %2772, %v3364_v29  }
 0x267   :  { %864 = vperm.xlu2 %2770, %v3364_v29   ;;  %2787 = vset.pattern.permute.xlu0 %v4676_v17 }
 0x26d   :  { %469 = vrot.lane.b32.xlu0 %v3347_v15, %s2937_s20  ;;  %v3430_v12 = vpop.permute.xlu1 %1214  ;;  %v1245_v15 = vperm.slane %v3350_v20, 0  ;;  %v3444_v20 = vld [vmem:[%s4623_s6] sm:$0xff] }
 0x26e   :  { %2774 = vset.pattern.permute.xlu1 %v4666_v63  ;;  %v76_v63 = vld [vmem:[%s4738_s27 + $0x18] sm:$0xff] }
 0x26f   :  { %2773 = vset.pattern.permute.xlu2 %v4668_v0  ;;  %920 = vperm.xlu1 %2774, %v3364_v29   ;;  %v3529_v0 = vld [vmem:[%s4623_s6 + $0x50] sm:$0xff]  ;;  %1262 = vst.msk [vmem:[%s4739_s0 + $0x18] sm:$0xff] %vm1078_vm1, %v3268_v55 }
 0x270   :  { %906 = vperm.xlu2 %2773, %v3364_v29  }
 0x277   :  { %2777 = vset.pattern.permute.xlu1 %v4662_v2 }
 0x278   :  { %2775 = vset.pattern.permute.xlu2 %v4688_v4  ;;  %962 = vperm.xlu1 %2777, %v3364_v29  }
 0x279   :  { %934 = vperm.xlu2 %2775, %v3364_v29  }
 0x27f   :  { %v625_v6 = vpop.permute.xlu2 %624 }
 0x280   :  { %2779 = vset.pattern.permute.xlu1 %v4658_v7  ;;  %v632_v59 = vmul.f32 %v625_v6, %v3444_v20 }
 0x281   :  { %2778 = vset.pattern.permute.xlu2 %v4660_v8  ;;  %990 = vperm.xlu1 %2779, %v3364_v29   ;;  %v513_v8 = vpop.f32.mrf.mxu3 }
 0x282   :  { %976 = vperm.xlu2 %2778, %v3364_v29   ;;  %v635_v53 = vadd.f32 %v3456_v27, %v632_v59  ;;  %v516_v2 = vmul.f32 2.0, %v513_v8 }
 0x288   :  { %v669_v9 = vpop.permute.xlu2 %668 }
 0x289   :  { %2782 = vset.pattern.permute.xlu1 %v4654_v10 }
 0x28a   :  { %2780 = vset.pattern.permute.xlu2 %v4682_v11  ;;  %1032 = vperm.xlu1 %2782, %v3364_v29  }
 0x28b   :  { %1004 = vperm.xlu2 %2780, %v3364_v29  }
 0x292   :  { %2786 = vset.pattern.permute.xlu1 %v4676_v17  ;;  %v697_v19 = vpop.permute.xlu2 %696 }
 0x293   :  { %2783 = vset.pattern.permute.xlu2 %v4652_v1  ;;  %1248 = vperm.xlu1 %2786, %v1245_v15   ;;  %v491_v15 = vpop.f32.mrf.mxu2 }
 0x294   :  { %1046 = vperm.xlu2 %2783, %v3364_v29   ;;  %v3449_v29 = vld [vmem:[%s4623_s6 + $0x8] sm:$0xff] }
 0x296   :  { %v655_v25 = vpop.permute.xlu1 %654  ;;  %v641_v26 = vpop.permute.xlu0 %640 }
 0x29b   :  { %360 = vrot.lane.b32.xlu1 %v3325_v18, %s4741_s4  ;;  %v725_v5 = vpop.permute.xlu2 %724  ;;  %v412_v18 = vsub.f32 %v411_v51, %v3277_v57  ;;  %v3464_v51 = vld [vmem:[%s4623_s6 + $0x10] sm:$0xff] }
 0x29c   :  { %2784 = vset.pattern.permute.xlu2 %v4676_v17  ;;  %2788 = vset.pattern.permute.xlu1 %v4648_v22  ;;  %v647_v22 = vmul.f32 %v3449_v29, %v641_v26  ;;  %v661_v49 = vmul.f32 %v3464_v51, %v655_v25  ;;  %v3473_v26 = vld [vmem:[%s4623_s6 + $0x18] sm:$0xff]  ;;  %v3593_v17 = vld [vmem:[%s4623_s6 + $0x88] sm:$0xff] }
 0x29d   :  { %1230 = vperm.xlu2 %2784, %v1227_v28   ;;  %v494_v28 = vmul.f32 2.0, %v491_v15 }
 0x29e   :  { %v649_v1 = vadd.f32 %v647_v22, %v635_v53  ;;  %v675_v22 = vmul.f32 %v3473_v26, %v669_v9 }
 0x29f   :  { %v683_v21 = vpop.permute.xlu1 %682  ;;  %v495_v10 = vsub.f32 %v494_v28, %v3189_v32  ;;  %v3488_v28 = vld [vmem:[%s4623_s6 + $0x28] sm:$0xff] }
 0x2a0   :  { %v739_v60 = vpop.permute.xlu0 %738  ;;  %v663_v7 = vadd.f32 %v661_v49, %v649_v1  ;;  %v3493_v49 = vld [vmem:[%s4623_s6 + $0x30] sm:$0xff]  ;;  %v703_v9 = vmul.f32 %v3488_v28, %v697_v19 }
 0x2a2   :  { %v677_v53 = vadd.f32 %v675_v22, %v663_v7  ;;  %v3502_v22 = vld [vmem:[%s4623_s6 + $0x38] sm:$0xff] }
 0x2a3   :  { %419 = vrot.lane.b32.xlu1 %v412_v18, %s4742_s5  ;;  %v3478_v18 = vld [vmem:[%s4623_s6 + $0x20] sm:$0xff] }
 0x2a4   :  { %v689_v32 = vmul.f32 %v3478_v18, %v683_v21 }
 0x2a5   :  { %315 = vrot.lane.b32.xlu2 %v3277_v57, %s4743_s22  ;;  %v767_v6 = vpop.permute.xlu2 %766  ;;  %s2977_s22 = smov 64  }
 0x2a9   :  { %v711_v59 = vpop.permute.xlu1 %710  ;;  %v809_v15 = vpop.permute.xlu0 %808 }
 0x2aa   :  { %v717_v1 = vmul.f32 %v3493_v49, %v711_v59  ;;  %v3510_v59 = vld [vmem:[%s4623_s6 + $0x40] sm:$0xff] }
 0x2ab   :  { %519 = vrot.lane.b32.xlu1 %v495_v10, %s4744_s3  ;;  %v691_v10 = vadd.f32 %v689_v32, %v677_v53  ;;  %v731_v32 = vmul.f32 %v3502_v22, %v725_v5  ;;  %v3515_v53 = vld [vmem:[%s4623_s6 + $0x48] sm:$0xff] }
 0x2ad   :  { %365 = vrot.lane.b32.xlu2 %v3342_v3, %s4745_s9  ;;  %v705_v7 = vadd.f32 %v703_v9, %v691_v10  ;;  %v517_v10 = vsub.f32 %v516_v2, %v3277_v57  ;;  %v3534_v57 = vld [vmem:[%s4623_s6 + $0x58] sm:$0xff] }
 0x2ae   :  { %v795_v25 = vpop.permute.xlu2 %794 }
 0x2af   :  { %v719_v44 = vadd.f32 %v717_v1, %v705_v7 }
 0x2b1   :  { %v733_v9 = vadd.f32 %v731_v32, %v719_v44  ;;  %v3537_v44 = vadd.f32 %v3160_v14, %v76_v63  ;;  %v773_v32 = vmul.f32 %v3529_v0, %v767_v6  ;;  %v3552_v14 = vld [vmem:[%s4623_s6 + $0x60] sm:$0xff]  ;;  %v3560_v6 = vld [vmem:[%s4623_s6 + $0x68] sm:$0xff] }
 0x2b2   :  { %v753_v21 = vpop.permute.xlu1 %752 }
 0x2b3   :  { %v3497_v3 = vpop.permute.xlu0 %878  ;;  %v759_v8 = vmul.f32 %v3515_v53, %v753_v21  ;;  %v1077_v21 = vmul.f32 %v3537_v44, %v3155_v13 }
 0x2b5   :  { %464 = vrot.lane.b32.xlu2 %v3337_v58, %s4746_s23  ;;  %v745_v58 = vmul.f32 %v3510_v59, %v739_v60 }
 0x2b7   :  { %v747_v7 = vadd.f32 %v745_v58, %v733_v9  ;;  %v1082_v9 = vsel %vm1078_vm1, %v1077_v21, 0.0 }
 0x2b8   :  { %v837_v19 = vpop.permute.xlu2 %836  ;;  %1083 = vadd.xlane.f32.xlu0 %v1082_v9 }
 0x2b9   :  { %v761_v2 = vadd.f32 %v759_v8, %v747_v7  ;;  %v801_v7 = vmul.f32 %v3552_v14, %v795_v25 }
 0x2bb   :  { %v775_v58 = vadd.f32 %v773_v32, %v761_v2  ;;  %v3569_v32 = vadd.f32 %v3234_v43, %v3268_v55 }
 0x2bc   :  { %v781_v1 = vpop.permute.xlu1 %780  ;;  %v3520_v5 = vpop.permute.xlu0 %948 }
 0x2bd   :  { %524 = vrot.lane.b32.xlu2 %v517_v10, %s4747_s7  ;;  %v787_v10 = vmul.f32 %v3534_v57, %v781_v1  ;;  %v3565_v1 = vld [vmem:[%s4623_s6 + $0x70] sm:$0xff] }
 0x2bf   :  { %v789_v61 = vadd.f32 %v787_v10, %v775_v58  ;;  %v815_v10 = vmul.f32 %v3560_v6, %v809_v15  ;;  %v1104_v58 = vmul.f32 %v3569_v32, %v3155_v13 }
 0x2c1   :  { %v865_v60 = vpop.permute.xlu2 %864  ;;  %v803_v2 = vadd.f32 %v801_v7, %v789_v61  ;;  %v3583_v61 = vld [vmem:[%s4623_s6 + $0x80] sm:$0xff] }
 0x2c2   :  { %v871_v11 = vmul.f32 %v3593_v17, %v865_v60 }
 0x2c3   :  { %v817_v9 = vadd.f32 %v815_v10, %v803_v2  ;;  %v1108_v2 = vsel %vm1078_vm1, %v1104_v58, 0.0 }
 0x2c5   :  { %v823_v63 = vpop.permute.xlu1 %822 }
 0x2c6   :  { %v3554_v8 = vpop.permute.xlu0 %1018  ;;  %v829_v25 = vmul.f32 %v3565_v1, %v823_v63  ;;  %v843_v63 = vmul.f32 %v3578_v39, %v837_v19  ;;  %v3601_v19 = vld [vmem:[%s4623_s6 + $0x90] sm:$0xff] }
 0x2c8   :  { %v831_v15 = vadd.f32 %v829_v25, %v817_v9  ;;  %v3606_v9 = vld [vmem:[%s4623_s6 + $0x98] sm:$0xff] }
 0x2ca   :  { %v907_v21 = vpop.permute.xlu2 %906  ;;  %v845_v52 = vadd.f32 %v843_v63, %v831_v15 }
 0x2cf   :  { %v851_v43 = vpop.permute.xlu1 %850  ;;  %v3585_v55 = vpop.permute.xlu0 %1060 }
 0x2d0   :  { %v857_v7 = vmul.f32 %v3583_v61, %v851_v43  ;;  %v3610_v43 = vadd.f32 %v3226_v41, %v3273_v56 }
 0x2d2   :  { %v859_v54 = vadd.f32 %v857_v7, %v845_v52  ;;  %v885_v52 = vmul.f32 %v3601_v19, %v3497_v3  ;;  %v3618_v7 = vld [vmem:[%s4623_s6 + $0xa0] sm:$0xff]  ;;  %v1130_v41 = vmul.f32 %v3610_v43, %v3155_v13 }
 0x2d3   :  { %v935_v10 = vpop.permute.xlu2 %934  ;;  %v913_v3 = vmul.f32 %v3618_v7, %v907_v21  ;;  %v3648_v21 = vld [vmem:[%s4623_s6 + $0xc0] sm:$0xff] }
 0x2d4   :  { %v873_v58 = vadd.f32 %v871_v11, %v859_v54  ;;  %v3625_v54 = vld [vmem:[%s4623_s6 + $0xa8] sm:$0xff]  ;;  %v941_v13 = vmul.f32 %v3637_v36, %v935_v10 }
 0x2d5   :  { %1109 = vadd.xlane.f32.xlu1 %v1108_v2  ;;  %v3656_v10 = vld [vmem:[%s4623_s6 + $0xc8] sm:$0xff] }
 0x2d6   :  { %v887_v63 = vadd.f32 %v885_v52, %v873_v58  ;;  %v1134_v58 = vsel %vm1078_vm1, %v1130_v41, 0.0 }
 0x2d7   :  { %v3595_v48 = vpop.permute.xlu0 %414 }
 0x2d8   :  { %v893_v25 = vpop.permute.xlu1 %892 }
 0x2d9   :  { %v899_v60 = vmul.f32 %v3606_v9, %v893_v25 }
 0x2db   :  { %v901_v56 = vadd.f32 %v899_v60, %v887_v63  ;;  %v3643_v60 = vld [vmem:[%s4623_s6 + $0xb8] sm:$0xff] }
 0x2dc   :  { %v977_v15 = vpop.permute.xlu2 %976 }
 0x2dd   :  { %v915_v52 = vadd.f32 %v913_v3, %v901_v56  ;;  %v955_v56 = vmul.f32 %v3643_v60, %v3520_v5 }
 0x2df   :  { %v3620_v2 = vpop.permute.xlu0 %469 }
 0x2e0   :  { %473 = vst.msk [vmem:[#allocation2 + $0x20] sm:$0xff] %vm89_vm0, %v3620_v2 }
 0x2e1   :  { %v921_v11 = vpop.permute.xlu1 %920 }
 0x2e2   :  { %v927_v25 = vmul.f32 %v3625_v54, %v921_v11 }
 0x2e4   :  { %v929_v4 = vadd.f32 %v927_v25, %v915_v52  ;;  %v3661_v52 = vld [vmem:[%s4623_s6 + $0xd0] sm:$0xff] }
 0x2e5   :  { %v1005_v42 = vpop.permute.xlu2 %1004 }
 0x2e6   :  { %1135 = vadd.xlane.f32.xlu2 %v1134_v58  ;;  %v943_v63 = vadd.f32 %v941_v13, %v929_v4  ;;  %v983_v4 = vmul.f32 %v3656_v10, %v977_v15 }
 0x2e8   :  { %v957_v3 = vadd.f32 %v955_v56, %v943_v63  ;;  %v3668_v63 = vld [vmem:[%s4623_s6 + $0xd8] sm:$0xff] }
 0x2e9   :  { %v3673_v56 = vld [vmem:[%s4738_s27 + $0x38] sm:$0xff] }
 0x2ea   :  { %v963_v41 = vpop.permute.xlu1 %962  ;;  %4748 = vst [vmem:[#allocation5_spill] sm:$0xff] %v3673_v56 }
 0x2eb   :  { %v969_v11 = vmul.f32 %v3648_v21, %v963_v41 }
 0x2ed   :  { %v971_v58 = vadd.f32 %v969_v11, %v957_v3  ;;  %v3678_v11 = vld [vmem:[%s4738_s27 + $0x40] sm:$0xff] }
 0x2ee   :  { %v1047_v25 = vpop.permute.xlu2 %1046  ;;  %4749 = vst [vmem:[#allocation6_spill] sm:$0xff] %v3678_v11  ;;  %v3682_v3 = vadd.f32 %v3678_v11, %v3673_v56 }
 0x2ef   :  { %v985_v47 = vadd.f32 %v983_v4, %v971_v58  ;;  %2698 = vst.msk [vmem:[%s4739_s0 + $0x38] sm:$0xff] %vm1078_vm1, %v3678_v11  ;;  %v3693_v58 = vld [vmem:[%s4623_s6 + $0xe0] sm:$0xff] }
 0x2f0   :  { %1320 = vmatpush.msra.mxu3 %v3682_v3 }
 0x2f3   :  { %v991_v13 = vpop.permute.xlu1 %990 }
 0x2f4   :  { %v997_v5 = vmul.f32 %v3661_v52, %v991_v13  ;;  %v3699_v13 = vld [vmem:[%s4623_s6 + $0xe8] sm:$0xff] }
 0x2f6   :  { %v999_v41 = vadd.f32 %v997_v5, %v985_v47  ;;  %v1011_v47 = vmul.f32 %v3668_v63, %v1005_v42  ;;  %v3704_v5 = vld [vmem:[%s4737_s25] sm:$0xff]  ;;  %v1025_v42 = vmul.f32 %v3693_v58, %v3554_v8  ;;  %v3722_v8 = vld [vmem:[%s4623_s6 + $0xf8] sm:$0xff] }
 0x2f7   :  { %v1231_v15 = vpop.permute.xlu2 %1230  ;;  %2646 = vmatmul.msk.f32.vlgmr.msra.gmra.mxu3 %vm89_vm0, %v3704_v5  ;;  %v1067_v30 = vmul.f32 %v3722_v8, %v3585_v55 }
 0x2f8   :  { %v1013_v4 = vadd.f32 %v1011_v47, %v999_v41  ;;  %v3714_v47 = vld [vmem:[%s4623_s6 + $0xf0] sm:$0xff]  ;;  %v1237_v37 = vmul.f32 %v1231_v15, %v3245_v46 }
 0x2f9   :  { %v1053_v50 = vmul.f32 %v3714_v47, %v1047_v25 }
 0x2fa   :  { %v1027_v41 = vadd.f32 %v1025_v42, %v1013_v4 }
 0x2fc   :  { %v1033_v38 = vpop.permute.xlu1 %1032 }
 0x2fd   :  { %v1039_v62 = vmul.f32 %v3699_v13, %v1033_v38  ;;  %v1221_v38 = vmul.f32 %v3430_v12, %v3163_v16 }
 0x2ff   :  { %v316_v31 = vpop.permute.xlu2 %315  ;;  %v1041_v34 = vadd.f32 %v1039_v62, %v1027_v41  ;;  %v1239_v62 = vadd.f32 %v1237_v37, %v1221_v38 }
 0x300   :  { %318 = vst.msk [vmem:[#allocation2 + $0x18] sm:$0xff] %vm87_vm3, %v316_v31 }
 0x301   :  { %v1055_v4 = vadd.f32 %v1053_v50, %v1041_v34 }
 0x303   :  { %v1069_v41 = vadd.f32 %v1067_v30, %v1055_v4 }
 0x305   :  { %v1249_v42 = vpop.permute.xlu1 %1248 }
 0x306   :  { %v1255_v31 = vmul.f32 %v1249_v42, %v3241_v45 }
 0x307   :  { %v366_v46 = vpop.permute.xlu2 %365 }
 0x308   :  { %v1257_v25 = vadd.f32 %v1255_v31, %v1239_v62 }
 0x30a   :  { %v3729_v40 = vadd.f32 %v1257_v25, %v1069_v41 }
 0x30c   :  { %2637 = vst.msk [vmem:[%s4739_s0 + $0x10] sm:$0xff] %vm1078_vm1, %v3729_v40  ;;  %1300 = vmatpush.msra.mxu2 %v3729_v40 }
 0x30d   :  { %1278 = vst.msk [vmem:[#allocation2] sm:$0xff] %vm1078_vm1, %v3729_v40  ;;  %v361_v16 = vpop.permute.xlu1 %360  ;;  %2645 = vmatmul.msk.f32.vlgmr.msra.gmra.mxu2 %vm89_vm0, %v3704_v5 }
 0x30e   :  { %363 = vst.msk [vmem:[#allocation2 + $0x18] sm:$0xff] %vm137_vm4, %v361_v16 }
 0x30f   :  { %368 = vst.msk [vmem:[#allocation2 + $0x18] sm:$0xff] %vm143_vm5, %v366_v46  ;;  %v465_v45 = vpop.permute.xlu2 %464 }
 0x310   :  { %417 = vst.msk [vmem:[#allocation2 + $0x18] sm:$0xff] %vm193_vm7, %v3595_v48 }
 0x315   :  { %v420_v30 = vpop.permute.xlu1 %419 }
 0x316   :  { %422 = vst.msk [vmem:[#allocation2 + $0x18] sm:$0xff] %vm199_vm8, %v420_v30 }
 0x317   :  { %467 = vst.msk [vmem:[#allocation2 + $0x18] sm:$0xff] %vm248_vm9, %v465_v45  ;;  %v525_v34 = vpop.permute.xlu2 %524  ;;  %vm1283_vm9 = vcmask 523520  }
 0x318   :  { %472 = vst.msk [vmem:[#allocation2 + $0x18] sm:$0xff] %vm254_vm10, %v3620_v2  ;;  %vm1329_vm10 = vcmask 785920  }
 0x31d   :  { %v520_v37 = vpop.permute.xlu1 %519 }
 0x31e   :  { %522 = vst.msk [vmem:[#allocation2 + $0x20] sm:$0xff] %vm305_vm11, %v520_v37  ;;  %vm1335_vm11 = vcmask 1048320  }
 0x31f   :  { %527 = vst.msk [vmem:[#allocation2 + $0x20] sm:$0xff] %vm311_vm12, %v525_v34  ;;  %v530_v50 = vld [vmem:[#allocation2 + $0x18] sm:$0xff]  ;;  %vm1743_vm12 = vcmask 523264  }
 0x320   :  { %588 = vmatmul.f32.gmra.mxu0 %v530_v50 }
 0x326   :  { %v531_v12 = vld [vmem:[#allocation2 + $0x20] sm:$0xff] }
 0x327   :  { %2601 = vmatmul.msk.f32.gmra.mxu1 %vm558_vm13, %v531_v12 }
 0x32b   :  { %v1084_v48 = vpop.xlane.xlu0 %1083 }
 0x32c   :  { %v1091_v15 = vrot.slane %v1084_v48, 4 }
 0x32e   :  { %v1092_v42 = vadd.f32 %v1091_v15, %v1084_v48 }
 0x330   :  { %v1093_v31 = vrot.slane %v1092_v42, 2 }
 0x332   :  { %v1094_v41 = vadd.f32 %v1093_v31, %v1092_v42 }
 0x334   :  { %v1095_v46 = vrot.slane %v1094_v41, 1 }
 0x336   :  { %v1096_v34 = vadd.f32 %v1095_v46, %v1094_v41 }
 0x338   :  { %v1098_v33 = vadd.f32 %v1096_v34, %v3332_v35 }
 0x348   :  { %v1110_v55 = vpop.xlane.xlu1 %1109 }
 0x349   :  { %v1117_v38 = vrot.slane %v1110_v55, 4 }
 0x34b   :  { %v1118_v4 = vadd.f32 %v1117_v38, %v1110_v55 }
 0x34d   :  { %v1119_v62 = vrot.slane %v1118_v4, 2 }
 0x34f   :  { %v1120_v2 = vadd.f32 %v1119_v62, %v1118_v4 }
 0x351   :  { %v1121_v25 = vrot.slane %v1120_v2, 1 }
 0x353   :  { %v1122_v30 = vadd.f32 %v1121_v25, %v1120_v2 }
 0x355   :  { %v1124_v12 = vadd.f32 %v1122_v30, %v3332_v35 }
 0x357   :  { %v1152_v55 = vmax.f32 %v1098_v33, %v1124_v12 }
 0x359   :  { %v1136_v16 = vpop.xlane.xlu2 %1135 }
 0x35a   :  { %v1143_v45 = vrot.slane %v1136_v16, 4 }
 0x35c   :  { %v1144_v37 = vadd.f32 %v1143_v45, %v1136_v16 }
 0x35e   :  { %v1145_v50 = vrot.slane %v1144_v37, 2 }
 0x360   :  { %v1146_v23 = vadd.f32 %v1145_v50, %v1144_v37  ;;  %v3764_v50 = vld [vmem:[%s4737_s25 + $0x8] sm:$0xff]  ;;  %s2975_s25 = smov 96  }
 0x362   :  { %v1147_v11 = vrot.slane %v1146_v23, 1 }
 0x364   :  { %v1148_v48 = vadd.f32 %v1147_v11, %v1146_v23 }
 0x366   :  { %v1150_v15 = vadd.f32 %v1148_v48, %v3332_v35 }
 0x368   :  { %v1154_v38 = vmax.f32 %v1152_v55, %v1150_v15 }
 0x36a   :  { %v1162_v4 = vsub.f32 %v1124_v12, %v1154_v38  ;;  %v1168_v42 = vsub.f32 %v1150_v15, %v1154_v38  ;;  %v1156_v62 = vsub.f32 %v1098_v33, %v1154_v38 }
 0x36c   :  { %v1165_v31 = vmul.f32 1.442695, %v1162_v4  ;;  %v1171_v56 = vmul.f32 1.442695, %v1168_v42  ;;  %v1159_v2 = vmul.f32 1.442695, %v1156_v62 }
 0x36e   :  { %2900 = vpow2.f32 %v1165_v31  ;;  %v4750_v31 = vmov 2  }
 0x36f   :  { %2902 = vpow2.f32 %v1171_v56 }
 0x370   :  { %2904 = vpow2.f32 %v1159_v2 }
 0x374   :  { %v2901_v41 = vpop.eup %2900 }
 0x375   :  { %v2903_v25 = vpop.eup %2902 }
 0x376   :  { %v2905_v46 = vpop.eup %2904 }
 0x377   :  { %v1174_v16 = vadd.f32 %v2905_v46, %v2901_v41 }
 0x379   :  { %v1176_v45 = vadd.f32 %v2903_v25, %v1174_v16 }
 0x37a   :  { %v3755_v30 = vpop.f32.mrf.mxu3 }
 0x37b   :  { %2906 = vrcp.f32 %v1176_v45  ;;  %1374 = vmatpush.msrb.mxu3 %v3755_v30  ;;  %v1203_v33 = vand.u32 2147483648, %v1176_v45  ;;  %vm1197_vm3 = vweird.f32 %v1176_v45  ;;  %v1201_v11 = vand.u32 2147483647, %v1176_v45 }
 0x37c   :  { %2648 = vmatmul.msk.f32.vlgmr.msrb.gmra.mxu3 %vm89_vm0, %v3704_v5 }
 0x37d   :  { %1422 = vmatpush.msra.mxu3 %v3682_v3  ;;  %v1204_v37 = vor.u32 1.1754944e-38, %v1203_v33  ;;  %vm1202_vm7 = vcmp.eq.f32.partialorder %v1201_v11, 8.507059e+37  ;;  %v4753_v33 = vmov 4   ;;  %v4756_v11 = vmov 6  }
 0x381   :  { %v2907_v35 = vpop.eup %2906 }
 0x382   :  { %v1193_v23 = vmul.f32 %v2907_v35, %v1176_v45  ;;  %vm1198_vm4 = vweird.f32 %v2907_v35 }
 0x383   :  { %vm1199_vm5 = vmor %vm1197_vm3, %vm1198_vm4 }
 0x384   :  { %v1194_v56 = vsub.f32 1.0, %v1193_v23  ;;  %2650 = vmatmul.msk.f32.vlgmr.msra.gmra.mxu3 %vm89_vm0, %v3764_v50  ;;  %v4752_v23 = vmov 7  }
 0x386   :  { %v1195_v34 = vmul.f32 %v2907_v35, %v1194_v56  ;;  %v4755_v56 = vmov 12  }
 0x388   :  { %v1196_v12 = vadd.f32 %v2907_v35, %v1195_v34  ;;  %v4757_v34 = vmov 8  }
 0x38a   :  { %v1200_v55 = vsel %vm1199_vm5, %v2907_v35, %v1196_v12  ;;  %v4751_v35 = vmov 3   ;;  %v4759_v12 = vmov 9  }
 0x38b   :  { %v1205_v48 = vsel %vm1202_vm7, %v1204_v37, %v1200_v55  ;;  %v4758_v37 = vmov 17   ;;  %v4760_v55 = vmov 10  }
 0x38c   :  { %v1208_v15 = vmul.f32 %v2905_v46, %v1205_v48  ;;  %v1224_v38 = vmul.f32 %v2901_v41, %v1205_v48  ;;  %v3768_v4 = vmul.f32 %v2903_v25, %v1205_v48  ;;  %v4761_v48 = vmov 22  }
 0x38e   :  { %v1212_v42 = vperm.slane %v1208_v15, 0  ;;  %v4762_v15 = vmov 11  }
 0x390   :  { %1218 = vperm.xlu2 %2784, %v1212_v42   ;;  %v3770_v62 = vpop.f32.mrf.mxu2  ;;  %v4763_v42 = vmov 13  }
 0x391   :  { %1352 = vmatpush.msrb.mxu2 %v3770_v62 }
 0x392   :  { %2647 = vmatmul.msk.f32.vlgmr.msrb.gmra.mxu2 %vm89_vm0, %v3704_v5 }
 0x393   :  { %1402 = vmatpush.msra.mxu2 %v3729_v40 }
 0x398   :  { %2789 = vset.pattern.permute.xlu2 %v4750_v31 }
 0x39a   :  { %2649 = vmatmul.msk.f32.vlgmr.msra.gmra.mxu2 %vm89_vm0, %v3764_v50 }
 0x39d   :  { %v589_v2 = vpop.f32.mrf.mxu0 }
 0x39e   :  { %v590_v41 = vadd.f32 %v3361_v24, %v589_v2  ;;  %v4754_v24 = vmov 5   ;;  %v4764_v2 = vmov 27  }
 0x3a4   :  { %v612_v25 = vpop.f32.mrf.mxu1 }
 0x3a5   :  { %v613_v46 = vadd.f32 %v612_v25, %v590_v41  ;;  %v4765_v41 = vmov 14   ;;  %v4766_v25 = vmov 15  }
 0x3a7   :  { %vm616_vm8 = vcmp.gt.f32.partialorder %v613_v46, 0.0  ;;  %v618_v16 = vmul.f32 0.01, %v613_v46 }
 0x3a9   :  { %v3780_v45 = vsel %vm616_vm8, %v613_v46, %v618_v16  ;;  %v1228_v46 = vperm.slane %v1224_v38, 0  ;;  %v4767_v16 = vmov 0   ;;  %v4771_v38 = vmov 20  }
 0x3aa   :  { %644 = vperm.xlu1 %2788, %v3780_v45   ;;  %629 = vperm.xlu0 %2787, %v3780_v45  }
 0x3ab   :  { %658 = vperm.xlu2 %2789, %v3780_v45  }
 0x3b2   :  { %2790 = vset.pattern.permute.xlu1 %v4751_v35  ;;  %2794 = vset.pattern.permute.xlu0 %v4752_v23 }
 0x3b3   :  { %2791 = vset.pattern.permute.xlu2 %v4753_v33  ;;  %672 = vperm.xlu1 %2790, %v3780_v45  }
 0x3b4   :  { %728 = vperm.xlu0 %2794, %v3780_v45   ;;  %686 = vperm.xlu2 %2791, %v3780_v45  }
 0x3bb   :  { %2792 = vset.pattern.permute.xlu1 %v4754_v24 }
 0x3bc   :  { %2799 = vset.pattern.permute.xlu0 %v4755_v56  ;;  %2793 = vset.pattern.permute.xlu2 %v4756_v11  ;;  %v4779_v56 = vmov 28  }
 0x3bd   :  { %700 = vperm.xlu1 %2792, %v3780_v45   ;;  %798 = vperm.xlu0 %2799, %v3780_v45  }
 0x3be   :  { %714 = vperm.xlu2 %2793, %v3780_v45  }
 0x3c5   :  { %2795 = vset.pattern.permute.xlu1 %v4757_v34  ;;  %2804 = vset.pattern.permute.xlu0 %v4758_v37  ;;  %v4770_v37 = vmov 19   ;;  %v1246_v34 = vperm.slane %v3768_v4, 0  ;;  %v4782_v4 = vmov 31  }
 0x3c6   :  { %2796 = vset.pattern.permute.xlu2 %v4759_v12  ;;  %742 = vperm.xlu1 %2795, %v3780_v45  }
 0x3c7   :  { %868 = vperm.xlu0 %2804, %v3780_v45   ;;  %756 = vperm.xlu2 %2796, %v3780_v45  }
 0x3ce   :  { %2797 = vset.pattern.permute.xlu1 %v4760_v55  ;;  %v4781_v55 = vmov 30  }
 0x3cf   :  { %2809 = vset.pattern.permute.xlu0 %v4761_v48  ;;  %2798 = vset.pattern.permute.xlu2 %v4762_v15  ;;  %v4768_v48 = vmov 16   ;;  %v4780_v15 = vmov 29  }
 0x3d0   :  { %770 = vperm.xlu1 %2797, %v3780_v45   ;;  %938 = vperm.xlu0 %2809, %v3780_v45  }
 0x3d1   :  { %784 = vperm.xlu2 %2798, %v3780_v45  }
 0x3d8   :  { %2800 = vset.pattern.permute.xlu1 %v4763_v42  ;;  %2814 = vset.pattern.permute.xlu0 %v4764_v2  ;;  %v4769_v2 = vmov 18  }
 0x3d9   :  { %2801 = vset.pattern.permute.xlu2 %v4765_v41  ;;  %812 = vperm.xlu1 %2800, %v3780_v45   ;;  %v4778_v41 = vmov 26  }
 0x3da   :  { %1008 = vperm.xlu0 %2814, %v3780_v45   ;;  %826 = vperm.xlu2 %2801, %v3780_v45  }
 0x3e1   :  { %2802 = vset.pattern.permute.xlu1 %v4766_v25 }
 0x3e2   :  { %2815 = vset.pattern.permute.xlu0 %v4767_v16  ;;  %2803 = vset.pattern.permute.xlu2 %v4768_v48  ;;  %v4772_v48 = vmov 21  }
 0x3e3   :  { %840 = vperm.xlu1 %2802, %v3780_v45   ;;  %1234 = vperm.xlu0 %2815, %v1228_v46   ;;  %v4773_v46 = vmov 23  }
 0x3e4   :  { %854 = vperm.xlu2 %2803, %v3780_v45  }
 0x3ea   :  { %v3850_v25 = vpop.permute.xlu2 %1218 }
 0x3eb   :  { %2805 = vset.pattern.permute.xlu1 %v4769_v2  ;;  %1332 = vrot.lane.b32.xlu0 %v3755_v30, %s2975_s25  ;;  %v4774_v2 = vmov 24   ;;  %v3837_v30 = vld [vmem:[%s4738_s27 + $0x50] sm:$0xff] }
 0x3ec   :  { %2806 = vset.pattern.permute.xlu2 %v4770_v37  ;;  %882 = vperm.xlu1 %2805, %v3780_v45   ;;  %4775 = vst [vmem:[#allocation7_spill] sm:$0xff] %v3837_v30 }
 0x3ed   :  { %896 = vperm.xlu2 %2806, %v3780_v45  }
 0x3f4   :  { %2807 = vset.pattern.permute.xlu1 %v4771_v38  ;;  %v4777_v38 = vmov 25  }
 0x3f5   :  { %2808 = vset.pattern.permute.xlu2 %v4772_v48  ;;  %910 = vperm.xlu1 %2807, %v3780_v45   ;;  %v3842_v48 = vld [vmem:[%s4738_s27 + $0x58] sm:$0xff] }
 0x3f6   :  { %924 = vperm.xlu2 %2808, %v3780_v45   ;;  %4776 = vst [vmem:[#allocation8_spill] sm:$0xff] %v3842_v48 }
 0x3f7   :  { %2699 = vst.msk [vmem:[%s4739_s0 + $0x50] sm:$0xff] %vm1078_vm1, %v3842_v48 }
 0x3fd   :  { %2810 = vset.pattern.permute.xlu1 %v4773_v46 }
 0x3fe   :  { %2811 = vset.pattern.permute.xlu2 %v4774_v2  ;;  %952 = vperm.xlu1 %2810, %v3780_v45  }
 0x3ff   :  { %966 = vperm.xlu2 %2811, %v3780_v45   ;;  %v1376_v46 = vpop.f32.mrf.mxu3 }
 0x405   :  { %v659_v2 = vpop.permute.xlu2 %658 }
 0x406   :  { %2812 = vset.pattern.permute.xlu1 %v4777_v38 }
 0x407   :  { %2813 = vset.pattern.permute.xlu2 %v4778_v41  ;;  %980 = vperm.xlu1 %2812, %v3780_v45   ;;  %v1424_v42 = vpop.f32.mrf.mxu3 }
 0x408   :  { %994 = vperm.xlu2 %2813, %v3780_v45   ;;  %1474 = vmatpush.msrb.mxu2 %v1424_v42 }
 0x409   :  { %2652 = vmatmul.msk.f32.vlgmr.msrb.gmra.mxu2 %vm89_vm0, %v3764_v50 }
 0x40e   :  { %v687_v12 = vpop.permute.xlu2 %686 }
 0x40f   :  { %2816 = vset.pattern.permute.xlu1 %v4779_v56 }
 0x410   :  { %2817 = vset.pattern.permute.xlu2 %v4780_v15  ;;  %1022 = vperm.xlu1 %2816, %v3780_v45  }
 0x411   :  { %1036 = vperm.xlu2 %2817, %v3780_v45  }
 0x415   :  { %v1354_v38 = vpop.f32.mrf.mxu2 }
 0x416   :  { %v1357_v41 = vmul.f32 2.0, %v1354_v38  ;;  %v3869_v38 = vadd.f32 %v3842_v48, %v3837_v30 }
 0x418   :  { %v1358_v37 = vsub.f32 %v1357_v41, %v3729_v40  ;;  %2818 = vset.pattern.permute.xlu1 %v4781_v55 }
 0x419   :  { %2820 = vset.pattern.permute.xlu2 %v4767_v16  ;;  %1050 = vperm.xlu1 %2818, %v3780_v45  }
 0x41a   :  { %1381 = vst.msk [vmem:[#allocation2 + $0x8] sm:$0xff] %vm1078_vm1, %v1358_v37  ;;  %1252 = vperm.xlu2 %2820, %v1246_v34   ;;  %v715_v34 = vpop.permute.xlu2 %714  ;;  %v4783_v37 = vmov 1  }
 0x41c   :  { %v645_v56 = vpop.permute.xlu1 %644  ;;  %v630_v55 = vpop.permute.xlu0 %629 }
 0x41d   :  { %v1404_v15 = vpop.f32.mrf.mxu2 }
 0x41e   :  { %1452 = vmatpush.msra.mxu1 %v1404_v15 }
 0x41f   :  { %2651 = vmatmul.msk.f32.vlgmr.msra.gmra.mxu1 %vm89_vm0, %v3764_v50 }
 0x420   :  { %1528 = vmatpush.msrb.mxu1 %v3869_v38 }
 0x421   :  { %2819 = vset.pattern.permute.xlu1 %v4782_v4  ;;  %v1379_v4 = vmul.f32 2.0, %v1376_v46  ;;  %v662_v46 = vmul.f32 %v3464_v51, %v659_v2 }
 0x422   :  { %1489 = vrot.lane.b32.xlu2 %v3869_v38, %s2976_s24  ;;  %1064 = vperm.xlu1 %2819, %v3780_v45   ;;  %v757_v16 = vpop.permute.xlu2 %756 }
 0x423   :  { %2821 = vset.pattern.permute.xlu2 %v4783_v37  ;;  %v1380_v48 = vsub.f32 %v1379_v4, %v3682_v3  ;;  %v633_v37 = vmul.f32 %v630_v55, %v3444_v20  ;;  %v690_v20 = vmul.f32 %v3478_v18, %v687_v12  ;;  %v760_v18 = vmul.f32 %v3515_v53, %v757_v16 }
 0x425   :  { %v673_v41 = vpop.permute.xlu1 %672  ;;  %v636_v30 = vadd.f32 %v3456_v27, %v633_v37 }
 0x427   :  { %2654 = vmatmul.msk.f32.vlgmr.msrb.gmra.mxu1 %vm89_vm0, %v3704_v5 }
 0x42a   :  { %1326 = vrot.lane.b32.xlu2 %v3770_v62, %s2977_s22  ;;  %1280 = vrot.lane.b32.xlu1 %v3682_v3, %s2976_s24  ;;  %v648_v62 = vmul.f32 %v3449_v29, %v645_v56  ;;  %v718_v29 = vmul.f32 %v3493_v49, %v715_v34  ;;  %v729_v56 = vpop.permute.xlu0 %728 }
 0x42b   :  { %2822 = vset.pattern.permute.xlu1 %v4750_v31  ;;  %v785_v11 = vpop.permute.xlu2 %784  ;;  %v676_v31 = vmul.f32 %v3473_v26, %v673_v41 }
 0x42c   :  { %v650_v33 = vadd.f32 %v648_v62, %v636_v30  ;;  %v788_v49 = vmul.f32 %v3534_v57, %v785_v11 }
 0x42e   :  { %v664_v4 = vadd.f32 %v662_v46, %v650_v33 }
 0x42f   :  { %v701_v45 = vpop.permute.xlu1 %700 }
 0x430   :  { %v678_v24 = vadd.f32 %v676_v31, %v664_v4  ;;  %v704_v55 = vmul.f32 %v3488_v28, %v701_v45 }
 0x432   :  { %1428 = vrot.lane.b32.xlu2 %v1404_v15, %s2977_s22  ;;  %1383 = vrot.lane.b32.xlu1 %v1380_v48, %s2976_s24  ;;  %v692_v27 = vadd.f32 %v690_v20, %v678_v24  ;;  %v799_v34 = vpop.permute.xlu0 %798 }
 0x434   :  { %v827_v48 = vpop.permute.xlu2 %826  ;;  %v706_v37 = vadd.f32 %v704_v55, %v692_v27 }
 0x435   :  { %v830_v53 = vmul.f32 %v3565_v1, %v827_v48 }
 0x436   :  { %v720_v30 = vadd.f32 %v718_v29, %v706_v37 }
 0x438   :  { %v743_v23 = vpop.permute.xlu1 %742 }
 0x439   :  { %v746_v51 = vmul.f32 %v3510_v59, %v743_v23 }
 0x43a   :  { %1433 = vrot.lane.b32.xlu1 %v1424_v42, %s2975_s25  ;;  %v732_v42 = vmul.f32 %v3502_v22, %v729_v56  ;;  %v802_v22 = vmul.f32 %v3552_v14, %v799_v34  ;;  %v869_v57 = vpop.permute.xlu0 %868  ;;  %v1723_v34 = vld [vmem:[%s4625_s10 + $0xc0] sm:$0xff] }
 0x43b   :  { %v872_v14 = vmul.f32 %v3593_v17, %v869_v57 }
 0x43c   :  { %v734_v33 = vadd.f32 %v732_v42, %v720_v30 }
 0x43e   :  { %v855_v2 = vpop.permute.xlu2 %854  ;;  %v748_v31 = vadd.f32 %v746_v51, %v734_v33 }
 0x440   :  { %v762_v12 = vadd.f32 %v760_v18, %v748_v31 }
 0x442   :  { %v771_v15 = vpop.permute.xlu1 %770  ;;  %v939_v17 = vpop.permute.xlu0 %938 }
 0x443   :  { %v774_v28 = vmul.f32 %v3529_v0, %v771_v15  ;;  %v858_v15 = vmul.f32 %v3583_v61, %v855_v2  ;;  %v1730_v61 = vld [vmem:[%s4625_s10 + $0xf8] sm:$0xff] }
 0x444   :  { %1773 = vmatpush.msra.mxu0 %v1730_v61 }
 0x445   :  { %v776_v41 = vadd.f32 %v774_v28, %v762_v12  ;;  %v1726_v12 = vld [vmem:[%s4625_s10 + $0xd8] sm:$0xff] }
 0x447   :  { %v897_v24 = vpop.permute.xlu2 %896  ;;  %v790_v62 = vadd.f32 %v788_v49, %v776_v41  ;;  %v1724_v49 = vld [vmem:[%s4625_s10 + $0xc8] sm:$0xff] }
 0x448   :  { %v900_v42 = vmul.f32 %v3606_v9, %v897_v24  ;;  %v1728_v9 = vld [vmem:[%s4625_s10 + $0xe8] sm:$0xff] }
 0x449   :  { %v804_v23 = vadd.f32 %v802_v22, %v790_v62 }
 0x44b   :  { %v813_v26 = vpop.permute.xlu1 %812 }
 0x44c   :  { %v816_v59 = vmul.f32 %v3560_v6, %v813_v26  ;;  %v1009_v22 = vpop.permute.xlu0 %1008 }
 0x44e   :  { %v818_v4 = vadd.f32 %v816_v59, %v804_v23 }
 0x450   :  { %v925_v20 = vpop.permute.xlu2 %924  ;;  %v832_v16 = vadd.f32 %v830_v53, %v818_v4  ;;  %v1719_v53 = vld [vmem:[%s4625_s10 + $0xa0] sm:$0xff] }
 0x451   :  { %v928_v2 = vmul.f32 %v3625_v54, %v925_v20  ;;  %v1727_v54 = vld [vmem:[%s4625_s10 + $0xe0] sm:$0xff]  ;;  %v1720_v20 = vld [vmem:[%s4625_s10 + $0xa8] sm:$0xff] }
 0x455   :  { %v841_v45 = vpop.permute.xlu1 %840 }
 0x456   :  { %v844_v0 = vmul.f32 %v3578_v39, %v841_v45 }
 0x458   :  { %v846_v55 = vadd.f32 %v844_v0, %v832_v16  ;;  %v1012_v0 = vmul.f32 %v3668_v63, %v1009_v22  ;;  %v1701_v22 = vld [vmem:[%s4625_s10 + $0x10] sm:$0xff] }
 0x459   :  { %v967_v37 = vpop.permute.xlu2 %966 }
 0x45a   :  { %v860_v11 = vadd.f32 %v858_v15, %v846_v55  ;;  %v1235_v15 = vpop.permute.xlu0 %1234 }
 0x45c   :  { %v874_v29 = vadd.f32 %v872_v14, %v860_v11  ;;  %v1717_v11 = vld [vmem:[%s4625_s10 + $0x90] sm:$0xff] }
 0x45e   :  { %v883_v46 = vpop.permute.xlu1 %882 }
 0x45f   :  { %v886_v6 = vmul.f32 %v3601_v19, %v883_v46  ;;  %v1729_v19 = vld [vmem:[%s4625_s10 + $0xf0] sm:$0xff] }
 0x460   :  { %1774 = vmatpush.msra.mxu0 %v1729_v19  ;;  %v1721_v46 = vld [vmem:[%s4625_s10 + $0xb0] sm:$0xff] }
 0x461   :  { %v888_v56 = vadd.f32 %v886_v6, %v874_v29 }
 0x462   :  { %v995_v39 = vpop.permute.xlu2 %994  ;;  %1775 = vmatpush.msra.mxu0 %v1728_v9 }
 0x463   :  { %v902_v48 = vadd.f32 %v900_v42, %v888_v56  ;;  %v1716_v56 = vld [vmem:[%s4625_s10 + $0x88] sm:$0xff] }
 0x464   :  { %1776 = vmatpush.msra.mxu0 %v1727_v54  ;;  %v1709_v54 = vld [vmem:[%s4625_s10 + $0x50] sm:$0xff] }
 0x466   :  { %1777 = vmatpush.msra.mxu0 %v1726_v12 }
 0x467   :  { %v911_v27 = vpop.permute.xlu1 %910 }
 0x468   :  { %v914_v1 = vmul.f32 %v3618_v7, %v911_v27  ;;  %v942_v7 = vmul.f32 %v3637_v36, %v939_v17  ;;  %v1725_v36 = vld [vmem:[%s4625_s10 + $0xd0] sm:$0xff]  ;;  %v1718_v27 = vld [vmem:[%s4625_s10 + $0x98] sm:$0xff] }
 0x469   :  { %1778 = vmatpush.msra.mxu0 %v1725_v36  ;;  %v1707_v36 = vld [vmem:[%s4625_s10 + $0x40] sm:$0xff] }
 0x46a   :  { %v916_v51 = vadd.f32 %v914_v1, %v902_v48 }
 0x46b   :  { %v1037_v18 = vpop.permute.xlu2 %1036  ;;  %1779 = vmatpush.msra.mxu0 %v1724_v49  ;;  %v1704_v49 = vld [vmem:[%s4625_s10 + $0x28] sm:$0xff] }
 0x46c   :  { %v930_v26 = vadd.f32 %v928_v2, %v916_v51  ;;  %v1040_v63 = vmul.f32 %v3699_v13, %v1037_v18 }
 0x46d   :  { %1780 = vmatpush.msra.mxu0 %v1723_v34  ;;  %v1703_v34 = vld [vmem:[%s4625_s10 + $0x20] sm:$0xff] }
 0x46e   :  { %v944_v28 = vadd.f32 %v942_v7, %v930_v26  ;;  %v1712_v26 = vld [vmem:[%s4625_s10 + $0x68] sm:$0xff]  ;;  %v1711_v7 = vld [vmem:[%s4625_s10 + $0x60] sm:$0xff] }
 0x470   :  { %v953_v30 = vpop.permute.xlu1 %952 }
 0x471   :  { %v956_v31 = vmul.f32 %v3643_v60, %v953_v30  ;;  %v970_v60 = vmul.f32 %v3648_v21, %v967_v37  ;;  %v1722_v21 = vld [vmem:[%s4625_s10 + $0xb8] sm:$0xff]  ;;  %v1238_v37 = vmul.f32 %v1235_v15, %v3569_v32  ;;  %v1222_v30 = vmul.f32 %v3850_v25, %v3537_v44  ;;  %v1733_v15 = vld [vmem:[%s4625_s10 + $0x110] sm:$0xff] }
 0x472   :  { %1781 = vmatpush.msra.mxu0 %v1722_v21  ;;  %v1700_v21 = vld [vmem:[%s4625_s10 + $0x8] sm:$0xff] }
 0x473   :  { %v958_v41 = vadd.f32 %v956_v31, %v944_v28  ;;  %v1710_v31 = vld [vmem:[%s4625_s10 + $0x58] sm:$0xff] }
 0x474   :  { %v1253_v23 = vpop.permute.xlu2 %1252  ;;  %1782 = vmatpush.msra.mxu0 %v1721_v46 }
 0x475   :  { %v972_v62 = vadd.f32 %v970_v60, %v958_v41  ;;  %v1256_v42 = vmul.f32 %v1253_v23, %v3610_v43  ;;  %v1714_v43 = vld [vmem:[%s4625_s10 + $0x78] sm:$0xff]  ;;  %v1708_v41 = vld [vmem:[%s4625_s10 + $0x48] sm:$0xff] }
 0x476   :  { %1783 = vmatpush.msra.mxu0 %v1720_v20  ;;  %v1706_v60 = vld [vmem:[%s4625_s10 + $0x38] sm:$0xff] }
 0x478   :  { %1784 = vmatpush.msra.mxu0 %v1719_v53  ;;  %v1738_v53 = vld [vmem:[%s4625_s10 + $0x138] sm:$0xff] }
 0x479   :  { %v981_v33 = vpop.permute.xlu1 %980 }
 0x47a   :  { %v984_v24 = vmul.f32 %v3656_v10, %v981_v33  ;;  %v998_v10 = vmul.f32 %v3661_v52, %v995_v39  ;;  %1785 = vmatpush.msra.mxu0 %v1718_v27  ;;  %v1240_v39 = vadd.f32 %v1238_v37, %v1222_v30  ;;  %v1333_v33 = vpop.permute.xlu0 %1332  ;;  %v1731_v37 = vld [vmem:[%s4625_s10 + $0x100] sm:$0xff] }
 0x47c   :  { %v986_v59 = vadd.f32 %v984_v24, %v972_v62  ;;  %1786 = vmatpush.msra.mxu0 %v1717_v11  ;;  %v1258_v61 = vadd.f32 %v1256_v42, %v1240_v39  ;;  %v1705_v24 = vld [vmem:[%s4625_s10 + $0x30] sm:$0xff]  ;;  %v1702_v62 = vld [vmem:[%s4625_s10 + $0x18] sm:$0xff] }
 0x47e   :  { %v1000_v4 = vadd.f32 %v998_v10, %v986_v59  ;;  %1787 = vmatpush.msra.mxu0 %v1716_v56  ;;  %v1699_v10 = vld [vmem:[%s4625_s10] sm:$0xff] }
 0x480   :  { %v1014_v55 = vadd.f32 %v1012_v0, %v1000_v4  ;;  %v1737_v0 = vld [vmem:[%s4625_s10 + $0x130] sm:$0xff] }
 0x482   :  { %v1023_v45 = vpop.permute.xlu1 %1022 }
 0x483   :  { %v1026_v52 = vmul.f32 %v3693_v58, %v1023_v45  ;;  %v1490_v58 = vpop.permute.xlu2 %1489 }
 0x485   :  { %v1028_v57 = vadd.f32 %v1026_v52, %v1014_v55  ;;  %v1736_v52 = vld [vmem:[%s4625_s10 + $0x128] sm:$0xff] }
 0x487   :  { %v1042_v1 = vadd.f32 %v1040_v63, %v1028_v57  ;;  %v1732_v57 = vld [vmem:[%s4625_s10 + $0x108] sm:$0xff] }
 0x48b   :  { %v1051_v16 = vpop.permute.xlu1 %1050 }
 0x48c   :  { %v1054_v14 = vmul.f32 %v3714_v47, %v1051_v16  ;;  %v1476_v6 = vpop.f32.mrf.mxu2  ;;  %v1715_v47 = vld [vmem:[%s4625_s10 + $0x80] sm:$0xff] }
 0x48d   :  { %v1479_v29 = vmul.f32 2.0, %v1476_v6  ;;  %1788 = vmatpush.msra.mxu0 %v1715_v47  ;;  %v1735_v16 = vld [vmem:[%s4625_s10 + $0x120] sm:$0xff] }
 0x48e   :  { %v1056_v48 = vadd.f32 %v1054_v14, %v1042_v1 }
 0x48f   :  { %v1480_v13 = vsub.f32 %v1479_v29, %v3682_v3  ;;  %v1327_v3 = vpop.permute.xlu2 %1326 }
 0x491   :  { %1483 = vrot.lane.b32.xlu0 %v1480_v13, %s2976_s24 }
 0x494   :  { %v1065_v32 = vpop.permute.xlu1 %1064 }
 0x495   :  { %v1068_v51 = vmul.f32 %v3722_v8, %v1065_v32  ;;  %v1713_v8 = vld [vmem:[%s4625_s10 + $0x70] sm:$0xff] }
 0x497   :  { %v1070_v44 = vadd.f32 %v1068_v51, %v1056_v48  ;;  %v1429_v12 = vpop.permute.xlu2 %1428 }
 0x499   :  { %v3977_v25 = vadd.f32 %v1258_v61, %v1070_v44 }
 0x49b   :  { %4784 = vst [vmem:[#allocation9_spill] sm:$0xff] %v3977_v25  ;;  %1508 = vmatpush.msrb.mxu3 %v3977_v25  ;;  %1608 = vmatpush.msra.mxu1 %v3977_v25 }
 0x49c   :  { %2638 = vst.msk [vmem:[%s4739_s0 + $0x28] sm:$0xff] %vm1078_vm1, %v3977_v25  ;;  %v1281_v2 = vpop.permute.xlu1 %1280  ;;  %2653 = vmatmul.msk.f32.vlgmr.msrb.gmra.mxu3 %vm89_vm0, %v3704_v5  ;;  %v1454_v17 = vpop.f32.mrf.mxu1  ;;  %2657 = vmatmul.msk.f32.vlgmr.msra.gmra.mxu1 %vm89_vm0, %v3764_v50 }
 0x49d   :  { %1487 = vst.msk [vmem:[#allocation2 + $0x18] sm:$0xff] %vm1078_vm1, %v3977_v25  ;;  %1750 = vmatpush.msrb.mxu1 %v1714_v43  ;;  %v1457_v19 = vmul.f32 2.0, %v1454_v17 }
 0x49e   :  { %1284 = vst.msk [vmem:[#allocation2] sm:$0xff] %vm1283_vm9, %v1281_v2 }
 0x49f   :  { %1330 = vst.msk [vmem:[#allocation2] sm:$0xff] %vm1329_vm10, %v1327_v3  ;;  %1751 = vmatpush.msrb.mxu1 %v1713_v8  ;;  %v1458_v9 = vsub.f32 %v1457_v19, %v3729_v40 }
 0x4a0   :  { %1492 = vst.msk [vmem:[#allocation2 + $0x18] sm:$0xff] %vm1283_vm9, %v1490_v58 }
 0x4a1   :  { %1752 = vmatpush.msrb.mxu1 %v1712_v26  ;;  %1336 = vst.msk [vmem:[#allocation2] sm:$0xff] %vm1335_vm11, %v1333_v33  ;;  %v4785_v33 = vmov 5  }
 0x4a2   :  { %1481 = vst.msk [vmem:[#allocation2 + $0x10] sm:$0xff] %vm1078_vm1, %v1458_v9  ;;  %v4786_v9 = vmov 4  }
 0x4a3   :  { %1753 = vmatpush.msrb.mxu1 %v1711_v7 }
 0x4a4   :  { %v1384_v18 = vpop.permute.xlu1 %1383  ;;  %v1530_v28 = vpop.f32.mrf.mxu1 }
 0x4a5   :  { %1754 = vmatpush.msrb.mxu1 %v1710_v31  ;;  %1386 = vst.msk [vmem:[#allocation2 + $0x8] sm:$0xff] %vm1283_vm9, %v1384_v18  ;;  %1580 = vmatpush.msra.mxu3 %v1530_v28  ;;  %v4788_v18 = vmov 6  }
 0x4a6   :  { %1539 = vrot.lane.b32.xlu2 %v1530_v28, %s2975_s25  ;;  %1431 = vst.msk [vmem:[#allocation2 + $0x8] sm:$0xff] %vm1329_vm10, %v1429_v12  ;;  %2656 = vmatmul.msk.f32.vlgmr.msra.gmra.mxu3 %vm89_vm0, %v3704_v5  ;;  %v4789_v28 = vmov 9   ;;  %v4790_v12 = vmov 8  }
 0x4a7   :  { %1755 = vmatpush.msrb.mxu1 %v1709_v54  ;;  %1628 = vmatpush.msrb.mxu3 %v3869_v38  ;;  %v4787_v54 = vmov 7  }
 0x4a8   :  { %v1693_v23 = vld [vmem:[#allocation2] sm:$0xff] }
 0x4a9   :  { %1756 = vmatpush.msrb.mxu1 %v1708_v41  ;;  %v4791_v41 = vmov 10  }
 0x4ab   :  { %1757 = vmatpush.msrb.mxu1 %v1707_v36  ;;  %v4792_v36 = vld [vmem:[#allocation5_spill] sm:$0xff] }
 0x4ac   :  { %v1434_v45 = vpop.permute.xlu1 %1433 }
 0x4ad   :  { %1758 = vmatpush.msrb.mxu1 %v1706_v60  ;;  %1436 = vst.msk [vmem:[#allocation2 + $0x8] sm:$0xff] %vm1335_vm11, %v1434_v45  ;;  %v4793_v60 = vmov 19   ;;  %v4795_v45 = vmov 12  }
 0x4ae   :  { %2658 = vmatmul.msk.f32.vlgmr.msrb.gmra.mxu3 %vm89_vm0, %v3764_v50 }
 0x4af   :  { %1759 = vmatpush.msrb.mxu1 %v1705_v24  ;;  %v4794_v24 = vmov 11  }
 0x4b1   :  { %1760 = vmatpush.msrb.mxu1 %v1704_v49 }
 0x4b3   :  { %1761 = vmatpush.msrb.mxu1 %v1703_v34  ;;  %v4796_v34 = vld [vmem:[#allocation7_spill] sm:$0xff] }
 0x4b4   :  { %v1694_v59 = vld [vmem:[#allocation2 + $0x8] sm:$0xff] }
 0x4b5   :  { %1762 = vmatpush.msrb.mxu1 %v1702_v62  ;;  %1789 = vmatmul.f32.vlgmr.msra.gmra.mxu0 %v1694_v59  ;;  %v2695_v62 = vld [vmem:[%s4627_s12 + $0x10] sm:$0xff]  ;;  %v2277_v59 = vld [vmem:[%s4627_s12] sm:$0xff] }
 0x4b7   :  { %1763 = vmatpush.msrb.mxu1 %v1701_v22  ;;  %v2694_v22 = vld [vmem:[%s4627_s12 + $0x8] sm:$0xff]  ;;  %s2978_s12 = smov 124  }
 0x4b9   :  { %1764 = vmatpush.msrb.mxu1 %v1700_v21  ;;  %v4797_v21 = vld [vmem:[#allocation6_spill] sm:$0xff] }
 0x4bb   :  { %1765 = vmatpush.msrb.mxu1 %v1699_v10  ;;  %v4159_v10 = vadd.f32 %v2695_v62, %v4797_v21 }
 0x4bc   :  { %1766 = vmatmul.f32.vlgmr.msrb.gmra.mxu1 %v1693_v23  ;;  %v2275_v23 = vld [vmem:[%s4628_s15] sm:$0xff]  ;;  %s2979_s15 = smov 126  }
 0x500   :  { %v1540_v6 = vpop.permute.xlu2 %1539 }
 0x503   :  { %v1484_v46 = vpop.permute.xlu0 %1483 }
 0x504   :  { %1486 = vst.msk [vmem:[#allocation2 + $0x10] sm:$0xff] %vm1283_vm9, %v1484_v46  ;;  %v4165_v46 = vadd.f32 %v2694_v22, %v4792_v36 }
 0x50b   :  { %v1695_v63 = vld [vmem:[#allocation2 + $0x10] sm:$0xff] }
 0x519   :  { %v1610_v20 = vpop.f32.mrf.mxu1 }
 0x51f   :  { %v1510_v4 = vpop.f32.mrf.mxu3 }
 0x520   :  { %1534 = vrot.lane.b32.xlu1 %v1510_v4, %s2977_s22  ;;  %1558 = vmatpush.msra.mxu2 %v1510_v4 }
 0x521   :  { %2655 = vmatmul.msk.f32.vlgmr.msra.gmra.mxu2 %vm89_vm0, %v3704_v5  ;;  %v1734_v5 = vld [vmem:[%s4625_s10 + $0x118] sm:$0xff] }
 0x522   :  { %1658 = vmatpush.msrb.mxu2 %v1610_v20 }
 0x524   :  { %1804 = vmatpush.msra.mxu2 %v1738_v53  ;;  %v2306_v53 = vmul.f32 %v4165_v46, %v2275_v23 }
 0x526   :  { %1805 = vmatpush.msra.mxu2 %v1737_v0 }
 0x528   :  { %1806 = vmatpush.msra.mxu2 %v1736_v52  ;;  %1634 = vrot.lane.b32.xlu1 %v1610_v20, %s2977_s22  ;;  %v2332_v20 = vmul.f32 %v4159_v10, %v2275_v23 }
 0x529   :  { %v1582_v55 = vpop.f32.mrf.mxu3  ;;  %2659 = vmatmul.msk.f32.vlgmr.msrb.gmra.mxu2 %vm89_vm0, %v3764_v50 }
 0x52a   :  { %1807 = vmatpush.msra.mxu2 %v1735_v16  ;;  %v1585_v27 = vmul.f32 2.0, %v1582_v55  ;;  %v2334_v52 = vsel %vm1078_vm1, %v2332_v20, 0.0  ;;  %v4798_v16 = vld [vmem:[#allocation8_spill] sm:$0xff]  ;;  %v2308_v55 = vsel %vm1078_vm1, %v2306_v53, 0.0  ;;  %v4813_v53 = vmov 16  }
 0x52c   :  { %1808 = vmatpush.msra.mxu2 %v1734_v5  ;;  %v1586_v11 = vsub.f32 %v1585_v27, %v3869_v38  ;;  %v4174_v5 = vadd.f32 %v2695_v62, %v4798_v16  ;;  %v4814_v16 = vmov 18  }
 0x52e   :  { %1809 = vmatpush.msra.mxu2 %v1733_v15  ;;  %1589 = vrot.lane.b32.xlu0 %v1586_v11, %s2976_s24  ;;  %4799 = vst [vmem:[#allocation5_spill] sm:$0xff] %v4174_v5  ;;  %v4178_v15 = vadd.f32 %v2694_v22, %v4796_v34  ;;  %v2333_v11 = vmul.f32 %v4174_v5, %v2275_v23  ;;  %v4243_v22 = vld [vmem:[%s4629_s13 + $0x28] sm:$0xff] }
 0x52f   :  { %4811 = vst [vmem:[#allocation11_spill] sm:$0xff] %v4243_v22 }
 0x530   :  { %1810 = vmatpush.msra.mxu2 %v1732_v57  ;;  %4800 = vst [vmem:[#allocation7_spill] sm:$0xff] %v4178_v15 }
 0x531   :  { %v1630_v58 = vpop.f32.mrf.mxu3 }
 0x532   :  { %1811 = vmatpush.msra.mxu2 %v1731_v37  ;;  %1639 = vrot.lane.b32.xlu2 %v1630_v58, %s2975_s25  ;;  %v1790_v44 = vpop.f32.mrf.mxu0  ;;  %v2307_v37 = vmul.f32 %v4178_v15, %v2275_v23 }
 0x533   :  { %2661 = vmatmul.msk.f32.vlgmr.msra.gmra.mxu2 %vm1743_vm12, %v1695_v63  ;;  %1680 = vmatpush.msra.mxu3 %v1630_v58  ;;  %v2337_v58 = vsel %vm1078_vm1, %v2333_v11, 0.0  ;;  %v4260_v11 = vld [vmem:[%s4629_s13 + $0x38] sm:$0xff] }
 0x534   :  { %2660 = vmatmul.msk.f32.vlgmr.msra.gmra.mxu3 %vm89_vm0, %v3764_v50  ;;  %v4101_v50 = vld [vmem:[%s4626_s11] ss:$0 sm:$0xff]  ;;  %4815 = vst [vmem:[#allocation13_spill] sm:$0xff] %v4260_v11 }
 0x539   :  { %v1767_v47 = vpop.f32.mrf.mxu1 }
 0x53a   :  { %v1768_v51 = vadd.f32 %v4101_v50, %v1767_v47  ;;  %v4208_v47 = vld [vmem:[%s4629_s13 + $0x8] sm:$0xff] }
 0x53c   :  { %v1791_v3 = vadd.f32 %v1790_v44, %v1768_v51  ;;  %v4219_v44 = vld [vmem:[%s4629_s13 + $0x10] sm:$0xff] }
 0x58c   :  { %v1640_v13 = vpop.permute.xlu2 %1639 }
 0x592   :  { %v1535_v14 = vpop.permute.xlu1 %1534 }
 0x593   :  { %1537 = vst.msk [vmem:[#allocation2 + $0x18] sm:$0xff] %vm1329_vm10, %v1535_v14  ;;  %v2311_v14 = vsel %vm1078_vm1, %v2307_v37, 0.0 }
 0x594   :  { %1542 = vst.msk [vmem:[#allocation2 + $0x18] sm:$0xff] %vm1335_vm11, %v1540_v6 }
 0x59a   :  { %v1635_v32 = vpop.permute.xlu1 %1634 }
 0x59b   :  { %v1696_v29 = vld [vmem:[#allocation2 + $0x18] sm:$0xff] }
 0x59c   :  { %1769 = vmatmul.f32.gmra.mxu1 %v1696_v29  ;;  %v4802_v29 = vmov 24  }
 0x5a0   :  { %v1590_v1 = vpop.permute.xlu0 %1589 }
 0x5a4   :  { %v1560_v56 = vpop.f32.mrf.mxu2 }
 0x5a5   :  { %v1563_v30 = vmul.f32 2.0, %v1560_v56 }
 0x5a7   :  { %v1564_v42 = vsub.f32 %v1563_v30, %v3977_v25  ;;  %v4803_v30 = vmov 13  }
 0x5a9   :  { %1587 = vst.msk [vmem:[#allocation2 + $0x20] sm:$0xff] %vm1078_vm1, %v1564_v42  ;;  %v4804_v42 = vmov 14  }
 0x5aa   :  { %1592 = vst.msk [vmem:[#allocation2 + $0x20] sm:$0xff] %vm1283_vm9, %v1590_v1  ;;  %v4805_v1 = vmov 29  }
 0x5ab   :  { %1637 = vst.msk [vmem:[#allocation2 + $0x20] sm:$0xff] %vm1329_vm10, %v1635_v32  ;;  %v4202_v32 = vld [vmem:[%s4629_s13] sm:$0xff] }
 0x5ac   :  { %1642 = vst.msk [vmem:[#allocation2 + $0x20] sm:$0xff] %vm1335_vm11, %v1640_v13  ;;  %v1660_v39 = vpop.f32.mrf.mxu2 }
 0x5ad   :  { %v1663_v48 = vmul.f32 2.0, %v1660_v39  ;;  %v4213_v39 = vld [vmem:[%s4630_s14] sm:$0xff] }
 0x5af   :  { %v1664_v61 = vsub.f32 %v1663_v48, %v3977_v25 }
 0x5b1   :  { %1687 = vst.msk [vmem:[#allocation2 + $0x28] sm:$0xff] %vm1078_vm1, %v1664_v61 }
 0x5b3   :  { %v1697_v43 = vld [vmem:[#allocation2 + $0x20] sm:$0xff] }
 0x5b4   :  { %1792 = vmatmul.f32.gmra.mxu0 %v1697_v43 }
 0x5b6   :  { %v1813_v8 = vpop.f32.mrf.mxu2 }
 0x5b7   :  { %v1814_v2 = vadd.f32 %v1813_v8, %v1791_v3  ;;  %v1682_v26 = vpop.f32.mrf.mxu3  ;;  %v4806_v8 = vmov 15  }
 0x5b8   :  { %v1685_v7 = vmul.f32 2.0, %v1682_v26  ;;  %v4807_v26 = vmov 17  }
 0x5b9   :  { %vm1819_vm0 = vcmp.gt.f32.partialorder %v1814_v2, 0.0  ;;  %v1821_v17 = vmul.f32 0.01, %v1814_v2 }
 0x5ba   :  { %v1686_v31 = vsub.f32 %v1685_v7, %v3869_v38  ;;  %v2639_v38 = vld [vmem:[%s4738_s27 + $0x30] sm:$0xff]  ;;  %v4231_v7 = vld [vmem:[%s4629_s13 + $0x18] sm:$0xff] }
 0x5bb   :  { %v4107_v19 = vsel %vm1819_vm0, %v1814_v2, %v1821_v17  ;;  %2696 = vst.msk [vmem:[%s4739_s0 + $0x30] sm:$0xff] %vm1078_vm1, %v4792_v36  ;;  %v4167_v4 = vadd.f32 %v2639_v38, %v2277_v59  ;;  %v4809_v38 = vmov 1  }
 0x5bc   :  { %1858 = vperm.xlu1 %2822, %v4107_v19   ;;  %1844 = vperm.xlu2 %2821, %v4107_v19   ;;  %4808 = vst [vmem:[#allocation8_spill] sm:$0xff] %v4231_v7 }
 0x5bd   :  { %1828 = vperm.xlu0 %2815, %v4107_v19   ;;  %v2280_v0 = vmul.f32 %v4167_v4, %v2275_v23 }
 0x5bf   :  { %v2282_v27 = vsel %vm1078_vm1, %v2280_v0, 0.0 }
 0x5c2   :  { %v2642_v49 = vld [vmem:[%s4738_s27 + $0x48] sm:$0xff] }
 0x5c3   :  { %2697 = vst.msk [vmem:[%s4739_s0 + $0x48] sm:$0xff] %vm1078_vm1, %v4796_v34  ;;  %v4181_v57 = vadd.f32 %v2642_v49, %v2277_v59  ;;  %v4237_v49 = vld [vmem:[%s4629_s13 + $0x20] sm:$0xff] }
 0x5c4   :  { %2823 = vset.pattern.permute.xlu1 %v4751_v35  ;;  %2825 = vset.pattern.permute.xlu2 %v4785_v33  ;;  %4810 = vst [vmem:[#allocation10_spill] sm:$0xff] %v4237_v49 }
 0x5c5   :  { %2824 = vset.pattern.permute.xlu0 %v4786_v9  ;;  %1872 = vperm.xlu1 %2823, %v4107_v19   ;;  %4801 = vst [vmem:[#allocation6_spill] sm:$0xff] %v4181_v57  ;;  %v2281_v63 = vmul.f32 %v4181_v57, %v2275_v23  ;;  %v4249_v23 = vld [vmem:[%s4629_s13 + $0x30] sm:$0xff] }
 0x5c6   :  { %1900 = vperm.xlu2 %2825, %v4107_v19   ;;  %1886 = vperm.xlu0 %2824, %v4107_v19   ;;  %4812 = vst [vmem:[#allocation12_spill] sm:$0xff] %v4249_v23 }
 0x5c7   :  { %v2285_v6 = vsel %vm1078_vm1, %v2281_v63, 0.0 }
 0x5cd   :  { %2827 = vset.pattern.permute.xlu1 %v4787_v54 }
 0x5ce   :  { %2826 = vset.pattern.permute.xlu2 %v4788_v18  ;;  %1689 = vrot.lane.b32.xlu0 %v1686_v31, %s2976_s24 }
 0x5cf   :  { %1928 = vperm.xlu1 %2827, %v4107_v19   ;;  %1914 = vperm.xlu2 %2826, %v4107_v19  }
 0x5d0   :  { %2829 = vset.pattern.permute.xlu0 %v4789_v28 }
 0x5d6   :  { %1956 = vperm.xlu0 %2829, %v4107_v19  }
 0x5d7   :  { %2828 = vset.pattern.permute.xlu1 %v4790_v12  ;;  %2830 = vset.pattern.permute.xlu2 %v4791_v41 }
 0x5d8   :  { %1942 = vperm.xlu1 %2828, %v4107_v19   ;;  %1970 = vperm.xlu2 %2830, %v4107_v19  }
 0x5de   :  { %2839 = vset.pattern.permute.xlu0 %v4793_v60 }
 0x5e0   :  { %2831 = vset.pattern.permute.xlu2 %v4794_v24  ;;  %2832 = vset.pattern.permute.xlu1 %v4795_v45 }
 0x600   :  { %2335 = vadd.xlane.f32.xlu0 %v2334_v52 }
 0x601   :  { %2309 = vadd.xlane.f32.xlu2 %v2308_v55 }
 0x602   :  { %2283 = vadd.xlane.f32.xlu1 %v2282_v27 }
 0x608   :  { %2338 = vadd.xlane.f32.xlu0 %v2337_v58 }
 0x609   :  { %2312 = vadd.xlane.f32.xlu2 %v2311_v14 }
 0x60a   :  { %2286 = vadd.xlane.f32.xlu1 %v2285_v6 }
 0x616   :  { %v1845_v56 = vpop.permute.xlu2 %1844 }
 0x617   :  { %v1851_v43 = vmul.f32 %v4208_v47, %v1845_v56  ;;  %v4816_v56 = vmov 20  }
 0x61c   :  { %2096 = vperm.xlu0 %2839, %v4107_v19  }
 0x620   :  { %v1901_v61 = vpop.permute.xlu2 %1900 }
 0x621   :  { %1984 = vperm.xlu2 %2831, %v4107_v19   ;;  %v1907_v0 = vmul.f32 %v4243_v22, %v1901_v61  ;;  %v28_v61 = vstv %s4631_s16 }
 0x622   :  { %29 = vst [vmem:[#allocation4] sm:$0x1] %v28_v61 }
 0x623   :  { %1998 = vperm.xlu1 %2832, %v4107_v19  }
 0x624   :  { %2844 = vset.pattern.permute.xlu0 %v4802_v29 }
 0x625   :  { %2166 = vperm.xlu0 %2844, %v4107_v19  }
 0x629   :  { %2833 = vset.pattern.permute.xlu2 %v4803_v30  ;;  %v1915_v20 = vpop.permute.xlu2 %1914 }
 0x62a   :  { %2012 = vperm.xlu2 %2833, %v4107_v19   ;;  %v1921_v55 = vmul.f32 %v4249_v23, %v1915_v20  ;;  %v4824_v20 = vmov 26  }
 0x62b   :  { %2834 = vset.pattern.permute.xlu1 %v4804_v42 }
 0x62c   :  { %2026 = vperm.xlu1 %2834, %v4107_v19  }
 0x62d   :  { %2849 = vset.pattern.permute.xlu0 %v4805_v1 }
 0x62e   :  { %2236 = vperm.xlu0 %2849, %v4107_v19   ;;  %v1859_v13 = vpop.permute.xlu1 %1858 }
 0x62f   :  { %v1829_v48 = vpop.permute.xlu0 %1828  ;;  %v1865_v2 = vmul.f32 %v4219_v44, %v1859_v13  ;;  %v4817_v13 = vmov 22  }
 0x630   :  { %v1836_v51 = vmul.f32 %v1829_v48, %v4202_v32 }
 0x632   :  { %v1839_v3 = vadd.f32 %v4213_v39, %v1836_v51  ;;  %2835 = vset.pattern.permute.xlu2 %v4806_v8  ;;  %v4271_v51 = vld [vmem:[%s4629_s13 + $0x40] sm:$0xff] }
 0x633   :  { %2040 = vperm.xlu2 %2835, %v4107_v19   ;;  %4818 = vst [vmem:[#allocation14_spill] sm:$0xff] %v4271_v51 }
 0x634   :  { %v1853_v17 = vadd.f32 %v1851_v43, %v1839_v3  ;;  %2837 = vset.pattern.permute.xlu1 %v4807_v26  ;;  %v4280_v43 = vld [vmem:[%s4629_s13 + $0x48] sm:$0xff] }
 0x635   :  { %2068 = vperm.xlu1 %2837, %v4107_v19   ;;  %4819 = vst [vmem:[#allocation15_spill] sm:$0xff] %v4280_v43 }
 0x636   :  { %v1867_v31 = vadd.f32 %v1865_v2, %v1853_v17  ;;  %2855 = vset.pattern.permute.xlu0 %v4809_v38 }
 0x637   :  { %v1873_v36 = vpop.permute.xlu1 %1872 }
 0x638   :  { %v1879_v34 = vmul.f32 %v4231_v7, %v1873_v36  ;;  %v1887_v62 = vpop.permute.xlu0 %1886  ;;  %v4820_v36 = vmov 21  }
 0x639   :  { %v1893_v21 = vmul.f32 %v4237_v49, %v1887_v62  ;;  %v4821_v62 = vmov 23  }
 0x63a   :  { %v1881_v59 = vadd.f32 %v1879_v34, %v1867_v31 }
 0x63b   :  { %2836 = vset.pattern.permute.xlu2 %v4813_v53 }
 0x63c   :  { %v1895_v52 = vadd.f32 %v1893_v21, %v1881_v59  ;;  %2054 = vperm.xlu2 %2836, %v4107_v19   ;;  %v4822_v59 = vmov 25   ;;  %v4823_v21 = vmov 27  }
 0x63d   :  { %2838 = vset.pattern.permute.xlu1 %v4814_v16 }
 0x63e   :  { %v1909_v27 = vadd.f32 %v1907_v0, %v1895_v52  ;;  %2082 = vperm.xlu1 %2838, %v4107_v19   ;;  %v4825_v0 = vmov 28   ;;  %v4826_v52 = vmov 30  }
 0x640   :  { %v1690_v37 = vpop.permute.xlu0 %1689  ;;  %v1923_v63 = vadd.f32 %v1921_v55, %v1909_v27  ;;  %v4827_v55 = vmov 0   ;;  %v4301_v27 = vpop.permute.xlu2 %1970 }
 0x641   :  { %1692 = vst.msk [vmem:[#allocation2 + $0x28] sm:$0xff] %vm1283_vm9, %v1690_v37  ;;  %v1929_v58 = vpop.permute.xlu1 %1928 }
 0x642   :  { %v1935_v14 = vmul.f32 %v4260_v11, %v1929_v58 }
 0x644   :  { %v1937_v6 = vadd.f32 %v1935_v14, %v1923_v63  ;;  %2840 = vset.pattern.permute.xlu2 %v4816_v56 }
 0x645   :  { %2110 = vperm.xlu2 %2840, %v4107_v19  }
 0x646   :  { %2842 = vset.pattern.permute.xlu1 %v4817_v13 }
 0x647   :  { %2138 = vperm.xlu1 %2842, %v4107_v19  }
 0x648   :  { %v1698_v48 = vld [vmem:[#allocation2 + $0x28] sm:$0xff]  ;;  %v1957_v3 = vpop.permute.xlu0 %1956 }
 0x649   :  { %2662 = vmatmul.msk.f32.gmra.mxu2 %vm1743_vm12, %v1698_v48  ;;  %v1963_v31 = vmul.f32 %v4280_v43, %v1957_v3 }
 0x64a   :  { %v1943_v2 = vpop.permute.xlu1 %1942 }
 0x64b   :  { %v1949_v17 = vmul.f32 %v4271_v51, %v1943_v2  ;;  %v4304_v51 = vld [vmem:[#allocation4] sm:$0x1] }
 0x64d   :  { %v1951_v38 = vadd.f32 %v1949_v17, %v1937_v6  ;;  %2841 = vset.pattern.permute.xlu2 %v4820_v36 }
 0x64e   :  { %2124 = vperm.xlu2 %2841, %v4107_v19  }
 0x64f   :  { %v4286_v34 = vadd.f32 %v1963_v31, %v1951_v38  ;;  %2843 = vset.pattern.permute.xlu1 %v4821_v62 }
 0x650   :  { %2152 = vperm.xlu1 %2843, %v4107_v19  }
 0x656   :  { %2845 = vset.pattern.permute.xlu2 %v4822_v59 }
 0x657   :  { %2180 = vperm.xlu2 %2845, %v4107_v19  }
 0x658   :  { %2847 = vset.pattern.permute.xlu1 %v4823_v21 }
 0x659   :  { %2208 = vperm.xlu1 %2847, %v4107_v19  }
 0x65f   :  { %2846 = vset.pattern.permute.xlu2 %v4824_v20 }
 0x660   :  { %2194 = vperm.xlu2 %2846, %v4107_v19  }
 0x661   :  { %2848 = vset.pattern.permute.xlu1 %v4825_v0 }
 0x662   :  { %2222 = vperm.xlu1 %2848, %v4107_v19  }
 0x668   :  { %2850 = vset.pattern.permute.xlu2 %v4826_v52 }
 0x669   :  { %2250 = vperm.xlu2 %2850, %v4107_v19  }
 0x66a   :  { %2851 = vset.pattern.permute.xlu1 %v4827_v55 }
 0x671   :  { %2852 = vset.pattern.permute.xlu2 %v4827_v55 }
 0x673   :  { %v2336_v37 = vpop.xlane.xlu0 %2335 }
 0x674   :  { %v2310_v63 = vpop.xlane.xlu2 %2309  ;;  %v2340_v58 = vrot.slane %v2336_v37, 4 }
 0x675   :  { %v2314_v14 = vrot.slane %v2310_v63, 4  ;;  %v2284_v6 = vpop.xlane.xlu1 %2283 }
 0x676   :  { %v2288_v48 = vrot.slane %v2284_v6, 4  ;;  %v2341_v61 = vadd.f32 %v2340_v58, %v2336_v37 }
 0x677   :  { %v2315_v3 = vadd.f32 %v2314_v14, %v2310_v63 }
 0x678   :  { %v2289_v2 = vadd.f32 %v2288_v48, %v2284_v6  ;;  %v2342_v17 = vrot.slane %v2341_v61, 2 }
 0x679   :  { %v2316_v31 = vrot.slane %v2315_v3, 2 }
 0x67a   :  { %v2290_v38 = vrot.slane %v2289_v2, 2  ;;  %v2343_v25 = vadd.f32 %v2342_v17, %v2341_v61 }
 0x67b   :  { %v2317_v5 = vadd.f32 %v2316_v31, %v2315_v3 }
 0x67c   :  { %v2291_v15 = vadd.f32 %v2290_v38, %v2289_v2  ;;  %v2344_v57 = vrot.slane %v2343_v25, 1 }
 0x67d   :  { %v2318_v43 = vrot.slane %v2317_v5, 1 }
 0x67e   :  { %v2292_v11 = vrot.slane %v2291_v15, 1  ;;  %v2345_v23 = vadd.f32 %v2344_v57, %v2343_v25 }
 0x67f   :  { %v2319_v22 = vadd.f32 %v2318_v43, %v2317_v5 }
 0x680   :  { %v2293_v49 = vadd.f32 %v2292_v11, %v2291_v15  ;;  %v2352_v63 = vadd.f32 %v2345_v23, %v4304_v51 }
 0x681   :  { %v2326_v7 = vadd.f32 %v2319_v22, %v4304_v51 }
 0x682   :  { %v2300_v37 = vadd.f32 %v2293_v49, %v4304_v51 }
 0x684   :  { %v2354_v58 = vmax.f32 %v2300_v37, %v2326_v7 }
 0x686   :  { %v2356_v14 = vmax.f32 %v2354_v58, %v2352_v63 }
 0x688   :  { %v2358_v6 = vsub.f32 %v2300_v37, %v2356_v14  ;;  %v2364_v48 = vsub.f32 %v2326_v7, %v2356_v14  ;;  %v2370_v61 = vsub.f32 %v2352_v63, %v2356_v14 }
 0x68a   :  { %v2360_v3 = vmul.f32 1.442695, %v2358_v6  ;;  %v2366_v2 = vmul.f32 1.442695, %v2364_v48  ;;  %v2372_v17 = vmul.f32 1.442695, %v2370_v61 }
 0x68c   :  { %2908 = vpow2.f32 %v2360_v3 }
 0x68d   :  { %2910 = vpow2.f32 %v2372_v17  ;;  %v4828_v17 = vmov 31  }
 0x68e   :  { %2912 = vpow2.f32 %v2366_v2 }
 0x692   :  { %v2909_v25 = vpop.eup %2908 }
 0x693   :  { %v2911_v5 = vpop.eup %2910 }
 0x694   :  { %v2913_v15 = vpop.eup %2912 }
 0x695   :  { %v2376_v57 = vadd.f32 %v2913_v15, %v2909_v25 }
 0x697   :  { %v2378_v22 = vadd.f32 %v2911_v5, %v2376_v57  ;;  %v2313_v57 = vpop.xlane.xlu2 %2312 }
 0x699   :  { %2914 = vrcp.f32 %v2378_v22  ;;  %v2391_v43 = vand.u32 2147483648, %v2378_v22  ;;  %vm2385_vm13 = vweird.f32 %v2378_v22  ;;  %v2389_v7 = vand.u32 2147483647, %v2378_v22 }
 0x69b   :  { %v2392_v37 = vor.u32 1.1754944e-38, %v2391_v43  ;;  %vm2390_vm6 = vcmp.eq.f32.partialorder %v2389_v7, 8.507059e+37 }
 0x69f   :  { %v2915_v49 = vpop.eup %2914 }
 0x6a0   :  { %v2381_v11 = vmul.f32 %v2915_v49, %v2378_v22  ;;  %vm2386_vm14 = vweird.f32 %v2915_v49  ;;  %v4829_v22 = vmov 2  }
 0x6a1   :  { %vm2387_vm15 = vmor %vm2385_vm13, %vm2386_vm14 }
 0x6a2   :  { %v2382_v23 = vsub.f32 1.0, %v2381_v11  ;;  %v1770_v11 = vpop.f32.mrf.mxu1 }
 0x6a4   :  { %v2383_v31 = vmul.f32 %v2915_v49, %v2382_v23  ;;  %v1771_v23 = vadd.f32 %v4101_v50, %v1770_v11  ;;  %v2339_v50 = vpop.xlane.xlu0 %2338 }
 0x6a6   :  { %v2384_v38 = vadd.f32 %v2915_v49, %v2383_v31 }
 0x6a8   :  { %v2388_v63 = vsel %vm2387_vm15, %v2915_v49, %v2384_v38  ;;  %v1985_v49 = vpop.permute.xlu2 %1984 }
 0x6a9   :  { %v2393_v58 = vsel %vm2390_vm6, %v2392_v37, %v2388_v63  ;;  %v2320_v63 = vrot.slane %v2313_v57, 4 }
 0x6aa   :  { %v2426_v14 = vmul.f32 %v2913_v15, %v2393_v58  ;;  %v2410_v6 = vmul.f32 %v2909_v25, %v2393_v58  ;;  %v2444_v3 = vmul.f32 %v2911_v5, %v2393_v58  ;;  %v1793_v15 = vpop.f32.mrf.mxu0  ;;  %v2287_v25 = vpop.xlane.xlu1 %2286 }
 0x6ab   :  { %v1794_v43 = vadd.f32 %v1793_v15, %v1771_v23  ;;  %v2294_v58 = vrot.slane %v2287_v25, 4 }
 0x6ac   :  { %v2430_v48 = vperm.slane %v2426_v14, 0  ;;  %v2414_v61 = vperm.slane %v2410_v6, 0  ;;  %v2448_v2 = vperm.slane %v2444_v3, 0  ;;  %v2321_v6 = vadd.f32 %v2320_v63, %v2313_v57 }
 0x6ae   :  { %2433 = vperm.xlu2 %2852, %v2430_v48   ;;  %2417 = vperm.xlu1 %2851, %v2414_v61   ;;  %v2346_v48 = vrot.slane %v2339_v50, 4  ;;  %v2295_v61 = vadd.f32 %v2294_v58, %v2287_v25  ;;  %v4354_v58 = vld [vmem:[%s4629_s13 + $0x68] sm:$0xff] }
 0x6b0   :  { %v2013_v7 = vpop.permute.xlu2 %2012  ;;  %v2296_v11 = vrot.slane %v2295_v61, 2 }
 0x6b2   :  { %v2297_v25 = vadd.f32 %v2296_v11, %v2295_v61 }
 0x6b6   :  { %2451 = vperm.xlu2 %2852, %v2448_v2   ;;  %2853 = vset.pattern.permute.xlu1 %v4828_v17  ;;  %v2322_v2 = vrot.slane %v2321_v6, 2 }
 0x6b7   :  { %2264 = vperm.xlu1 %2853, %v4107_v19   ;;  %v1999_v19 = vpop.permute.xlu1 %1998 }
 0x6b8   :  { %v2041_v14 = vpop.permute.xlu2 %2040  ;;  %v2323_v57 = vadd.f32 %v2322_v2, %v2321_v6 }
 0x6be   :  { %2856 = vset.pattern.permute.xlu2 %v4829_v22  ;;  %v2347_v22 = vadd.f32 %v2346_v48, %v2339_v50 }
 0x6bf   :  { %2854 = vset.pattern.permute.xlu1 %v4827_v55  ;;  %v2027_v3 = vpop.permute.xlu1 %2026 }
 0x6c0   :  { %v2348_v15 = vrot.slane %v2347_v22, 2 }
 0x6cc   :  { %v1816_v31 = vpop.f32.mrf.mxu2 }
 0x6cd   :  { %v1817_v5 = vadd.f32 %v1816_v31, %v1794_v43  ;;  %v4343_v43 = vld [vmem:[%s4629_s13 + $0x60] sm:$0xff]  ;;  %v2069_v31 = vpop.permute.xlu1 %2068 }
 0x6cf   :  { %vm1820_vm2 = vcmp.gt.f32.partialorder %v1817_v5, 0.0  ;;  %v1822_v38 = vmul.f32 0.01, %v1817_v5 }
 0x6d1   :  { %v4314_v37 = vsel %vm1820_vm2, %v1817_v5, %v1822_v38  ;;  %v2349_v5 = vadd.f32 %v2348_v15, %v2347_v22  ;;  %v2298_v38 = vrot.slane %v2297_v25, 1 }
 0x6d2   :  { %1848 = vperm.xlu0 %2855, %v4314_v37   ;;  %1862 = vperm.xlu2 %2856, %v4314_v37  }
 0x6d3   :  { %1833 = vperm.xlu1 %2854, %v4314_v37   ;;  %v2350_v6 = vrot.slane %v2349_v5, 1  ;;  %v2299_v48 = vadd.f32 %v2298_v38, %v2297_v25 }
 0x6d5   :  { %v2351_v11 = vadd.f32 %v2350_v6, %v2349_v5  ;;  %v2083_v15 = vpop.permute.xlu1 %2082 }
 0x6da   :  { %2860 = vset.pattern.permute.xlu0 %v4788_v18  ;;  %2857 = vset.pattern.permute.xlu2 %v4751_v35  ;;  %v4328_v35 = vld [vmem:[%s4629_s13 + $0x50] sm:$0xff]  ;;  %v2055_v18 = vpop.permute.xlu2 %2054 }
 0x6db   :  { %2858 = vset.pattern.permute.xlu1 %v4786_v9  ;;  %1918 = vperm.xlu0 %2860, %v4314_v37   ;;  %v4333_v9 = vld [vmem:[%s4629_s13 + $0x58] sm:$0xff]  ;;  %v1977_v23 = vmul.f32 %v4328_v35, %v4301_v27  ;;  %v2005_v27 = vmul.f32 %v4343_v43, %v1999_v19  ;;  %v2019_v19 = vmul.f32 %v4354_v58, %v2013_v7 }
 0x6dc   :  { %1876 = vperm.xlu2 %2857, %v4314_v37   ;;  %1890 = vperm.xlu1 %2858, %v4314_v37  }
 0x6e2   :  { %v2111_v61 = vpop.permute.xlu2 %2110 }
 0x6e3   :  { %2865 = vset.pattern.permute.xlu0 %v4794_v24  ;;  %v1991_v24 = vmul.f32 %v4333_v9, %v1985_v49  ;;  %v4359_v49 = vld [vmem:[%s4629_s13 + $0x70] sm:$0xff] }
 0x6e4   :  { %2861 = vset.pattern.permute.xlu2 %v4787_v54  ;;  %2859 = vset.pattern.permute.xlu1 %v4785_v33  ;;  %v1979_v54 = vadd.f32 %v1977_v23, %v4286_v34  ;;  %v2324_v33 = vrot.slane %v2323_v57, 1  ;;  %v2033_v2 = vmul.f32 %v4359_v49, %v2027_v3  ;;  %v4381_v23 = vld [vmem:[%s4629_s13 + $0x80] sm:$0xff] }
 0x6e5   :  { %1988 = vperm.xlu0 %2865, %v4314_v37   ;;  %1932 = vperm.xlu2 %2861, %v4314_v37   ;;  %v2061_v5 = vmul.f32 %v4381_v23, %v2055_v18 }
 0x6e6   :  { %1904 = vperm.xlu1 %2859, %v4314_v37   ;;  %v1993_v63 = vadd.f32 %v1991_v24, %v1979_v54  ;;  %v2325_v50 = vadd.f32 %v2324_v33, %v2323_v57  ;;  %v2301_v57 = vadd.f32 %v2299_v48, %v4304_v51  ;;  %v4386_v24 = vld [vmem:[%s4629_s13 + $0x88] sm:$0xff] }
 0x6e7   :  { %v2075_v38 = vmul.f32 %v4386_v24, %v2069_v31 }
 0x6e8   :  { %v2007_v34 = vadd.f32 %v2005_v27, %v1993_v63  ;;  %v2327_v22 = vadd.f32 %v2325_v50, %v4304_v51  ;;  %v2139_v63 = vpop.permute.xlu1 %2138 }
 0x6ea   :  { %v2355_v3 = vmax.f32 %v2301_v57, %v2327_v22  ;;  %v2125_v33 = vpop.permute.xlu2 %2124 }
 0x6ed   :  { %2867 = vset.pattern.permute.xlu0 %v4803_v30  ;;  %2862 = vset.pattern.permute.xlu2 %v4790_v12  ;;  %v2021_v30 = vadd.f32 %v2019_v19, %v2007_v34  ;;  %v4374_v12 = vld [vmem:[%s4629_s13 + $0x78] sm:$0xff] }
 0x6ee   :  { %2863 = vset.pattern.permute.xlu1 %v4789_v28  ;;  %2016 = vperm.xlu0 %2867, %v4314_v37   ;;  %v2353_v28 = vadd.f32 %v2351_v11, %v4304_v51  ;;  %v2047_v25 = vmul.f32 %v4374_v12, %v2041_v14  ;;  %v4392_v51 = vld [vmem:[%s4629_s13 + $0x90] sm:$0xff] }
 0x6ef   :  { %1946 = vperm.xlu2 %2862, %v4314_v37   ;;  %1960 = vperm.xlu1 %2863, %v4314_v37   ;;  %v2035_v7 = vadd.f32 %v2033_v2, %v2021_v30  ;;  %v2089_v27 = vmul.f32 %v4392_v51, %v2083_v15  ;;  %v4413_v2 = vld [vmem:[%s4629_s13 + $0xa0] sm:$0xff]  ;;  %v4423_v15 = vld [vmem:[%s4629_s13 + $0xa8] sm:$0xff] }
 0x6f0   :  { %v2357_v14 = vmax.f32 %v2355_v3, %v2353_v28 }
 0x6f1   :  { %v2049_v54 = vadd.f32 %v2047_v25, %v2035_v7  ;;  %v4428_v7 = vld [vmem:[%s4629_s13 + $0xb0] sm:$0xff] }
 0x6f2   :  { %v2359_v50 = vsub.f32 %v2301_v57, %v2357_v14  ;;  %v2365_v18 = vsub.f32 %v2327_v22, %v2357_v14  ;;  %v2371_v19 = vsub.f32 %v2353_v28, %v2357_v14  ;;  %v2181_v11 = vpop.permute.xlu2 %2180  ;;  %v2131_v28 = vmul.f32 %v4423_v15, %v2125_v33 }
 0x6f4   :  { %v2362_v48 = vmul.f32 1.442695, %v2359_v50  ;;  %v2368_v22 = vmul.f32 1.442695, %v2365_v18  ;;  %v2374_v30 = vmul.f32 1.442695, %v2371_v19 }
 0x6f6   :  { %2872 = vset.pattern.permute.xlu0 %v4814_v16  ;;  %v2063_v16 = vadd.f32 %v2061_v5, %v2049_v54  ;;  %2916 = vpow2.f32 %v2362_v48  ;;  %v2145_v54 = vmul.f32 %v4428_v7, %v2139_v63  ;;  %v4461_v63 = vld [vmem:[%s4629_s13 + $0xc0] sm:$0xff]  ;;  %v4473_v48 = vld [vmem:[%s4629_s13 + $0xc8] sm:$0xff] }
 0x6f7   :  { %2868 = vset.pattern.permute.xlu2 %v4804_v42  ;;  %2864 = vset.pattern.permute.xlu1 %v4791_v41  ;;  %v4405_v41 = vld [vmem:[%s4629_s13 + $0x98] sm:$0xff]  ;;  %v2097_v42 = vpop.permute.xlu0 %2096  ;;  %2918 = vpow2.f32 %v2368_v22 }
 0x6f8   :  { %2086 = vperm.xlu0 %2872, %v4314_v37   ;;  %2030 = vperm.xlu2 %2868, %v4314_v37   ;;  %v2077_v6 = vadd.f32 %v2075_v38, %v2063_v16  ;;  %v2103_v34 = vmul.f32 %v4405_v41, %v2097_v42  ;;  %2920 = vpow2.f32 %v2374_v30  ;;  %v2476_v42 = vld [vmem:[%s4632_s17 + $0x8] sm:$0xff] }
 0x6f9   :  { %1974 = vperm.xlu1 %2864, %v4314_v37  }
 0x6fa   :  { %v2091_v31 = vadd.f32 %v2089_v27, %v2077_v6  ;;  %v2195_v33 = vpop.permute.xlu2 %2194 }
 0x6fc   :  { %v2105_v57 = vadd.f32 %v2103_v34, %v2091_v31  ;;  %v4437_v3 = vpop.eup %2916  ;;  %v2475_v34 = vld [vmem:[%s4632_s17] sm:$0xff] }
 0x6fd   :  { %v4442_v14 = vpop.eup %2918 }
 0x6fe   :  { %v2377_v16 = vadd.f32 %v4442_v14, %v4437_v3  ;;  %v4456_v27 = vpop.eup %2920 }
 0x6ff   :  { %v2167_v50 = vpop.permute.xlu0 %2166 }
 0x700   :  { %2877 = vset.pattern.permute.xlu0 %v4821_v62  ;;  %2869 = vset.pattern.permute.xlu2 %v4806_v8  ;;  %v2117_v8 = vmul.f32 %v4413_v2, %v2111_v61  ;;  %v2153_v62 = vpop.permute.xlu1 %2152  ;;  %v4434_v61 = vld [vmem:[%s4629_s13 + $0xb8] sm:$0xff]  ;;  %v2173_v18 = vmul.f32 %v4461_v63, %v2167_v50  ;;  %v4468_v31 = vadd.f32 %v4456_v27, %v2377_v16  ;;  %v4520_v50 = vld [vmem:[%s4629_s13 + $0xf0] sm:$0xff] }
 0x701   :  { %2866 = vset.pattern.permute.xlu1 %v4795_v45  ;;  %2156 = vperm.xlu0 %2877, %v4314_v37   ;;  %v2159_v5 = vmul.f32 %v4434_v61, %v2153_v62 }
 0x702   :  { %2044 = vperm.xlu2 %2869, %v4314_v37   ;;  %2002 = vperm.xlu1 %2866, %v4314_v37   ;;  %v2119_v45 = vadd.f32 %v2117_v8, %v2105_v57  ;;  %v2251_v22 = vpop.permute.xlu2 %2250  ;;  %v2187_v57 = vmul.f32 %v4473_v48, %v2181_v11  ;;  %2922 = vrcp.f32 %v4468_v31  ;;  %v4500_v11 = vld [vmem:[%s4629_s13 + $0xe0] sm:$0xff]  ;;  %vm2400_vm3 = vweird.f32 %v4468_v31 }
 0x704   :  { %v2133_v25 = vadd.f32 %v2131_v28, %v2119_v45 }
 0x706   :  { %v2147_v38 = vadd.f32 %v2145_v54, %v2133_v25 }
 0x708   :  { %v2161_v6 = vadd.f32 %v2159_v5, %v2147_v38  ;;  %v2923_v30 = vpop.eup %2922  ;;  %v4513_v38 = vld [vmem:[%s4629_s13 + $0xe8] sm:$0xff] }
 0x709   :  { %2881 = vset.pattern.permute.xlu0 %v4823_v21  ;;  %v2478_v21 = vld [vmem:[%s4632_s17 + $0x18] sm:$0xff]  ;;  %vm2401_vm4 = vweird.f32 %v2923_v30 }
 0x70a   :  { %2873 = vset.pattern.permute.xlu2 %v4793_v60  ;;  %2870 = vset.pattern.permute.xlu1 %v4813_v53  ;;  %v2209_v60 = vpop.permute.xlu1 %2208  ;;  %v2477_v53 = vld [vmem:[%s4632_s17 + $0x10] sm:$0xff]  ;;  %v2175_v19 = vadd.f32 %v2173_v18, %v2161_v6  ;;  %v2434_v25 = vpop.permute.xlu2 %2433  ;;  %vm2402_vm5 = vmor %vm2400_vm3, %vm2401_vm4 }
 0x70b   :  { %2212 = vperm.xlu0 %2881, %v4314_v37   ;;  %2100 = vperm.xlu2 %2873, %v4314_v37  }
 0x70c   :  { %2058 = vperm.xlu1 %2870, %v4314_v37   ;;  %2501 = vmatpush.msrb.mxu3 %v2478_v21 }
 0x70e   :  { %2502 = vmatpush.msrb.mxu3 %v2477_v53 }
 0x710   :  { %2503 = vmatpush.msrb.mxu3 %v2476_v42  ;;  %v2440_v42 = vmul.f32 %v2434_v25, %v4165_v46 }
 0x712   :  { %2504 = vmatpush.msrb.mxu3 %v2475_v34  ;;  %v2223_v8 = vpop.permute.xlu1 %2222  ;;  %v2452_v18 = vpop.permute.xlu2 %2451 }
 0x713   :  { %2884 = vset.pattern.permute.xlu0 %v4826_v52  ;;  %2874 = vset.pattern.permute.xlu2 %v4816_v56  ;;  %v4489_v56 = vld [vmem:[%s4629_s13 + $0xd0] sm:$0xff]  ;;  %v2189_v52 = vadd.f32 %v2187_v57, %v2175_v19  ;;  %v2229_v54 = vmul.f32 %v4500_v11, %v2223_v8  ;;  %v2257_v19 = vmul.f32 %v4520_v50, %v2251_v22  ;;  %v2406_v8 = vand.u32 2147483648, %v4468_v31 }
 0x714   :  { %2871 = vset.pattern.permute.xlu1 %v4807_v26  ;;  %2254 = vperm.xlu0 %2884, %v4314_v37   ;;  %v4494_v26 = vld [vmem:[%s4629_s13 + $0xd8] sm:$0xff]  ;;  %v2201_v62 = vmul.f32 %v4489_v56, %v2195_v33  ;;  %v2396_v33 = vmul.f32 %v2923_v30, %v4468_v31  ;;  %v2458_v46 = vmul.f32 %v2452_v18, %v4159_v10 }
 0x715   :  { %2114 = vperm.xlu2 %2874, %v4314_v37   ;;  %2072 = vperm.xlu1 %2871, %v4314_v37   ;;  %v2215_v28 = vmul.f32 %v4494_v26, %v2209_v60  ;;  %v2237_v60 = vpop.permute.xlu0 %2236  ;;  %v2407_v22 = vor.u32 1.1754944e-38, %v2406_v8 }
 0x716   :  { %v2203_v45 = vadd.f32 %v2201_v62, %v2189_v52 }
 0x718   :  { %v2217_v5 = vadd.f32 %v2215_v28, %v2203_v45  ;;  %v2404_v45 = vand.u32 2147483647, %v4468_v31 }
 0x71a   :  { %v2231_v53 = vadd.f32 %v2229_v54, %v2217_v5  ;;  %vm2405_vm7 = vcmp.eq.f32.partialorder %v2404_v45, 8.507059e+37 }
 0x71c   :  { %2888 = vset.pattern.permute.xlu0 %v4827_v55 }
 0x71d   :  { %2878 = vset.pattern.permute.xlu2 %v4802_v29  ;;  %2875 = vset.pattern.permute.xlu1 %v4820_v36  ;;  %v2397_v29 = vsub.f32 1.0, %v2396_v33  ;;  %v2243_v36 = vmul.f32 %v4513_v38, %v2237_v60 }
 0x71e   :  { %2170 = vperm.xlu2 %2878, %v4314_v37   ;;  %2128 = vperm.xlu1 %2875, %v4314_v37  }
 0x71f   :  { %v2245_v6 = vadd.f32 %v2243_v36, %v2231_v53  ;;  %v2398_v34 = vmul.f32 %v2923_v30, %v2397_v29 }
 0x720   :  { %v2418_v21 = vpop.permute.xlu1 %2417 }
 0x721   :  { %v2424_v16 = vmul.f32 %v2418_v21, %v4167_v4  ;;  %v4530_v4 = vld [vmem:[%s4629_s13 + $0xf8] sm:$0xff]  ;;  %v2399_v62 = vadd.f32 %v2923_v30, %v2398_v34  ;;  %v4830_v34 = vld [vmem:[#allocation8_spill] sm:$0xff] }
 0x723   :  { %v2442_v57 = vadd.f32 %v2440_v42, %v2424_v16  ;;  %v2403_v33 = vsel %vm2402_vm5, %v2923_v30, %v2399_v62  ;;  %v4833_v62 = vld [vmem:[#allocation12_spill] sm:$0xff] }
 0x724   :  { %v2408_v31 = vsel %vm2405_vm7, %v2407_v22, %v2403_v33  ;;  %v4835_v33 = vld [vmem:[#allocation14_spill] sm:$0xff] }
 0x725   :  { %v2460_v28 = vadd.f32 %v2458_v46, %v2442_v57  ;;  %v4831_v57 = vld [vmem:[#allocation10_spill] sm:$0xff] }
 0x726   :  { %2879 = vset.pattern.permute.xlu2 %v4822_v59  ;;  %2876 = vset.pattern.permute.xlu1 %v4817_v13  ;;  %v2259_v13 = vadd.f32 %v2257_v19, %v2245_v6 }
 0x727   :  { %2184 = vperm.xlu2 %2879, %v4314_v37   ;;  %2142 = vperm.xlu1 %2876, %v4314_v37  }
 0x729   :  { %v2265_v52 = vpop.permute.xlu1 %2264 }
 0x72a   :  { %v2271_v59 = vmul.f32 %v4530_v4, %v2265_v52  ;;  %v4832_v52 = vld [vmem:[#allocation11_spill] sm:$0xff] }
 0x72c   :  { %v2273_v25 = vadd.f32 %v2271_v59, %v2259_v13  ;;  %v1863_v60 = vpop.permute.xlu2 %1862 }
 0x72e   :  { %v2462_v54 = vadd.f32 %v2460_v28, %v2273_v25  ;;  %v4834_v28 = vld [vmem:[#allocation13_spill] sm:$0xff] }
 0x72f   :  { %2883 = vset.pattern.permute.xlu2 %v4805_v1  ;;  %2880 = vset.pattern.permute.xlu1 %v4824_v20  ;;  %v2427_v1 = vmul.f32 %v4442_v14, %v2408_v31  ;;  %v2445_v20 = vmul.f32 %v4456_v27, %v2408_v31 }
 0x730   :  { %2700 = vst.msk [vmem:[%s4739_s0 + $0x40] sm:$0xff] %vm1078_vm1, %v2462_v54  ;;  %v2473_v10 = vadd.f32 %v2462_v54, %v3729_v40  ;;  %2240 = vperm.xlu2 %2883, %v4314_v37   ;;  %2198 = vperm.xlu1 %2880, %v4314_v37   ;;  %v2411_v40 = vmul.f32 %v4437_v3, %v2408_v31 }
 0x731   :  { %v2431_v5 = vperm.slane %v2427_v1, 0  ;;  %v2449_v30 = vperm.slane %v2445_v20, 0  ;;  %v4836_v1 = vld [vmem:[#allocation15_spill] sm:$0xff] }
 0x732   :  { %2702 = vmatmul.msk.f32.vlgmr.msrb.gmra.mxu3 %vm1078_vm1, %v2473_v10  ;;  %v2415_v21 = vperm.slane %v2411_v40, 0 }
 0x738   :  { %2886 = vset.pattern.permute.xlu2 %v4827_v55  ;;  %2882 = vset.pattern.permute.xlu1 %v4825_v0  ;;  %v1877_v0 = vpop.permute.xlu2 %1876 }
 0x739   :  { %2226 = vperm.xlu1 %2882, %v4314_v37   ;;  %2437 = vperm.xlu2 %2886, %v2431_v5   ;;  %v1880_v19 = vmul.f32 %v4830_v34, %v1877_v0 }
 0x740   :  { %v1933_v6 = vpop.permute.xlu2 %1932 }
 0x741   :  { %2885 = vset.pattern.permute.xlu1 %v4827_v55  ;;  %2455 = vperm.xlu2 %2886, %v2449_v30   ;;  %v1866_v55 = vmul.f32 %v4219_v44, %v1863_v60  ;;  %v1936_v25 = vmul.f32 %v4834_v28, %v1933_v6 }
 0x742   :  { %2421 = vperm.xlu1 %2885, %v2415_v21  }
 0x744   :  { %v1849_v36 = vpop.permute.xlu0 %1848 }
 0x745   :  { %v1834_v14 = vpop.permute.xlu1 %1833  ;;  %v1852_v3 = vmul.f32 %v4208_v47, %v1849_v36 }
 0x746   :  { %v1837_v53 = vmul.f32 %v1834_v14, %v4202_v32 }
 0x748   :  { %v1840_v27 = vadd.f32 %v4213_v39, %v1837_v53 }
 0x749   :  { %v1947_v32 = vpop.permute.xlu2 %1946 }
 0x74a   :  { %2887 = vset.pattern.permute.xlu1 %v4828_v17  ;;  %v1854_v16 = vadd.f32 %v1852_v3, %v1840_v27  ;;  %v1950_v10 = vmul.f32 %v4835_v33, %v1947_v32 }
 0x74b   :  { %2268 = vperm.xlu1 %2887, %v4314_v37  }
 0x74c   :  { %v1868_v18 = vadd.f32 %v1866_v55, %v1854_v16 }
 0x74d   :  { %v1919_v8 = vpop.permute.xlu0 %1918 }
 0x74e   :  { %v1891_v29 = vpop.permute.xlu1 %1890  ;;  %v1882_v17 = vadd.f32 %v1880_v19, %v1868_v18  ;;  %v1922_v47 = vmul.f32 %v4833_v62, %v1919_v8 }
 0x74f   :  { %v1894_v37 = vmul.f32 %v4831_v57, %v1891_v29 }
 0x751   :  { %v1896_v59 = vadd.f32 %v1894_v37, %v1882_v17 }
 0x752   :  { %v2031_v44 = vpop.permute.xlu2 %2030 }
 0x757   :  { %v1989_v20 = vpop.permute.xlu0 %1988 }
 0x758   :  { %v1905_v42 = vpop.permute.xlu1 %1904  ;;  %v1992_v0 = vmul.f32 %v4333_v9, %v1989_v20 }
 0x759   :  { %v1908_v46 = vmul.f32 %v4832_v52, %v1905_v42  ;;  %v2034_v42 = vmul.f32 %v4359_v49, %v2031_v44 }
 0x75b   :  { %v1910_v39 = vadd.f32 %v1908_v46, %v1896_v59 }
 0x75c   :  { %v2045_v60 = vpop.permute.xlu2 %2044 }
 0x75d   :  { %v1924_v45 = vadd.f32 %v1922_v47, %v1910_v39 }
 0x75f   :  { %v1938_v22 = vadd.f32 %v1936_v25, %v1924_v45 }
 0x760   :  { %v2017_v36 = vpop.permute.xlu0 %2016 }
 0x761   :  { %v1961_v13 = vpop.permute.xlu1 %1960  ;;  %v1952_v31 = vadd.f32 %v1950_v10, %v1938_v22  ;;  %v2020_v3 = vmul.f32 %v4354_v58, %v2017_v36 }
 0x762   :  { %v1964_v5 = vmul.f32 %v4836_v1, %v1961_v13 }
 0x764   :  { %v1966_v30 = vadd.f32 %v1964_v5, %v1952_v31 }
 0x765   :  { %v2101_v6 = vpop.permute.xlu2 %2100 }
 0x766   :  { %v2104_v49 = vmul.f32 %v4405_v41, %v2101_v6 }
 0x76a   :  { %v2087_v37 = vpop.permute.xlu0 %2086 }
 0x76b   :  { %v1975_v54 = vpop.permute.xlu1 %1974  ;;  %v2090_v58 = vmul.f32 %v4392_v51, %v2087_v37 }
 0x76c   :  { %v1978_v40 = vmul.f32 %v4328_v35, %v1975_v54  ;;  %v2048_v35 = vmul.f32 %v4374_v12, %v2045_v60 }
 0x76e   :  { %v1980_v14 = vadd.f32 %v1978_v40, %v1966_v30 }
 0x76f   :  { %v2115_v9 = vpop.permute.xlu2 %2114 }
 0x770   :  { %v1994_v29 = vadd.f32 %v1992_v0, %v1980_v14  ;;  %v2118_v12 = vmul.f32 %v4413_v2, %v2115_v9  ;;  %v4837_v14 = vld [vmem:[#allocation6_spill] sm:$0xff] }
 0x773   :  { %v2157_v45 = vpop.permute.xlu0 %2156 }
 0x774   :  { %v2003_v21 = vpop.permute.xlu1 %2002  ;;  %v2160_v51 = vmul.f32 %v4434_v61, %v2157_v45  ;;  %v2891_v61 = vld [vmem:[%s4633_s18] ss:$0 sm:$0xff] }
 0x775   :  { %v2006_v53 = vmul.f32 %v4343_v43, %v2003_v21 }
 0x777   :  { %v2008_v27 = vadd.f32 %v2006_v53, %v1994_v29 }
 0x778   :  { %v2171_v13 = vpop.permute.xlu2 %2170 }
 0x779   :  { %v2022_v55 = vadd.f32 %v2020_v3, %v2008_v27  ;;  %v2174_v54 = vmul.f32 %v4461_v63, %v2171_v13 }
 0x77b   :  { %v2036_v18 = vadd.f32 %v2034_v42, %v2022_v55 }
 0x77d   :  { %v2050_v19 = vadd.f32 %v2048_v35, %v2036_v18  ;;  %v2213_v31 = vpop.permute.xlu0 %2212 }
 0x77e   :  { %v2059_v16 = vpop.permute.xlu1 %2058  ;;  %v2216_v5 = vmul.f32 %v4494_v26, %v2213_v31 }
 0x77f   :  { %v2062_v17 = vmul.f32 %v4381_v23, %v2059_v16  ;;  %v4839_v16 = vld [vmem:[#allocation5_spill] sm:$0xff] }
 0x781   :  { %v2064_v57 = vadd.f32 %v2062_v17, %v2050_v19 }
 0x786   :  { %v2255_v26 = vpop.permute.xlu0 %2254 }
 0x787   :  { %v2073_v34 = vpop.permute.xlu1 %2072  ;;  %v2258_v36 = vmul.f32 %v4520_v50, %v2255_v26 }
 0x788   :  { %v2076_v43 = vmul.f32 %v4386_v24, %v2073_v34  ;;  %v2185_v24 = vpop.permute.xlu2 %2184  ;;  %v4840_v34 = vld [vmem:[#allocation9_spill] sm:$0xff] }
 0x789   :  { %v2188_v2 = vmul.f32 %v4473_v48, %v2185_v24 }
 0x78a   :  { %v2078_v52 = vadd.f32 %v2076_v43, %v2064_v57 }
 0x78c   :  { %v2092_v32 = vadd.f32 %v2090_v58, %v2078_v52 }
 0x78e   :  { %v2106_v59 = vadd.f32 %v2104_v49, %v2092_v32 }
 0x790   :  { %v2129_v46 = vpop.permute.xlu1 %2128  ;;  %v2120_v39 = vadd.f32 %v2118_v12, %v2106_v59  ;;  %v2241_v41 = vpop.permute.xlu2 %2240 }
 0x791   :  { %v2132_v23 = vmul.f32 %v4423_v15, %v2129_v46  ;;  %v2244_v60 = vmul.f32 %v4513_v38, %v2241_v41 }
 0x793   :  { %v2134_v47 = vadd.f32 %v2132_v23, %v2120_v39 }
 0x798   :  { %v2438_v1 = vpop.permute.xlu2 %2437 }
 0x799   :  { %v2143_v8 = vpop.permute.xlu1 %2142 }
 0x79a   :  { %v2146_v62 = vmul.f32 %v4428_v7, %v2143_v8 }
 0x79c   :  { %v2148_v28 = vadd.f32 %v2146_v62, %v2134_v47 }
 0x79e   :  { %v2162_v44 = vadd.f32 %v2160_v51, %v2148_v28 }
 0x7a0   :  { %v2176_v22 = vadd.f32 %v2174_v54, %v2162_v44  ;;  %v2456_v29 = vpop.permute.xlu2 %2455 }
 0x7a1   :  { %v2459_v6 = vmul.f32 %v2456_v29, %v4839_v16 }
 0x7a2   :  { %v2199_v25 = vpop.permute.xlu1 %2198  ;;  %v2190_v10 = vadd.f32 %v2188_v2, %v2176_v22 }
 0x7a3   :  { %v2202_v15 = vmul.f32 %v4489_v56, %v2199_v25 }
 0x7a5   :  { %v2204_v7 = vadd.f32 %v2202_v15, %v2190_v10 }
 0x7a7   :  { %v2218_v63 = vadd.f32 %v2216_v5, %v2204_v7 }
 0x7ab   :  { %v2227_v33 = vpop.permute.xlu1 %2226 }
 0x7ac   :  { %v2230_v20 = vmul.f32 %v4500_v11, %v2227_v33  ;;  %v4838_v11 = vld [vmem:[#allocation7_spill] sm:$0xff] }
 0x7ad   :  { %v2441_v0 = vmul.f32 %v2438_v1, %v4838_v11 }
 0x7ae   :  { %v2232_v21 = vadd.f32 %v2230_v20, %v2218_v63 }
 0x7b0   :  { %v2246_v53 = vadd.f32 %v2244_v60, %v2232_v21 }
 0x7b2   :  { %v2260_v38 = vadd.f32 %v2258_v36, %v2246_v53 }
 0x7b4   :  { %v2422_v40 = vpop.permute.xlu1 %2421 }
 0x7b5   :  { %v2506_v30 = vpop.f32.mrf.mxu3  ;;  %v2425_v56 = vmul.f32 %v2422_v40, %v4837_v14 }
 0x7b6   :  { %v2507_v48 = vadd.f32 %v2891_v61, %v2506_v30 }
 0x7b7   :  { %v2443_v27 = vadd.f32 %v2441_v0, %v2425_v56 }
 0x7b8   :  { %2562 = vrot.lane.b32.xlu2 %v2507_v48, %s2978_s12  ;;  %2552 = vrot.lane.b32.xlu0 %v2507_v48, %s2979_s15  ;;  %v2704_v50 = vmul.f32 -1.442695, %v2507_v48 }
 0x7b9   :  { %v2461_v42 = vadd.f32 %v2459_v6, %v2443_v27 }
 0x7ba   :  { %2924 = vpow2.f32 %v2704_v50 }
 0x7bd   :  { %v2269_v3 = vpop.permute.xlu1 %2268 }
 0x7be   :  { %v2272_v55 = vmul.f32 %v4530_v4, %v2269_v3 }
 0x7c0   :  { %v2274_v18 = vadd.f32 %v2272_v55, %v2260_v38  ;;  %v2925_v17 = vpop.eup %2924 }
 0x7c1   :  { %v2518_v9 = vadd.f32 1.0, %v2925_v17 }
 0x7c2   :  { %v2463_v35 = vadd.f32 %v2461_v42, %v2274_v18 }
 0x7c3   :  { %2926 = vrcp.f32 %v2518_v9  ;;  %v2531_v58 = vand.u32 2147483648, %v2518_v9  ;;  %vm2525_vm9 = vweird.f32 %v2518_v9  ;;  %v2529_v46 = vand.u32 2147483647, %v2518_v9 }
 0x7c4   :  { %2701 = vst.msk [vmem:[%s4739_s0 + $0x58] sm:$0xff] %vm1078_vm1, %v2463_v35  ;;  %v2474_v19 = vadd.f32 %v2463_v35, %v4840_v34 }
 0x7c5   :  { %v2532_v13 = vor.u32 1.1754944e-38, %v2531_v58  ;;  %vm2530_vm11 = vcmp.eq.f32.partialorder %v2529_v46, 8.507059e+37 }
 0x7c6   :  { %2703 = vmatmul.msk.f32.gmra.mxu3 %vm1078_vm1, %v2474_v19  ;;  %vm4841_vm1 = vcmask 15360  }
 0x7c7   :  { %vm4842_vm15 = vmmov %vm4841_vm1 }
 0x7c9   :  { %v2927_v43 = vpop.eup %2926 }
 0x7ca   :  { %v2521_v57 = vmul.f32 %v2927_v43, %v2518_v9  ;;  %vm2526_vm8 = vweird.f32 %v2927_v43 }
 0x7cb   :  { %vm2527_vm10 = vmor %vm2525_vm9, %vm2526_vm8 }
 0x7cc   :  { %v2522_v4 = vsub.f32 1.0, %v2521_v57 }
 0x7ce   :  { %v2523_v37 = vmul.f32 %v2927_v43, %v2522_v4 }
 0x7d0   :  { %v2524_v52 = vadd.f32 %v2927_v43, %v2523_v37 }
 0x7d2   :  { %v2528_v32 = vsel %vm2527_vm10, %v2927_v43, %v2524_v52 }
 0x7d3   :  { %v2533_v49 = vsel %vm2530_vm11, %v2532_v13, %v2528_v32 }
 0x7d4   :  { %v2560_v12 = vsub.f32 1.0, %v2533_v49 }
 0x812   :  { %v2563_v59 = vpop.permute.xlu2 %2562 }
 0x813   :  { %v2568_v39 = vmul.f32 %v2563_v59, %v2560_v12 }
 0x82a   :  { %v2553_v8 = vpop.permute.xlu0 %2552 }
 0x82b   :  { %v2558_v23 = vmul.f32 %v2553_v8, %v2533_v49 }
 0x82d   :  { %v2570_v62 = vadd.f32 %v2568_v39, %v2558_v23 }
 0x82f   :  { %2572 = vst.msk [vmem:[%s4634_s19] sm:$0xff] %vm4841_vm1, %v2570_v62 }
 0x849   :  { %v2509_v24 = vpop.f32.mrf.mxu3 }
 0x84a   :  { %v2510_v47 = vadd.f32 %v2891_v61, %v2509_v24 }
 0x84c   :  { %2564 = vrot.lane.b32.xlu0 %v2510_v47, %s2978_s12  ;;  %2554 = vrot.lane.b32.xlu1 %v2510_v47, %s2979_s15  ;;  %v2705_v45 = vmul.f32 -1.442695, %v2510_v47 }
 0x84e   :  { %2928 = vpow2.f32 %v2705_v45 }
 0x854   :  { %v2929_v28 = vpop.eup %2928 }
 0x855   :  { %v2519_v51 = vadd.f32 1.0, %v2929_v28 }
 0x857   :  { %2930 = vrcp.f32 %v2519_v51  ;;  %v2546_v2 = vand.u32 2147483648, %v2519_v51  ;;  %vm2540_vm0 = vweird.f32 %v2519_v51  ;;  %v2544_v33 = vand.u32 2147483647, %v2519_v51 }
 0x859   :  { %v2547_v15 = vor.u32 1.1754944e-38, %v2546_v2  ;;  %vm2545_vm14 = vcmp.eq.f32.partialorder %v2544_v33, 8.507059e+37 }
 0x85d   :  { %v2931_v25 = vpop.eup %2930 }
 0x85e   :  { %v2536_v44 = vmul.f32 %v2931_v25, %v2519_v51  ;;  %vm2541_vm12 = vweird.f32 %v2931_v25 }
 0x85f   :  { %vm2542_vm13 = vmor %vm2540_vm0, %vm2541_vm12 }
 0x860   :  { %v2537_v54 = vsub.f32 1.0, %v2536_v44 }
 0x862   :  { %v2538_v41 = vmul.f32 %v2931_v25, %v2537_v54 }
 0x864   :  { %v2539_v22 = vadd.f32 %v2931_v25, %v2538_v41 }
 0x866   :  { %v2543_v10 = vsel %vm2542_vm13, %v2931_v25, %v2539_v22 }
 0x867   :  { %v2548_v31 = vsel %vm2545_vm14, %v2547_v15, %v2543_v10 }
 0x868   :  { %v2561_v7 = vsub.f32 1.0, %v2548_v31 }
 0x8be   :  { %v2565_v1 = vpop.permute.xlu0 %2564  ;;  %v2555_v5 = vpop.permute.xlu1 %2554 }
 0x8bf   :  { %v2569_v20 = vmul.f32 %v2565_v1, %v2561_v7  ;;  %v2559_v61 = vmul.f32 %v2555_v5, %v2548_v31 }
 0x8c1   :  { %v2571_v63 = vadd.f32 %v2569_v20, %v2559_v61 }
 0x8c3   :  { %2573 = vst.msk [vmem:[%s4634_s19 + $0x8] sm:$0xff] %vm4842_vm15, %v2571_v63 }

</bundles_post_ra>
